<compile_context>
chip_gen: v7x
topology: tpu7x:2x2x1
jax: 0.10.0
libtpu: 0.0.40
codegen_flags: <defaults>
</compile_context>

<pallas_src>
import jax
import jax.numpy as jnp
from jax.experimental import pallas as pl
from jax.experimental.pallas import tpu as pltpu

NEG_SLOPE = 0.01  # torch.nn.functional.leaky_relu default


def _leaky(v):
    return jnp.where(v > 0, v, NEG_SLOPE * v)


# --------------------------- kernel -----------------------------------------
def _block_series_kernel(x_ref, w_ref, b_ref, o_ref, pad_ref):
    """All ResidualBlock3D blocks applied to TB (batch, depth) slices.

    x_ref   : (TB, H, W*C)              f32 activations, lane-dense
    w_ref   : (n_blocks, 3*W*C, W*C)    bf16 fused kh-band weight matrices
    b_ref   : (n_blocks, 1, W*C)        f32 bias tiled over W
    o_ref   : (TB, H, W*C)              f32 output
    pad_ref : (TB, H+2, W*C)            bf16 scratch for the +-1 H shift
    """
    TB, H, WC = o_ref.shape
    n_blocks = b_ref.shape[0]
    M = TB * H

    # Zero only the two padding border rows.  Re-done every grid step so the
    # kernel has no cross-step scratch dependence (safe under megacore
    # "parallel" splitting).  The interior is overwritten before every use.
    zrow = jnp.zeros((TB, 1, WC), jnp.bfloat16)
    pad_ref[:, 0:1, :] = zrow
    pad_ref[:, H + 1:H + 2, :] = zrow

    def conv(v, blk):
        # One Conv3d((1,3,3), pad (0,1,1)) + bias on a (TB, H, WC) f32 input,
        # realized as a single MXU matmul with K = 3*WC.
        pad_ref[:, 1:H + 1, :] = v.astype(jnp.bfloat16)  # borders stay zero
        # Lane-block concatenation of the three H-shifted slabs:
        #   kh = 0 -> x[h-1], kh = 1 -> x[h], kh = 2 -> x[h+1] (zero outside).
        opnd = jnp.concatenate(
            [pad_ref[:, 0:H, :].reshape(M, WC),
             pad_ref[:, 1:H + 1, :].reshape(M, WC),
             pad_ref[:, 2:H + 2, :].reshape(M, WC)],
            axis=-1)                                      # (M, 3*WC) bf16
        acc = jnp.dot(opnd, w_ref[blk],
                      preferred_element_type=jnp.float32)  # (M, WC) f32
        acc = acc + b_ref[blk]                             # (M, WC) + (1, WC)
        return acc.reshape(TB, H, WC)

    x = x_ref[...]
    # Static unroll is fine for small n_blocks; switch to lax.fori_loop with
    # dynamic w_ref[blk] indexing if n_blocks grows beyond a handful.
    for blk in range(n_blocks):
        # ResidualBlock3D.forward: conv1+act, conv1+act (again), +residual, act
        y = _leaky(conv(x, blk))
        y = _leaky(conv(y, blk))
        x = _leaky(y + x)
    o_ref[...] = x.astype(o_ref.dtype)


# --------------------------- chip-aware sizing -------------------------------
def _chip_config():
    """(vmem_limit_bytes, num_tensorcores) with safe fallbacks everywhere."""
    kind = ""
    try:
        kind = jax.devices()[0].device_kind.lower()
    except Exception:
        pass
    is_v7 = "v7" in kind
    # v7x has 2 TensorCores per chip (so do v4 / v5p megacore devices);
    # v5e / v6e are single-TC, where extra grid steps are pure overhead.
    num_tc = 2 if (is_v7 or "v4" in kind or "v5p" in kind) else 1
    # v7x has only 64 MiB physical VMEM per TC -> leave headroom; v5e/v6e have
    # 128 MiB so 64 MiB scoped is comfortable.
    vmem_limit = (48 << 20) if is_v7 else (64 << 20)
    try:  # refine from the hardware query when available
        cap = int(pltpu.get_tpu_info().vmem_capacity_bytes)
        vmem_limit = min(vmem_limit, (cap * 3) // 4)
    except Exception:
        pass
    return vmem_limit, num_tc


def _pick_tb(nd, h, wc, itemsize, block_budget_bytes, min_grid):
    """Largest divisor of nd whose (tb, H, W*C) block stays under the budget.
    On multi-TC chips prefer (when possible) a grid of length >= min_grid so
    both cores get work; on single-TC chips just take the largest block."""
    per_slice = max(1, h * wc * itemsize)
    max_tb = max(1, block_budget_bytes // per_slice)
    divisors = [d for d in range(1, nd + 1) if nd % d == 0]
    feasible = [d for d in divisors if d <= max_tb] or [1]
    if min_grid > 1:
        pref = [d for d in feasible if nd // d >= min_grid]
        if pref:
            return max(pref)
    return max(feasible)


# --------------------------- pallas_call wrapper -----------------------------
def _block_series_pallas(x, w_fused, bias_wc):
    """x: (N*D, H, W*C) f32 -> same shape."""
    ND, H, WC = x.shape
    n_blocks = bias_wc.shape[0]
    vmem_limit, num_tc = _chip_config()
    # Peak VMEM ~ (double-buffered in/out + bf16 pad scratch + live
    # f32/bf16 temporaries) ~= 9-10x the block bytes, plus the weights.
    tb = _pick_tb(ND, H, WC, itemsize=x.dtype.itemsize,
                  block_budget_bytes=vmem_limit // 10, min_grid=num_tc)
    grid = (ND // tb,)
    return pl.pallas_call(
        _block_series_kernel,
        out_shape=jax.ShapeDtypeStruct((ND, H, WC), x.dtype),
        grid_spec=pltpu.PrefetchScalarGridSpec(
            num_scalar_prefetch=0,
            grid=grid,
            in_specs=[
                pl.BlockSpec((tb, H, WC), lambda i: (i, 0, 0)),
                pl.BlockSpec((n_blocks, 3 * WC, WC), lambda i: (0, 0, 0)),
                pl.BlockSpec((n_blocks, 1, WC), lambda i: (0, 0, 0)),
            ],
            out_specs=pl.BlockSpec((tb, H, WC), lambda i: (i, 0, 0)),
            scratch_shapes=[
                pltpu.VMEM((tb, H + 2, WC), jnp.bfloat16),
            ],
        ),
        compiler_params=pltpu.CompilerParams(
            dimension_semantics=("parallel",),
            vmem_limit_bytes=vmem_limit,
        ),
    )(x, w_fused, bias_wc)


# --------------------------- parameter packing -------------------------------
def _pack_block_params(block_params, W):
    """Pack per-block conv1 weights (kh, kw, cin, cout) into fused band mats.

    Returns:
      w_fused : (n_blocks, 3*W*C, W*C) bf16.  Row kh*W*C + win*C + cin, column
                wout*C + cout holds w[kh, win-wout+1, cin, cout] inside the
                +-1 band and 0 outside, implementing both the kw taps and the
                zero padding along W; the kh taps are stacked along K so the
                whole 3x3 conv is one matmul.
      bias_wc : (n_blocks, 1, W*C) f32, bias tiled over W.
    """
    ws, bs = [], []
    for (w, b) in block_params:
        C = w.shape[2]
        kh_bands = []
        for kh in range(3):
            m = sum(jnp.kron(jnp.eye(W, k=1 - kw, dtype=w.dtype), w[kh, kw])
                    for kw in range(3))
            kh_bands.append(m)
        ws.append(jnp.concatenate(kh_bands, axis=0))            # (3*W*C, W*C)
        bs.append(jnp.tile(b.reshape(-1), W).reshape(1, W * C))
    w_fused = jnp.stack(ws).astype(jnp.bfloat16)
    bias_wc = jnp.stack(bs).astype(jnp.float32)
    return w_fused, bias_wc


# --------------------------- entry points ------------------------------------
def block_series_3d_forward_channels_last(x_ndhwc, block_params):
    """Preferred entry: x (N, D, H, W, C) -> (N, D, H, W, C), no transposes.
    Keeping the surrounding model channels-last means the activations touch
    HBM exactly once for this whole block series."""
    N, D, H, W, C = x_ndhwc.shape
    x = x_ndhwc.reshape(N * D, H, W * C)
    w_fused, bias_wc = _pack_block_params(block_params, W)
    y = _block_series_pallas(x, w_fused, bias_wc)
    return y.reshape(N, D, H, W, C)


def block_series_3d_forward(x_ncdhw, block_params):
    """PyTorch-layout adapter: x (N, C, D, H, W) -> (N, C, D, H, W).
    The transposes exist only for NCDHW API parity; a channels-last model
    should call block_series_3d_forward_channels_last directly."""
    N, C, D, H, W = x_ncdhw.shape
    x = jnp.transpose(x_ncdhw, (0, 2, 3, 4, 1))           # (N, D, H, W, C)
    y = block_series_3d_forward_channels_last(x, block_params)
    return jnp.transpose(y, (0, 4, 1, 2, 3))


# ----------------------- pure-JAX references (for checking) ------------------
def block_series_3d_reference(x_ncdhw, block_params, matmul_dtype=jnp.float32):
    """Reference.  matmul_dtype=bfloat16 mirrors the kernel's operand casting
    (f32 accumulation), enabling a tight comparison."""
    x = x_ncdhw
    for (w, b) in block_params:
        # (kh, kw, cin, cout) -> OIDHW with kD = 1
        w_oidhw = jnp.transpose(w, (3, 2, 0, 1))[:, :, None, :, :]
        w_oidhw = w_oidhw.astype(matmul_dtype)
        bias = b.reshape(1, -1, 1, 1, 1).astype(jnp.float32)

        def conv(v):
            y = jax.lax.conv_general_dilated(
                v.astype(matmul_dtype), w_oidhw, window_strides=(1, 1, 1),
                padding=((0, 0), (1, 1), (1, 1)),
                dimension_numbers=("NCDHW", "OIDHW", "NCDHW"),
                preferred_element_type=jnp.float32)
            return y + bias

        residual = x
        y = _leaky(conv(x))
        y = _leaky(conv(y))
        x = _leaky(y + residual)
    return x


# ----------------------------- main -----------------------------------------
if __name__ == "__main__":
    N, C, D, H, W = 2, 16, 4, 16, 16
    n_blocks = 2

    key = jax.random.PRNGKey(0)
    key, kx = jax.random.split(key)
    x = jax.random.normal(kx, (N, C, D, H, W), dtype=jnp.float32)

    # Deterministic synthetic parameters.  Each ResidualBlock3D owns
    # convolution_1 (used twice in forward) and convolution_2 (never used in
    # forward, so it is not materialized here).
    block_params = []
    for _ in range(n_blocks):
        key, kw1, kb1 = jax.random.split(key, 3)
        w1 = 0.1 * jax.random.normal(kw1, (3, 3, C, C), dtype=jnp.float32)
        b1 = 0.1 * jax.random.normal(kb1, (1, C), dtype=jnp.float32)
        block_params.append((w1, b1))

    out = jax.block_until_ready(block_series_3d_forward(x, block_params))
    assert out.shape == (N, C, D, H, W), out.shape

    # Tight check against a reference that mirrors the kernel's bf16 operand
    # casting (f32 accumulation), plus a loose sanity check against pure f32.
    ref_bf16 = jax.block_until_ready(
        block_series_3d_reference(x, block_params, matmul_dtype=jnp.bfloat16))
    ref_f32 = jax.block_until_ready(
        block_series_3d_reference(x, block_params, matmul_dtype=jnp.float32))

    err_bf16 = float(jnp.max(jnp.abs(out - ref_bf16)))
    err_f32 = float(jnp.max(jnp.abs(out - ref_f32)))
    assert jnp.allclose(out, ref_bf16, rtol=2e-2, atol=2e-2), err_bf16
    assert jnp.allclose(out, ref_f32, rtol=1e-1, atol=1e-1), err_f32

    print("KERNEL_OK")
</pallas_src>

<mosaic_0001>
module attributes {stable_mosaic.version = 11 : i64} {
  func.func @_block_series_kernel(%arg0: i32, %arg1: memref<8x16x256xf32, #tpu.memory_space<vmem>>, %arg2: memref<2x768x256xbf16, #tpu.memory_space<vmem>>, %arg3: memref<2x1x256xf32, #tpu.memory_space<vmem>>, %arg4: memref<8x16x256xf32, #tpu.memory_space<vmem>>, %arg5: memref<8x18x256xbf16, #tpu.memory_space<vmem>>) attributes {dimension_semantics = [#tpu.dimension_semantics<parallel>], iteration_bounds = array<i64: 1>, scalar_prefetch = 0 : i64, scratch_operands = 1 : i64, tpu.core_type = #tpu.core_type<tc>, window_params = [{transform_indices = @transform_0, window_bounds = array<i64: 8, 16, 256>}, {pipeline_mode = #tpu.pipeline_mode<synchronous>, transform_indices = @transform_1, window_bounds = array<i64: 2, 768, 256>}, {pipeline_mode = #tpu.pipeline_mode<synchronous>, transform_indices = @transform_2, window_bounds = array<i64: 2, 1, 256>}, {transform_indices = @transform_3, window_bounds = array<i64: 8, 16, 256>}]} {
    %cst = arith.constant 0.000000e+00 : bf16
    %0 = vector.broadcast %cst : bf16 to vector<8x1x256xbf16>
    %c0 = arith.constant 0 : index
    %c0_0 = arith.constant 0 : index
    %c0_1 = arith.constant 0 : index
    %1 = vector.load %arg5[%c0, %c0_0, %c0_1] : memref<8x18x256xbf16, #tpu.memory_space<vmem>>, vector<8x1x256xbf16>
    tpu.vector_store %arg5[%c0, %c0_0, %c0_1], %0 {strides = array<i32>} : memref<8x18x256xbf16, #tpu.memory_space<vmem>>, vector<8x1x256xbf16>,
    %c0_2 = arith.constant 0 : index
    %c17 = arith.constant 17 : index
    %c0_3 = arith.constant 0 : index
    %2 = vector.load %arg5[%c0_2, %c17, %c0_3] : memref<8x18x256xbf16, #tpu.memory_space<vmem>>, vector<8x1x256xbf16>
    tpu.vector_store %arg5[%c0_2, %c17, %c0_3], %0 {strides = array<i32>} : memref<8x18x256xbf16, #tpu.memory_space<vmem>>, vector<8x1x256xbf16>,
    %c0_4 = arith.constant 0 : index
    %c0_5 = arith.constant 0 : index
    %c0_6 = arith.constant 0 : index
    %3 = vector.load %arg1[%c0_4, %c0_5, %c0_6] : memref<8x16x256xf32, #tpu.memory_space<vmem>>, vector<8x16x256xf32>
    %4 = arith.truncf %3 : vector<8x16x256xf32> to vector<8x16x256xbf16>
    %c0_7 = arith.constant 0 : index
    %c1 = arith.constant 1 : index
    %c0_8 = arith.constant 0 : index
    %5 = vector.load %arg5[%c0_7, %c1, %c0_8] : memref<8x18x256xbf16, #tpu.memory_space<vmem>>, vector<8x16x256xbf16>
    tpu.vector_store %arg5[%c0_7, %c1, %c0_8], %4 {strides = array<i32>} : memref<8x18x256xbf16, #tpu.memory_space<vmem>>, vector<8x16x256xbf16>,
    %c0_9 = arith.constant 0 : index
    %c0_10 = arith.constant 0 : index
    %c0_11 = arith.constant 0 : index
    %6 = vector.load %arg5[%c0_9, %c0_10, %c0_11] : memref<8x18x256xbf16, #tpu.memory_space<vmem>>, vector<8x16x256xbf16>
    %7 = vector.shape_cast %6 : vector<8x16x256xbf16> to vector<128x256xbf16>
    %c0_12 = arith.constant 0 : index
    %c1_13 = arith.constant 1 : index
    %c0_14 = arith.constant 0 : index
    %8 = vector.load %arg5[%c0_12, %c1_13, %c0_14] : memref<8x18x256xbf16, #tpu.memory_space<vmem>>, vector<8x16x256xbf16>
    %9 = vector.shape_cast %8 : vector<8x16x256xbf16> to vector<128x256xbf16>
    %c0_15 = arith.constant 0 : index
    %c2 = arith.constant 2 : index
    %c0_16 = arith.constant 0 : index
    %10 = vector.load %arg5[%c0_15, %c2, %c0_16] : memref<8x18x256xbf16, #tpu.memory_space<vmem>>, vector<8x16x256xbf16>
    %11 = vector.shape_cast %10 : vector<8x16x256xbf16> to vector<128x256xbf16>
    %12 = tpu.concatenate %7, %9, %11 in 1 : vector<128x256xbf16>, vector<128x256xbf16>, vector<128x256xbf16> -> vector<128x768xbf16>
    %c0_17 = arith.constant 0 : index
    %c0_18 = arith.constant 0 : index
    %c0_19 = arith.constant 0 : index
    %13 = vector.load %arg2[%c0_17, %c0_18, %c0_19] : memref<2x768x256xbf16, #tpu.memory_space<vmem>>, vector<1x768x256xbf16>
    %14 = vector.shape_cast %13 : vector<1x768x256xbf16> to vector<768x256xbf16>
    %cst_20 = arith.constant dense<0.000000e+00> : vector<128x256xf32>
    %15 = tpu.matmul %12, %14, %cst_20 {dimension_numbers = #tpu.dot_dimension_numbers<[1], [0], [0], [1], [0, 0, 1, 1], [], []>} : vector<128x768xbf16>, vector<768x256xbf16>, vector<128x256xf32> -> vector<128x256xf32>
    %c0_21 = arith.constant 0 : index
    %c0_22 = arith.constant 0 : index
    %c0_23 = arith.constant 0 : index
    %16 = vector.load %arg3[%c0_21, %c0_22, %c0_23] : memref<2x1x256xf32, #tpu.memory_space<vmem>>, vector<1x1x256xf32>
    %17 = vector.shape_cast %16 : vector<1x1x256xf32> to vector<1x256xf32>
    %18 = vector.broadcast %17 : vector<1x256xf32> to vector<128x256xf32>
    %19 = arith.addf %15, %18 : vector<128x256xf32>
    %20 = vector.shape_cast %19 : vector<128x256xf32> to vector<8x16x256xf32>
    %cst_24 = arith.constant 0.000000e+00 : f32
    %21 = vector.broadcast %cst_24 : f32 to vector<8x16x256xf32>
    %22 = arith.cmpf ogt, %20, %21 : vector<8x16x256xf32>
    %cst_25 = arith.constant 0.00999999977 : f32
    %23 = vector.broadcast %cst_25 : f32 to vector<8x16x256xf32>
    %24 = arith.mulf %23, %20 : vector<8x16x256xf32>
    %25 = arith.select %22, %20, %24 : vector<8x16x256xi1>, vector<8x16x256xf32>
    %26 = arith.truncf %25 : vector<8x16x256xf32> to vector<8x16x256xbf16>
    %c0_26 = arith.constant 0 : index
    %c1_27 = arith.constant 1 : index
    %c0_28 = arith.constant 0 : index
    %27 = vector.load %arg5[%c0_26, %c1_27, %c0_28] : memref<8x18x256xbf16, #tpu.memory_space<vmem>>, vector<8x16x256xbf16>
    tpu.vector_store %arg5[%c0_26, %c1_27, %c0_28], %26 {strides = array<i32>} : memref<8x18x256xbf16, #tpu.memory_space<vmem>>, vector<8x16x256xbf16>,
    %c0_29 = arith.constant 0 : index
    %c0_30 = arith.constant 0 : index
    %c0_31 = arith.constant 0 : index
    %28 = vector.load %arg5[%c0_29, %c0_30, %c0_31] : memref<8x18x256xbf16, #tpu.memory_space<vmem>>, vector<8x16x256xbf16>
    %29 = vector.shape_cast %28 : vector<8x16x256xbf16> to vector<128x256xbf16>
    %c0_32 = arith.constant 0 : index
    %c1_33 = arith.constant 1 : index
    %c0_34 = arith.constant 0 : index
    %30 = vector.load %arg5[%c0_32, %c1_33, %c0_34] : memref<8x18x256xbf16, #tpu.memory_space<vmem>>, vector<8x16x256xbf16>
    %31 = vector.shape_cast %30 : vector<8x16x256xbf16> to vector<128x256xbf16>
    %c0_35 = arith.constant 0 : index
    %c2_36 = arith.constant 2 : index
    %c0_37 = arith.constant 0 : index
    %32 = vector.load %arg5[%c0_35, %c2_36, %c0_37] : memref<8x18x256xbf16, #tpu.memory_space<vmem>>, vector<8x16x256xbf16>
    %33 = vector.shape_cast %32 : vector<8x16x256xbf16> to vector<128x256xbf16>
    %34 = tpu.concatenate %29, %31, %33 in 1 : vector<128x256xbf16>, vector<128x256xbf16>, vector<128x256xbf16> -> vector<128x768xbf16>
    %c0_38 = arith.constant 0 : index
    %c0_39 = arith.constant 0 : index
    %c0_40 = arith.constant 0 : index
    %35 = vector.load %arg2[%c0_38, %c0_39, %c0_40] : memref<2x768x256xbf16, #tpu.memory_space<vmem>>, vector<1x768x256xbf16>
    %36 = vector.shape_cast %35 : vector<1x768x256xbf16> to vector<768x256xbf16>
    %cst_41 = arith.constant dense<0.000000e+00> : vector<128x256xf32>
    %37 = tpu.matmul %34, %36, %cst_41 {dimension_numbers = #tpu.dot_dimension_numbers<[1], [0], [0], [1], [0, 0, 1, 1], [], []>} : vector<128x768xbf16>, vector<768x256xbf16>, vector<128x256xf32> -> vector<128x256xf32>
    %c0_42 = arith.constant 0 : index
    %c0_43 = arith.constant 0 : index
    %c0_44 = arith.constant 0 : index
    %38 = vector.load %arg3[%c0_42, %c0_43, %c0_44] : memref<2x1x256xf32, #tpu.memory_space<vmem>>, vector<1x1x256xf32>
    %39 = vector.shape_cast %38 : vector<1x1x256xf32> to vector<1x256xf32>
    %40 = vector.broadcast %39 : vector<1x256xf32> to vector<128x256xf32>
    %41 = arith.addf %37, %40 : vector<128x256xf32>
    %42 = vector.shape_cast %41 : vector<128x256xf32> to vector<8x16x256xf32>
    %cst_45 = arith.constant 0.000000e+00 : f32
    %43 = vector.broadcast %cst_45 : f32 to vector<8x16x256xf32>
    %44 = arith.cmpf ogt, %42, %43 : vector<8x16x256xf32>
    %cst_46 = arith.constant 0.00999999977 : f32
    %45 = vector.broadcast %cst_46 : f32 to vector<8x16x256xf32>
    %46 = arith.mulf %45, %42 : vector<8x16x256xf32>
    %47 = arith.select %44, %42, %46 : vector<8x16x256xi1>, vector<8x16x256xf32>
    %48 = arith.addf %47, %3 : vector<8x16x256xf32>
    %cst_47 = arith.constant 0.000000e+00 : f32
    %49 = vector.broadcast %cst_47 : f32 to vector<8x16x256xf32>
    %50 = arith.cmpf ogt, %48, %49 : vector<8x16x256xf32>
    %cst_48 = arith.constant 0.00999999977 : f32
    %51 = vector.broadcast %cst_48 : f32 to vector<8x16x256xf32>
    %52 = arith.mulf %51, %48 : vector<8x16x256xf32>
    %53 = arith.select %50, %48, %52 : vector<8x16x256xi1>, vector<8x16x256xf32>
    %54 = arith.truncf %53 : vector<8x16x256xf32> to vector<8x16x256xbf16>
    %c0_49 = arith.constant 0 : index
    %c1_50 = arith.constant 1 : index
    %c0_51 = arith.constant 0 : index
    %55 = vector.load %arg5[%c0_49, %c1_50, %c0_51] : memref<8x18x256xbf16, #tpu.memory_space<vmem>>, vector<8x16x256xbf16>
    tpu.vector_store %arg5[%c0_49, %c1_50, %c0_51], %54 {strides = array<i32>} : memref<8x18x256xbf16, #tpu.memory_space<vmem>>, vector<8x16x256xbf16>,
    %c0_52 = arith.constant 0 : index
    %c0_53 = arith.constant 0 : index
    %c0_54 = arith.constant 0 : index
    %56 = vector.load %arg5[%c0_52, %c0_53, %c0_54] : memref<8x18x256xbf16, #tpu.memory_space<vmem>>, vector<8x16x256xbf16>
    %57 = vector.shape_cast %56 : vector<8x16x256xbf16> to vector<128x256xbf16>
    %c0_55 = arith.constant 0 : index
    %c1_56 = arith.constant 1 : index
    %c0_57 = arith.constant 0 : index
    %58 = vector.load %arg5[%c0_55, %c1_56, %c0_57] : memref<8x18x256xbf16, #tpu.memory_space<vmem>>, vector<8x16x256xbf16>
    %59 = vector.shape_cast %58 : vector<8x16x256xbf16> to vector<128x256xbf16>
    %c0_58 = arith.constant 0 : index
    %c2_59 = arith.constant 2 : index
    %c0_60 = arith.constant 0 : index
    %60 = vector.load %arg5[%c0_58, %c2_59, %c0_60] : memref<8x18x256xbf16, #tpu.memory_space<vmem>>, vector<8x16x256xbf16>
    %61 = vector.shape_cast %60 : vector<8x16x256xbf16> to vector<128x256xbf16>
    %62 = tpu.concatenate %57, %59, %61 in 1 : vector<128x256xbf16>, vector<128x256xbf16>, vector<128x256xbf16> -> vector<128x768xbf16>
    %c1_61 = arith.constant 1 : index
    %c0_62 = arith.constant 0 : index
    %c0_63 = arith.constant 0 : index
    %63 = vector.load %arg2[%c1_61, %c0_62, %c0_63] : memref<2x768x256xbf16, #tpu.memory_space<vmem>>, vector<1x768x256xbf16>
    %64 = vector.shape_cast %63 : vector<1x768x256xbf16> to vector<768x256xbf16>
    %cst_64 = arith.constant dense<0.000000e+00> : vector<128x256xf32>
    %65 = tpu.matmul %62, %64, %cst_64 {dimension_numbers = #tpu.dot_dimension_numbers<[1], [0], [0], [1], [0, 0, 1, 1], [], []>} : vector<128x768xbf16>, vector<768x256xbf16>, vector<128x256xf32> -> vector<128x256xf32>
    %c1_65 = arith.constant 1 : index
    %c0_66 = arith.constant 0 : index
    %c0_67 = arith.constant 0 : index
    %66 = vector.load %arg3[%c1_65, %c0_66, %c0_67] : memref<2x1x256xf32, #tpu.memory_space<vmem>>, vector<1x1x256xf32>
    %67 = vector.shape_cast %66 : vector<1x1x256xf32> to vector<1x256xf32>
    %68 = vector.broadcast %67 : vector<1x256xf32> to vector<128x256xf32>
    %69 = arith.addf %65, %68 : vector<128x256xf32>
    %70 = vector.shape_cast %69 : vector<128x256xf32> to vector<8x16x256xf32>
    %cst_68 = arith.constant 0.000000e+00 : f32
    %71 = vector.broadcast %cst_68 : f32 to vector<8x16x256xf32>
    %72 = arith.cmpf ogt, %70, %71 : vector<8x16x256xf32>
    %cst_69 = arith.constant 0.00999999977 : f32
    %73 = vector.broadcast %cst_69 : f32 to vector<8x16x256xf32>
    %74 = arith.mulf %73, %70 : vector<8x16x256xf32>
    %75 = arith.select %72, %70, %74 : vector<8x16x256xi1>, vector<8x16x256xf32>
    %76 = arith.truncf %75 : vector<8x16x256xf32> to vector<8x16x256xbf16>
    %c0_70 = arith.constant 0 : index
    %c1_71 = arith.constant 1 : index
    %c0_72 = arith.constant 0 : index
    %77 = vector.load %arg5[%c0_70, %c1_71, %c0_72] : memref<8x18x256xbf16, #tpu.memory_space<vmem>>, vector<8x16x256xbf16>
    tpu.vector_store %arg5[%c0_70, %c1_71, %c0_72], %76 {strides = array<i32>} : memref<8x18x256xbf16, #tpu.memory_space<vmem>>, vector<8x16x256xbf16>,
    %c0_73 = arith.constant 0 : index
    %c0_74 = arith.constant 0 : index
    %c0_75 = arith.constant 0 : index
    %78 = vector.load %arg5[%c0_73, %c0_74, %c0_75] : memref<8x18x256xbf16, #tpu.memory_space<vmem>>, vector<8x16x256xbf16>
    %79 = vector.shape_cast %78 : vector<8x16x256xbf16> to vector<128x256xbf16>
    %c0_76 = arith.constant 0 : index
    %c1_77 = arith.constant 1 : index
    %c0_78 = arith.constant 0 : index
    %80 = vector.load %arg5[%c0_76, %c1_77, %c0_78] : memref<8x18x256xbf16, #tpu.memory_space<vmem>>, vector<8x16x256xbf16>
    %81 = vector.shape_cast %80 : vector<8x16x256xbf16> to vector<128x256xbf16>
    %c0_79 = arith.constant 0 : index
    %c2_80 = arith.constant 2 : index
    %c0_81 = arith.constant 0 : index
    %82 = vector.load %arg5[%c0_79, %c2_80, %c0_81] : memref<8x18x256xbf16, #tpu.memory_space<vmem>>, vector<8x16x256xbf16>
    %83 = vector.shape_cast %82 : vector<8x16x256xbf16> to vector<128x256xbf16>
    %84 = tpu.concatenate %79, %81, %83 in 1 : vector<128x256xbf16>, vector<128x256xbf16>, vector<128x256xbf16> -> vector<128x768xbf16>
    %c1_82 = arith.constant 1 : index
    %c0_83 = arith.constant 0 : index
    %c0_84 = arith.constant 0 : index
    %85 = vector.load %arg2[%c1_82, %c0_83, %c0_84] : memref<2x768x256xbf16, #tpu.memory_space<vmem>>, vector<1x768x256xbf16>
    %86 = vector.shape_cast %85 : vector<1x768x256xbf16> to vector<768x256xbf16>
    %cst_85 = arith.constant dense<0.000000e+00> : vector<128x256xf32>
    %87 = tpu.matmul %84, %86, %cst_85 {dimension_numbers = #tpu.dot_dimension_numbers<[1], [0], [0], [1], [0, 0, 1, 1], [], []>} : vector<128x768xbf16>, vector<768x256xbf16>, vector<128x256xf32> -> vector<128x256xf32>
    %c1_86 = arith.constant 1 : index
    %c0_87 = arith.constant 0 : index
    %c0_88 = arith.constant 0 : index
    %88 = vector.load %arg3[%c1_86, %c0_87, %c0_88] : memref<2x1x256xf32, #tpu.memory_space<vmem>>, vector<1x1x256xf32>
    %89 = vector.shape_cast %88 : vector<1x1x256xf32> to vector<1x256xf32>
    %90 = vector.broadcast %89 : vector<1x256xf32> to vector<128x256xf32>
    %91 = arith.addf %87, %90 : vector<128x256xf32>
    %92 = vector.shape_cast %91 : vector<128x256xf32> to vector<8x16x256xf32>
    %cst_89 = arith.constant 0.000000e+00 : f32
    %93 = vector.broadcast %cst_89 : f32 to vector<8x16x256xf32>
    %94 = arith.cmpf ogt, %92, %93 : vector<8x16x256xf32>
    %cst_90 = arith.constant 0.00999999977 : f32
    %95 = vector.broadcast %cst_90 : f32 to vector<8x16x256xf32>
    %96 = arith.mulf %95, %92 : vector<8x16x256xf32>
    %97 = arith.select %94, %92, %96 : vector<8x16x256xi1>, vector<8x16x256xf32>
    %98 = arith.addf %97, %53 : vector<8x16x256xf32>
    %cst_91 = arith.constant 0.000000e+00 : f32
    %99 = vector.broadcast %cst_91 : f32 to vector<8x16x256xf32>
    %100 = arith.cmpf ogt, %98, %99 : vector<8x16x256xf32>
    %cst_92 = arith.constant 0.00999999977 : f32
    %101 = vector.broadcast %cst_92 : f32 to vector<8x16x256xf32>
    %102 = arith.mulf %101, %98 : vector<8x16x256xf32>
    %103 = arith.select %100, %98, %102 : vector<8x16x256xi1>, vector<8x16x256xf32>
    %c0_93 = arith.constant 0 : index
    %c0_94 = arith.constant 0 : index
    %c0_95 = arith.constant 0 : index
    %104 = vector.load %arg4[%c0_93, %c0_94, %c0_95] : memref<8x16x256xf32, #tpu.memory_space<vmem>>, vector<8x16x256xf32>
    tpu.vector_store %arg4[%c0_93, %c0_94, %c0_95], %103 {strides = array<i32>} : memref<8x16x256xf32, #tpu.memory_space<vmem>>, vector<8x16x256xf32>,
    return
  }
  func.func @transform_0(%arg0: i32) -> (i32, i32, i32) {
    %c0_i32 = arith.constant 0 : i32
    %c0_i32_0 = arith.constant 0 : i32
    %c0_i32_1 = arith.constant 0 : i32
    return %arg0, %c0_i32, %c0_i32_0 : i32, i32, i32
  }
  func.func @transform_1(%arg0: i32) -> (i32, i32, i32) {
    %c0_i32 = arith.constant 0 : i32
    %c0_i32_0 = arith.constant 0 : i32
    %c0_i32_1 = arith.constant 0 : i32
    %c0_i32_2 = arith.constant 0 : i32
    return %c0_i32, %c0_i32_0, %c0_i32_1 : i32, i32, i32
  }
  func.func @transform_2(%arg0: i32) -> (i32, i32, i32) {
    %c0_i32 = arith.constant 0 : i32
    %c0_i32_0 = arith.constant 0 : i32
    %c0_i32_1 = arith.constant 0 : i32
    %c0_i32_2 = arith.constant 0 : i32
    return %c0_i32, %c0_i32_0, %c0_i32_1 : i32, i32, i32
  }
  func.func @transform_3(%arg0: i32) -> (i32, i32, i32) {
    %c0_i32 = arith.constant 0 : i32
    %c0_i32_0 = arith.constant 0 : i32
    %c0_i32_1 = arith.constant 0 : i32
    return %arg0, %c0_i32, %c0_i32_0 : i32, i32, i32
  }
}

</mosaic_0001>

<bundles_post_ra>
// kernel: tpu_custom_call.1
= control target key start
LH: loop header
LB: loop body
LE: loop exit
PB: predicated region body
PF: predicated region fallthrough
CT: control target
= control target key end

     0   :  { %8 = vsyncpa [#allocation4], 0  ;;  %s11524_s0 = inlined_call_operand.hbm [shape: f32[8,16,256], index: 0, kind: input, shape index: {}]   ;;  %s11525_s1 = inlined_call_operand.hbm [shape: bf16[2,768,256], index: 1, kind: input, shape index: {}]   ;;  %s11526_s2 = inlined_call_operand.hbm [shape: f32[2,1,256], index: 2, kind: input, shape index: {}]   ;;  %s11527_s3 = inlined_call_operand.hbm [shape: f32[8,16,256], index: 3, kind: output, shape index: {}]  }
   0x1   :  { %9 = vsyncpa [#allocation7], 0 }
   0x2   :  { %10 = vsyncpa [#allocation5], 0  ;;  %s9598_s12 = smov [#allocation6]   ;;  %s9504_s16 = scalar_lea.hbm %s11525_s1, 24576 }
   0x3   :  { %s28_s13 = sshll.u32 %s9598_s12, 4  ;;  %p9505_p0 = scmp.ne.s32.totalorder %s11525_s1, %s9504_s16  ;;  %s29_s13 = int_to_ptr.vmem [resolvable:$true] %s28_s13 }
   0x4   :  { %p9508_p1 = scmp.lt.u32.totalorder %s9504_s16, %s11525_s1 }
   0x6   :  { %p9510_p2 = pnand %p9508_p1, %p9505_p0 }
   0x8   :  { %9513 = shalt.err (!%p9510_p2)
}
   0x9   :  { %s9514_s21 = scalar_lea.vmem %s29_s13, 24576  ;;  %p9519_p4 = scmp.lt.s32.totalorder %s29_s13, %s29_s13 }
   0xa   :  { %p9515_p3 = scmp.ne.s32.totalorder %s29_s13, %s9514_s21  ;;  %p9520_p5 = scmp.lt.s32.totalorder %s9514_s21, %s9514_s21 }
   0xc   :  { %p9521_p6 = por %p9520_p5, %p9519_p4 }
   0xe   :  { %p9522_p7 = pnand %p9521_p6, %p9515_p3 }
  0x10   :  { %9525 = shalt.err (!%p9522_p7)
}
  0x11   :  { %s9599_s22 = smov 128   ;;  %s9600_s23 = smov 8  }
  0x12   :  { %34 = dma.hbm_to_vmem [thread:$0]  %s11525_s1, 24576, %s29_s13, [#allocation7], %s9599_s22, %s9599_s22, %s9600_s23  }
  0x13   :  { %s9601_s26 = smov [#allocation3]   ;;  %s9526_s30 = scalar_lea.hbm %s11524_s0, 4096 }
  0x14   :  { %s16_s27 = sshll.u32 %s9601_s26, 4  ;;  %p9527_p8 = scmp.ne.s32.totalorder %s11524_s0, %s9526_s30  ;;  %s17_s27 = int_to_ptr.vmem [resolvable:$true] %s16_s27 }
  0x15   :  { %p9530_p9 = scmp.lt.u32.totalorder %s9526_s30, %s11524_s0 }
  0x17   :  { %p9532_p10 = pnand %p9530_p9, %p9527_p8 }
  0x19   :  { %9535 = shalt.err (!%p9532_p10)
}
  0x1a   :  { %s9536_s8 = scalar_lea.vmem %s17_s27, 4096  ;;  %p9541_p12 = scmp.lt.s32.totalorder %s17_s27, %s17_s27 }
  0x1b   :  { %p9537_p11 = scmp.ne.s32.totalorder %s17_s27, %s9536_s8  ;;  %p9542_p13 = scmp.lt.s32.totalorder %s9536_s8, %s9536_s8 }
  0x1d   :  { %p9543_p0 = por %p9542_p13, %p9541_p12 }
  0x1f   :  { %p9544_p1 = pnand %p9543_p0, %p9537_p11 }
  0x21   :  { %9547 = shalt.err (!%p9544_p1)
}
  0x22   :  { %s9602_s1 = smov 256   ;;  %s9603_s9 = smov 16  }
  0x23   :  { %22 = dma.hbm_to_vmem [thread:$0]  %s11524_s0, 4096, %s17_s27, [#allocation4], %s9602_s1, %s9602_s1, %s9603_s9  }
  0x24   :  { %s9604_s12 = smov [#allocation8]   ;;  %s9548_s16 = scalar_lea.hbm %s11526_s2, 64 }
  0x25   :  { %s40_s13 = sshll.u32 %s9604_s12, 4  ;;  %p9549_p2 = scmp.ne.s32.totalorder %s11526_s2, %s9548_s16  ;;  %s41_s13 = int_to_ptr.vmem [resolvable:$true] %s40_s13 }
  0x26   :  { %p9552_p3 = scmp.lt.u32.totalorder %s9548_s16, %s11526_s2 }
  0x28   :  { %p9554_p4 = pnand %p9552_p3, %p9549_p2 }
  0x2a   :  { %9557 = shalt.err (!%p9554_p4)
}
  0x2b   :  { %s9558_s21 = scalar_lea.vmem %s41_s13, 64  ;;  %p9563_p6 = scmp.lt.s32.totalorder %s41_s13, %s41_s13 }
  0x2c   :  { %p9559_p5 = scmp.ne.s32.totalorder %s41_s13, %s9558_s21  ;;  %p9564_p7 = scmp.lt.s32.totalorder %s9558_s21, %s9558_s21 }
  0x2e   :  { %p9565_p8 = por %p9564_p7, %p9563_p6 }
  0x30   :  { %p9566_p9 = pnand %p9565_p8, %p9559_p5 }
  0x32   :  { %9569 = shalt.err (!%p9566_p9)
}
  0x33   :  { %s9605_s0 = smov 32   ;;  %s9606_s22 = smov 2  }
  0x34   :  { %46 = dma.hbm_to_vmem [thread:$0]  %s11526_s2, 64, %s41_s13, [#allocation7], %s9605_s0, %s9605_s0, %s9606_s22  }
  0x35   :  { %9592 = dma.done.wait [#allocation4], 4096  }
  0x36   :  { %9593 = vsyncadd [#allocation4], 4294963200 }
  0x37   :  { %9594 = dma.done.wait [#allocation7], 24640  }
  0x38   :  { %9595 = vsyncadd [#allocation7], 4294942656  ;;  %v8889_v0 = vld [vmem:[#allocation6 + $0x4] ss:$8 sps:$4 sm:$0xff]   ;;  %v8891_v1 = vld [vmem:[#allocation6] ss:$8 sps:$4 sm:$0xff]  }
  0x39   :  { %1550 = vmatprep.subr.bf16.mxu0 %v8889_v0  ;;  %v8892_v2 = vld [vmem:[#allocation6 + $0x14] ss:$8 sps:$4 sm:$0xff]   ;;  %v8894_v3 = vld [vmem:[#allocation6 + $0x10] ss:$8 sps:$4 sm:$0xff]   ;;  %v8895_v4 = vld [vmem:[#allocation6 + $0x24] ss:$8 sps:$4 sm:$0xff]  }
  0x3a   :  { %1551 = vmatpush1.bf16.msra.mxu0 %v8891_v1  ;;  %v8897_v5 = vld [vmem:[#allocation6 + $0x20] ss:$8 sps:$4 sm:$0xff]   ;;  %v8898_v6 = vld [vmem:[#allocation6 + $0x34] ss:$8 sps:$4 sm:$0xff]   ;;  %vm57_vm0 = vcmask 1040384   ;;  %vm60_vm2 = vcmask 1044484  }
  0x3b   :  { %1552 = vmatprep.subr.bf16.mxu0 %v8892_v2  ;;  %v8900_v7 = vld [vmem:[#allocation6 + $0x30] ss:$8 sps:$4 sm:$0xff]   ;;  %vm58_vm1 = vsmask.f32 256  ;;  %v8901_v8 = vld [vmem:[#allocation6 + $0x44] ss:$8 sps:$4 sm:$0xff]  }
  0x3c   :  { %vm61_vm3 = vsmask.f32 4352  ;;  %vm59_vm4 = vmand %vm57_vm0, %vm58_vm1  ;;  %v8903_v9 = vld [vmem:[#allocation6 + $0x40] ss:$8 sps:$4 sm:$0xff]   ;;  %v8904_v10 = vld [vmem:[#allocation6 + $0x54] ss:$8 sps:$4 sm:$0xff]  }
  0x3d   :  { %vm62_vm5 = vmand %vm60_vm2, %vm61_vm3  ;;  %v8906_v11 = vld [vmem:[#allocation6 + $0x50] ss:$8 sps:$4 sm:$0xff]   ;;  %v8907_v13 = vld [vmem:[#allocation6 + $0x64] ss:$8 sps:$4 sm:$0xff]   ;;  %vm88_vm7 = vsmask.f32 7938 }
  0x3e   :  { %1553 = vmatpush1.bf16.msra.mxu0 %v8894_v3  ;;  %vm9670_vm6 = vmor %vm62_vm5, %vm59_vm4  ;;  %v64_v14 = vld [vmem:[#allocation2] sm:$0x11]  ;;  %vm90_vm8 = vsmask.f32 7954  ;;  %vm391_vm9 = vcmask 1043456   ;;  %v118_v17 = vld [vmem:[#allocation3 + $0x8] sm:$0xff] }
  0x3f   :  { %1554 = vmatprep.subr.bf16.mxu0 %v8895_v4  ;;  %v117_v15 = vld [vmem:[#allocation3] sm:$0xff]  ;;  %v65_v16 = vsel %vm9670_vm6, 0, %v64_v14  ;;  %v119_v18 = vld [vmem:[#allocation3 + $0x10] sm:$0xff]  ;;  %v120_v19 = vld [vmem:[#allocation3 + $0x18] sm:$0xff]  ;;  %vm393_vm10 = vcmask 1047556   ;;  %s9607_s2 = smov [#allocation9]  }
  0x40   :  { %v8909_v20 = vld [vmem:[#allocation6 + $0x60] ss:$8 sps:$4 sm:$0xff]   ;;  %66 = vst [vmem:[#allocation2] sm:$0x11] %v65_v16  ;;  %v8431_v21 = vpack.c.bf16 %v118_v17, %v117_v15  ;;  %v8432_v22 = vpack.c.bf16 %v120_v19, %v119_v18  ;;  %v8910_v23 = vld [vmem:[#allocation6 + $0x74] ss:$8 sps:$4 sm:$0xff]   ;;  %vm9677_vm12 = vmand %vm391_vm9, %vm88_vm7 }
  0x41   :  { %vm229_vm11 = vsmask.f32 4368  ;;  %vm394_vm13 = vmand %vm393_vm10, %vm90_vm8  ;;  %v121_v29 = vld [vmem:[#allocation3 + $0x20] sm:$0xff]  ;;  %v8912_v30 = vld [vmem:[#allocation6 + $0x70] ss:$8 sps:$4 sm:$0xff]   ;;  %s7746_s25 = sshll.u32 %s9607_s2, 4  ;;  %s7747_s25 = int_to_ptr.vmem [resolvable:$true] %s7746_s25 }
  0x42   :  { %1555 = vmatpush1.bf16.msra.mxu0 %v8897_v5  ;;  %v232_v25 = vshrl.u32 %v8431_v21, 16  ;;  %v235_v26 = vshll.u32 %v8431_v21, 16  ;;  %v240_v27 = vshrl.u32 %v8432_v22, 16  ;;  %v243_v28 = vshll.u32 %v8432_v22, 16  ;;  %v67_v31 = vld [vmem:[#allocation2 + $0x18] sm:$0x11]  ;;  %vm9683_vm14 = vmor %vm58_vm1, %vm229_vm11  ;;  %p9575_p11 = scmp.lt.s32.totalorder %s7747_s25, %s7747_s25 }
  0x43   :  { %1556 = vmatprep.subr.bf16.mxu0 %v8898_v6  ;;  %v8913_v32 = vld [vmem:[#allocation6 + $0x84] ss:$8 sps:$4 sm:$0xff]   ;;  %v68_v36 = vsel %vm9670_vm6, 0, %v67_v31  ;;  %vm9693_vm15 = vmor %vm394_vm13, %vm9677_vm12  ;;  %v8915_v47 = vld [vmem:[#allocation6 + $0x80] ss:$8 sps:$4 sm:$0xff]   ;;  %s9570_s26 = scalar_lea.vmem %s7747_s25, 4096 }
  0x44   :  { %v234_v34 = vrot.slane %v232_v25, 7  ;;  %v9687_v35 = vrot.slane %v240_v27, 7  ;;  %v122_v37 = vld [vmem:[#allocation3 + $0x28] sm:$0xff]  ;;  %69 = vst [vmem:[#allocation2 + $0x18] sm:$0x11] %v68_v36  ;;  %v125_v46 = vld [vmem:[#allocation3 + $0x40] sm:$0xff]  ;;  %vm9758_vm1 = vmand %vm57_vm0, %vm88_vm7  ;;  %p9571_p10 = scmp.ne.s32.totalorder %s7747_s25, %s9570_s26  ;;  %p9576_p12 = scmp.lt.s32.totalorder %s9570_s26, %s9570_s26 }
  0x45   :  { %v8433_v39 = vpack.c.bf16 %v122_v37, %v121_v29  ;;  %v70_v50 = vld [vmem:[#allocation2 + $0x30] sm:$0x11]  ;;  %v126_v54 = vld [vmem:[#allocation3 + $0x48] sm:$0xff]  ;;  %v129_v62 = vld [vmem:[#allocation3 + $0x60] sm:$0xff]  ;;  %vm476_vm3 = vsmask.f32 3328 }
  0x46   :  { %1557 = vmatpush1.bf16.msra.mxu0 %v8900_v7  ;;  %v237_v40 = vor.u32 %v235_v26, %v234_v34  ;;  %v238_v41 = vrot.slane %v234_v34, 4  ;;  %v245_v42 = vor.u32 %v243_v28, %v9687_v35  ;;  %v8916_v51 = vld [vmem:[#allocation6 + $0x94] ss:$8 sps:$4 sm:$0xff]   ;;  %v71_v55 = vsel %vm9670_vm6, 0, %v70_v50  ;;  %v8918_v58 = vld [vmem:[#allocation6 + $0x90] ss:$8 sps:$4 sm:$0xff]   ;;  %vm91_vm0 = vmand %vm60_vm2, %vm90_vm8  ;;  %p9577_p13 = por %p9576_p12, %p9575_p11 }
  0x47   :  { %1558 = vmatprep.subr.bf16.mxu0 %v8901_v8  ;;  %v396_v43 = vld [vmem:[#allocation2] sm:$0xff]  ;;  %v249_v44 = vshrl.u32 %v8433_v39, 16  ;;  %v252_v45 = vshll.u32 %v8433_v39, 16  ;;  %v8435_v56 = vpack.c.bf16 %v126_v54, %v125_v46  ;;  %72 = vst [vmem:[#allocation2 + $0x30] sm:$0x11] %v71_v55  ;;  %v130_v3 = vld [vmem:[#allocation3 + $0x68] sm:$0xff]  ;;  %vm9784_vm2 = vmor %vm91_vm0, %vm9758_vm1 }
  0x48   :  { %v9700_v48 = vsel %vm9683_vm14, %v238_v41, %v245_v42  ;;  %v9704_v49 = vsel %vm9693_vm15, %v237_v40, %v396_v43  ;;  %v8919_v63 = vld [vmem:[#allocation6 + $0xa4] ss:$8 sps:$4 sm:$0xff]   ;;  %v8437_v5 = vpack.c.bf16 %v130_v3, %v129_v62  ;;  %v8921_v6 = vld [vmem:[#allocation6 + $0xa0] ss:$8 sps:$4 sm:$0xff]   ;;  %v8922_v8 = vld [vmem:[#allocation6 + $0xb4] ss:$8 sps:$4 sm:$0xff]   ;;  %p9578_p0 = pnand %p9577_p13, %p9571_p10 }
  0x49   :  { %398 = vst [vmem:[#allocation2] sm:$0xff] %v9704_v49  ;;  %v7784_v52 = vcombine.high %v9704_v49, %v9700_v48  ;;  %v9709_v53 = vrot.slane %v249_v44, 7  ;;  %v266_v60 = vshrl.u32 %v8435_v56, 16  ;;  %v269_v61 = vshll.u32 %v8435_v56, 16  ;;  %v73_v1 = vld [vmem:[#allocation2 + $0x48] sm:$0x11] }
  0x4a   :  { %1559 = vmatpush1.bf16.msra.mxu0 %v8903_v9  ;;  %v74_v4 = vsel %vm9670_vm6, 0, %v73_v1  ;;  %v123_v9 = vld [vmem:[#allocation3 + $0x30] sm:$0xff]  ;;  %v76_v15 = vld [vmem:[#allocation2 + $0x60] sm:$0x11]  ;;  %v79_v29 = vld [vmem:[#allocation2 + $0x78] sm:$0x11] }
  0x4b   :  { %1560 = vmatprep.subr.bf16.mxu0 %v8904_v10  ;;  %1582 = vmatprep.mubr.bf16.mxu0 %v7784_v52  ;;  %v254_v57 = vor.u32 %v252_v45, %v9709_v53  ;;  %v403_v59 = vld [vmem:[#allocation2 + $0x18] sm:$0xff]  ;;  %v9719_v2 = vrot.slane %v266_v60, 7  ;;  %75 = vst [vmem:[#allocation2 + $0x48] sm:$0x11] %v74_v4  ;;  %v283_v10 = vshrl.u32 %v8437_v5, 16  ;;  %v77_v18 = vsel %vm9670_vm6, 0, %v76_v15 }
  0x4c   :  { %v133_v19 = vld [vmem:[#allocation3 + $0x80] sm:$0xff]  ;;  %v8924_v21 = vld [vmem:[#allocation6 + $0xb0] ss:$8 sps:$4 sm:$0xff]   ;;  %78 = vst [vmem:[#allocation2 + $0x60] sm:$0x11] %v77_v18  ;;  %v138_v36 = vld [vmem:[#allocation3 + $0xa8] sm:$0xff] }
  0x4d   :  { %v9716_v0 = vsel %vm9693_vm15, %v254_v57, %v403_v59  ;;  %v271_v7 = vor.u32 %v269_v61, %v9719_v2  ;;  %v9728_v17 = vrot.slane %v283_v10, 7  ;;  %v137_v34 = vld [vmem:[#allocation3 + $0xa0] sm:$0xff]  ;;  %v8928_v37 = vld [vmem:[#allocation6 + $0xd4] ss:$8 sps:$4 sm:$0xff]   ;;  %v80_v40 = vsel %vm9670_vm6, 0, %v79_v29  ;;  %v142_v60 = vld [vmem:[#allocation3 + $0xc8] sm:$0xff] }
  0x4e   :  { %1561 = vmatpush1.bf16.msra.mxu0 %v8906_v11  ;;  %405 = vst [vmem:[#allocation2 + $0x18] sm:$0xff] %v9716_v0  ;;  %v286_v11 = vshll.u32 %v8437_v5, 16  ;;  %v410_v14 = vld [vmem:[#allocation2 + $0x30] sm:$0xff]  ;;  %v8441_v41 = vpack.c.bf16 %v138_v36, %v137_v34  ;;  %v128_v43 = vld [vmem:[#allocation3 + $0x58] sm:$0xff]  ;;  %81 = vst [vmem:[#allocation2 + $0x78] sm:$0x11] %v80_v40 }
  0x4f   :  { %1562 = vmatprep.subr.bf16.mxu0 %v8907_v13  ;;  %v124_v13 = vld [vmem:[#allocation3 + $0x38] sm:$0xff]  ;;  %v9726_v16 = vsel %vm9693_vm15, %v271_v7, %v410_v14  ;;  %v127_v42 = vld [vmem:[#allocation3 + $0x50] sm:$0xff]  ;;  %v141_v59 = vld [vmem:[#allocation3 + $0xc0] sm:$0xff]  ;;  %v255_v5 = vrot.slane %v9709_v53, 4  ;;  %vm477_vm4 = vsmask.f32 7440 }
  0x50   :  { %412 = vst [vmem:[#allocation2 + $0x30] sm:$0xff] %v9726_v16  ;;  %v8434_v24 = vpack.c.bf16 %v124_v13, %v123_v9  ;;  %v288_v25 = vor.u32 %v286_v11, %v9728_v17  ;;  %v317_v46 = vshrl.u32 %v8441_v41, 16  ;;  %v8930_v50 = vld [vmem:[#allocation6 + $0xd0] ss:$8 sps:$4 sm:$0xff]   ;;  %v8436_v56 = vpack.c.bf16 %v128_v43, %v127_v42  ;;  %v8933_v61 = vld [vmem:[#allocation6 + $0xe0] ss:$8 sps:$4 sm:$0xff]   ;;  %vm9912_vm5 = vmor %vm476_vm3, %vm477_vm4 }
  0x51   :  { %v8934_v1 = vld [vmem:[#allocation6 + $0xf4] ss:$8 sps:$4 sm:$0xff]   ;;  %v85_v14 = vld [vmem:[#allocation2 + $0xa8] sm:$0x11]  ;;  %vm703_vm7 = vcmask 1042432   ;;  %vm704_vm8 = vcmask 1046532  }
  0x52   :  { %1563 = vmatpush1.bf16.msra.mxu0 %v8909_v20  ;;  %v134_v20 = vld [vmem:[#allocation3 + $0x88] sm:$0xff]  ;;  %v257_v39 = vshrl.u32 %v8434_v24, 16  ;;  %v260_v52 = vshll.u32 %v8434_v24, 16  ;;  %v9751_v57 = vrot.slane %v317_v46, 7  ;;  %v274_v9 = vshrl.u32 %v8436_v56, 16  ;;  %v132_v10 = vld [vmem:[#allocation3 + $0x78] sm:$0xff]  ;;  %vm10002_vm9 = vmor %vm703_vm7, %vm704_vm8 }
  0x53   :  { %1564 = vmatprep.subr.bf16.mxu0 %v8910_v23  ;;  %v8439_v22 = vpack.c.bf16 %v134_v20, %v133_v19  ;;  %v8925_v23 = vld [vmem:[#allocation6 + $0xc4] ss:$8 sps:$4 sm:$0xff]   ;;  %v86_v53 = vsel %vm9670_vm6, 0, %v85_v14  ;;  %v93_v40 = vld [vmem:[#allocation2 + $0x10] sm:$0x11] }
  0x54   :  { %v417_v28 = vld [vmem:[#allocation2 + $0x48] sm:$0xff]  ;;  %v424_v45 = vld [vmem:[#allocation2 + $0x60] sm:$0xff]  ;;  %v9748_v55 = vrot.slane %v257_v39, 7  ;;  %87 = vst [vmem:[#allocation2 + $0xa8] sm:$0x11] %v86_v53 }
  0x55   :  { %v300_v26 = vshrl.u32 %v8439_v22, 16  ;;  %v303_v27 = vshll.u32 %v8439_v22, 16  ;;  %v9736_v31 = vsel %vm9693_vm15, %v288_v25, %v417_v28  ;;  %v431_v11 = vld [vmem:[#allocation2 + $0x78] sm:$0xff]  ;;  %v145_v19 = vld [vmem:[#allocation3 + $0xe0] sm:$0xff]  ;;  %v146_v20 = vld [vmem:[#allocation3 + $0xe8] sm:$0xff]  ;;  %v277_v28 = vshll.u32 %v8436_v56, 16 }
  0x56   :  { %1565 = vmatpush1.bf16.msra.mxu0 %v8912_v30  ;;  %v8927_v30 = vld [vmem:[#allocation6 + $0xc0] ss:$8 sps:$4 sm:$0xff]   ;;  %419 = vst [vmem:[#allocation2 + $0x48] sm:$0xff] %v9736_v31  ;;  %v8939_v22 = vld [vmem:[#allocation6 + $0x104] ss:$8 sps:$4 sm:$0xff]   ;;  %v8445_v25 = vpack.c.bf16 %v146_v20, %v145_v19  ;;  %v139_v20 = vld [vmem:[#allocation3 + $0xb0] sm:$0xff] }
  0x57   :  { %1566 = vmatprep.subr.bf16.mxu0 %v8913_v32  ;;  %v9738_v32 = vrot.slane %v300_v26, 7  ;;  %v8942_v46 = vld [vmem:[#allocation6 + $0x114] ss:$8 sps:$4 sm:$0xff]  }
  0x58   :  { %v351_v34 = vshrl.u32 %v8445_v25, 16  ;;  %v354_v36 = vshll.u32 %v8445_v25, 16  ;;  %v8948_v19 = vld [vmem:[#allocation6 + $0x134] ss:$8 sps:$4 sm:$0xff]  }
  0x59   :  { %v305_v44 = vor.u32 %v303_v27, %v9738_v32  ;;  %v9780_v27 = vrot.slane %v274_v9, 7  ;;  %v99_v9 = vld [vmem:[#allocation2 + $0x40] sm:$0x11]  ;;  %v9416_v33 = vld [vmem:[#allocation6 + $0x4f4] ss:$8 sps:$4 sm:$0xff]  }
  0x5a   :  { %1567 = vmatpush1.bf16.msra.mxu0 %v8915_v47  ;;  %v320_v47 = vshll.u32 %v8441_v41, 16  ;;  %v8937_v41 = vld [vmem:[#allocation6 + $0x100] ss:$8 sps:$4 sm:$0xff]   ;;  %v100_v14 = vsel %vm9784_vm2, 0, %v99_v9 }
  0x5b   :  { %1568 = vmatprep.subr.bf16.mxu0 %v8916_v51  ;;  %v8931_v51 = vld [vmem:[#allocation6 + $0xe4] ss:$8 sps:$4 sm:$0xff]   ;;  %v9746_v54 = vsel %vm9693_vm15, %v305_v44, %v424_v45  ;;  %v9797_v44 = vrot.slane %v351_v34, 7  ;;  %v94_v45 = vsel %vm9784_vm2, 0, %v93_v40  ;;  %101 = vst [vmem:[#allocation2 + $0x40] sm:$0x11] %v100_v14 }
  0x5c   :  { %426 = vst [vmem:[#allocation2 + $0x60] sm:$0xff] %v9746_v54  ;;  %v322_v3 = vor.u32 %v320_v47, %v9751_v57  ;;  %v272_v47 = vrot.slane %v9719_v2, 4  ;;  %95 = vst [vmem:[#allocation2 + $0x10] sm:$0x11] %v94_v45  ;;  %v323_v14 = vrot.slane %v9751_v57, 4 }
  0x5d   :  { %v356_v56 = vor.u32 %v354_v36, %v9797_v44  ;;  %v8963_v57 = vld [vmem:[#allocation6 + $0x184] ss:$8 sps:$4 sm:$0xff]  }
  0x5e   :  { %1569 = vmatpush1.bf16.msra.mxu0 %v8918_v58  ;;  %v82_v58 = vld [vmem:[#allocation2 + $0x90] sm:$0x11]  ;;  %v9766_v15 = vsel %vm9693_vm15, %v322_v3, %v431_v11  ;;  %v8945_v3 = vld [vmem:[#allocation6 + $0x124] ss:$8 sps:$4 sm:$0xff]  }
  0x5f   :  { %1570 = vmatprep.subr.bf16.mxu0 %v8919_v63  ;;  %v83_v62 = vsel %vm9670_vm6, 0, %v82_v58  ;;  %v8443_v63 = vpack.c.bf16 %v142_v60, %v141_v59  ;;  %433 = vst [vmem:[#allocation2 + $0x78] sm:$0xff] %v9766_v15  ;;  %v96_v58 = vld [vmem:[#allocation2 + $0x28] sm:$0x11] }
  0x60   :  { %84 = vst [vmem:[#allocation2 + $0x90] sm:$0x11] %v83_v62  ;;  %v445_v59 = vld [vmem:[#allocation2 + $0xa8] sm:$0xff]  ;;  %v97_v60 = vsel %vm9784_vm2, 0, %v96_v58 }
  0x61   :  { %v334_v7 = vshrl.u32 %v8443_v63, 16  ;;  %v337_v13 = vshll.u32 %v8443_v63, 16  ;;  %v9810_v2 = vsel %vm9693_vm15, %v356_v56, %v445_v59  ;;  %98 = vst [vmem:[#allocation2 + $0x28] sm:$0x11] %v97_v60  ;;  %v143_v59 = vld [vmem:[#allocation3 + $0xd0] sm:$0xff]  ;;  %v144_v60 = vld [vmem:[#allocation3 + $0xd8] sm:$0xff] }
  0x62   :  { %1571 = vmatpush1.bf16.msra.mxu0 %v8921_v6  ;;  %v131_v6 = vld [vmem:[#allocation3 + $0x70] sm:$0xff]  ;;  %447 = vst [vmem:[#allocation2 + $0xa8] sm:$0xff] %v9810_v2  ;;  %v414_v45 = vld [vmem:[#allocation2 + $0x40] sm:$0x11] }
  0x63   :  { %1572 = vmatprep.subr.bf16.mxu0 %v8922_v8  ;;  %v262_v8 = vor.u32 %v260_v52, %v9748_v55  ;;  %v9768_v18 = vrot.slane %v334_v7, 7  ;;  %v136_v52 = vld [vmem:[#allocation3 + $0x98] sm:$0xff] }
  0x65   :  { %v339_v24 = vor.u32 %v337_v13, %v9768_v18  ;;  %v9778_v26 = vsel %vm9683_vm14, %v255_v5, %v262_v8  ;;  %v8943_v8 = vld [vmem:[#allocation6 + $0x120] ss:$8 sps:$4 sm:$0xff]   ;;  %v400_v13 = vld [vmem:[#allocation2 + $0x10] sm:$0x11] }
  0x66   :  { %1573 = vmatpush1.bf16.msra.mxu0 %v8924_v21  ;;  %v8936_v21 = vld [vmem:[#allocation6 + $0xf0] ss:$8 sps:$4 sm:$0xff]   ;;  %v7786_v42 = vcombine.high %v9716_v0, %v9778_v26  ;;  %v7785_v7 = vcombine.low %v9716_v0, %v9778_v26 }
  0x67   :  { %1574 = vmatprep.subr.bf16.mxu0 %v8925_v23  ;;  %v8438_v23 = vpack.c.bf16 %v132_v10, %v131_v6  ;;  %v264_v6 = vrot.slane %v9748_v55, 4  ;;  %v289_v10 = vrot.slane %v9728_v17, 4  ;;  %v281_v17 = vrot.slane %v9780_v27, 4 }
  0x69   :  { %v291_v43 = vshrl.u32 %v8438_v23, 16  ;;  %v294_v63 = vshll.u32 %v8438_v23, 16  ;;  %v407_v23 = vld [vmem:[#allocation2 + $0x28] sm:$0x11] }
  0x6a   :  { %1575 = vmatpush1.bf16.msra.mxu0 %v8927_v30  ;;  %v438_v30 = vld [vmem:[#allocation2 + $0x90] sm:$0xff]  ;;  %v408_v25 = vsel %vm9670_vm6, %v264_v6, %v407_v23  ;;  %v111_v23 = vld [vmem:[#allocation2 + $0xa0] sm:$0x11] }
  0x6b   :  { %1576 = vmatprep.subr.bf16.mxu0 %v8928_v37  ;;  %v7783_v37 = vcombine.low %v9704_v49, %v9700_v48  ;;  %v9792_v39 = vsel %vm9693_vm15, %v339_v24, %v438_v30  ;;  %v9806_v62 = vrot.slane %v291_v43, 7  ;;  %v8951_v30 = vld [vmem:[#allocation6 + $0x144] ss:$8 sps:$4 sm:$0xff]   ;;  %409 = vst [vmem:[#allocation2 + $0x28] sm:$0x11] %v408_v25  ;;  %v306_v43 = vrot.slane %v9738_v32, 4 }
  0x6c   :  { %440 = vst [vmem:[#allocation2 + $0x90] sm:$0xff] %v9792_v39  ;;  %v8952_v32 = vld [vmem:[#allocation6 + $0x150] ss:$8 sps:$4 sm:$0xff]  }
  0x6d   :  { %v296_v11 = vor.u32 %v294_v63, %v9806_v62  ;;  %v298_v58 = vrot.slane %v9806_v62, 4 }
  0x6e   :  { %1577 = vmatpush1.bf16.msra.mxu0 %v8930_v50  ;;  %v279_v50 = vor.u32 %v277_v28, %v9780_v27  ;;  %v102_v28 = vld [vmem:[#allocation2 + $0x58] sm:$0x11] }
  0x6f   :  { %1578 = vmatprep.subr.bf16.mxu0 %v8931_v51  ;;  %v135_v51 = vld [vmem:[#allocation3 + $0x90] sm:$0xff]  ;;  %v9832_v24 = vsel %vm9683_vm14, %v289_v10, %v296_v11  ;;  %v103_v40 = vsel %vm9784_vm2, 0, %v102_v28 }
  0x70   :  { %v9815_v4 = vsel %vm9683_vm14, %v272_v47, %v279_v50  ;;  %v8440_v5 = vpack.c.bf16 %v136_v52, %v135_v51  ;;  %104 = vst [vmem:[#allocation2 + $0x58] sm:$0x11] %v103_v40  ;;  %v8954_v47 = vld [vmem:[#allocation6 + $0x154] ss:$8 sps:$4 sm:$0xff]   ;;  %v415_v52 = vsel %vm9670_vm6, %v281_v17, %v414_v45  ;;  %v7789_v9 = vcombine.low %v9736_v31, %v9832_v24  ;;  %v8958_v17 = vld [vmem:[#allocation6 + $0x170] ss:$8 sps:$4 sm:$0xff]  }
  0x71   :  { %v7787_v27 = vcombine.low %v9726_v16, %v9815_v4  ;;  %416 = vst [vmem:[#allocation2 + $0x40] sm:$0x11] %v415_v52  ;;  %v8960_v10 = vld [vmem:[#allocation6 + $0x174] ss:$8 sps:$4 sm:$0xff]  }
  0x72   :  { %1579 = vmatpush1.bf16.msra.mxu0 %v8933_v61  ;;  %v8940_v61 = vld [vmem:[#allocation6 + $0x110] ss:$8 sps:$4 sm:$0xff]   ;;  %v308_v55 = vshrl.u32 %v8440_v5, 16  ;;  %v311_v36 = vshll.u32 %v8440_v5, 16  ;;  %v8444_v5 = vpack.c.bf16 %v144_v60, %v143_v59  ;;  %v480_v59 = vshrl.u32 %v9704_v49, 16 }
  0x73   :  { %1580 = vmatprep.subr.bf16.mxu0 %v8934_v1  ;;  %v247_v1 = vrot.slane %v9687_v35, 4  ;;  %v7788_v35 = vcombine.high %v9726_v16, %v9815_v4  ;;  %v483_v60 = vshll.u32 %v9704_v49, 16 }
  0x74   :  { %v310_v34 = vrot.slane %v308_v55, 7  ;;  %v342_v55 = vshrl.u32 %v8444_v5, 16 }
  0x75   :  { %v401_v53 = vsel %vm9670_vm6, %v247_v1, %v400_v13 }
  0x76   :  { %1581 = vmatpush1.bf16.msra.mxu0 %v8936_v21  ;;  %v140_v21 = vld [vmem:[#allocation3 + $0xb8] sm:$0xff]  ;;  %402 = vst [vmem:[#allocation2 + $0x10] sm:$0x11] %v401_v53  ;;  %v313_v50 = vor.u32 %v311_v36, %v310_v34  ;;  %v344_v36 = vrot.slane %v342_v55, 7 }
  0x77   :  { %1663 = vmatprep.subr.bf16.mxu0 %v8939_v22  ;;  %v8946_v22 = vld [vmem:[#allocation6 + $0x130] ss:$8 sps:$4 sm:$0xff]  }
  0x78   :  { %v9850_v63 = vsel %vm9683_vm14, %v306_v43, %v313_v50  ;;  %v421_v6 = vld [vmem:[#allocation2 + $0x58] sm:$0x11]  ;;  %v340_v50 = vrot.slane %v9768_v18, 4  ;;  %v349_v52 = vrot.slane %v344_v36, 4  ;;  %v493_v18 = vshrl.u32 %v9700_v48, 16 }
  0x79   :  { %1583 = vmatmul.mubr.bf16.vlgmr.msra.gmra.mrb[0].mxu0 %v7783_v37  ;;  %v8442_v37 = vpack.c.bf16 %v140_v21, %v139_v20  ;;  %v422_v62 = vsel %vm9670_vm6, %v298_v58, %v421_v6  ;;  %v7792_v13 = vcombine.high %v9746_v54, %v9850_v63  ;;  %v147_v20 = vld [vmem:[#allocation3 + $0xf0] sm:$0xff]  ;;  %v148_v53 = vld [vmem:[#allocation3 + $0xf8] sm:$0xff]  ;;  %v7791_v40 = vcombine.low %v9746_v54, %v9850_v63 }
  0x7a   :  { %1664 = vmatpush1.bf16.msra.mxu0 %v8937_v41  ;;  %1592 = vmatprep.mubr.bf16.mxu0 %v7786_v42  ;;  %v8949_v41 = vld [vmem:[#allocation6 + $0x140] ss:$8 sps:$4 sm:$0xff]   ;;  %v7790_v42 = vcombine.high %v9736_v31, %v9832_v24  ;;  %423 = vst [vmem:[#allocation2 + $0x58] sm:$0x11] %v422_v62  ;;  %v8446_v28 = vpack.c.bf16 %v148_v53, %v147_v20  ;;  %v8964_v58 = vld [vmem:[#allocation6 + $0x190] ss:$8 sps:$4 sm:$0xff]  }
  0x7b   :  { %1665 = vmatprep.subr.bf16.mxu0 %v8942_v46  ;;  %v105_v46 = vld [vmem:[#allocation2 + $0x70] sm:$0x11]  ;;  %v325_v51 = vshrl.u32 %v8442_v37, 16  ;;  %v482_v62 = vrot.slane %v480_v59, 4  ;;  %v528_v59 = vshrl.u32 %v9726_v16, 16 }
  0x7c   :  { %v106_v56 = vsel %vm9784_vm2, 0, %v105_v46  ;;  %v359_v43 = vshrl.u32 %v8446_v28, 16  ;;  %v114_v46 = vld [vmem:[#allocation2 + $0xb8] sm:$0x11] }
  0x7d   :  { %107 = vst [vmem:[#allocation2 + $0x70] sm:$0x11] %v106_v56  ;;  %v327_v1 = vrot.slane %v325_v51, 7  ;;  %v115_v56 = vsel %vm9784_vm2, 0, %v114_v46  ;;  %v9893_v20 = vld [vmem:[#allocation2 + $0x10] sm:$0x11] }
  0x7e   :  { %1666 = vmatpush1.bf16.msra.mxu0 %v8940_v61  ;;  %v8957_v61 = vld [vmem:[#allocation6 + $0x164] ss:$8 sps:$4 sm:$0xff]   ;;  %116 = vst [vmem:[#allocation2 + $0xb8] sm:$0x11] %v115_v56 }
  0x7f   :  { %1667 = vmatprep.subr.bf16.mxu0 %v8945_v3  ;;  %v328_v3 = vshll.u32 %v8442_v37, 16  ;;  %v332_v25 = vrot.slane %v327_v1, 4  ;;  %v345_v37 = vshll.u32 %v8444_v5, 16  ;;  %v362_v5 = vshll.u32 %v8446_v28, 16  ;;  %v9916_v56 = vld [vmem:[#allocation2 + $0x28] sm:$0x11] }
  0x81   :  { %1593 = vmatmul.mubr.bf16.gmra.mrb[4].mxu0 %v7785_v7  ;;  %v315_v7 = vrot.slane %v310_v34, 4  ;;  %v347_v51 = vor.u32 %v345_v37, %v344_v36  ;;  %v517_v36 = vshrl.u32 %v9778_v26, 16  ;;  %v8973_v37 = vld [vmem:[#allocation6 + $0x1c0] ss:$8 sps:$4 sm:$0xff]  }
  0x82   :  { %1668 = vmatpush1.bf16.msra.mxu0 %v8943_v8  ;;  %1602 = vmatprep.mubr.bf16.mxu0 %v7788_v35  ;;  %v108_v8 = vld [vmem:[#allocation2 + $0x88] sm:$0x11] }
  0x83   :  { %1669 = vmatprep.subr.bf16.mxu0 %v8948_v19  ;;  %v8955_v35 = vld [vmem:[#allocation6 + $0x160] ss:$8 sps:$4 sm:$0xff]   ;;  %v109_v11 = vsel %vm9784_vm2, 0, %v108_v8  ;;  %v330_v19 = vor.u32 %v328_v3, %v327_v1  ;;  %v8969_v3 = vld [vmem:[#allocation6 + $0x1a4] ss:$8 sps:$4 sm:$0xff]   ;;  %v9884_v29 = vsel %vm9683_vm14, %v340_v50, %v347_v51  ;;  %v485_v8 = vrot.slane %v483_v60, 5 }
  0x84   :  { %110 = vst [vmem:[#allocation2 + $0x88] sm:$0x11] %v109_v11  ;;  %v428_v21 = vld [vmem:[#allocation2 + $0x70] sm:$0x11]  ;;  %v495_v11 = vrot.slane %v493_v18, 4  ;;  %v519_v51 = vrot.slane %v517_v36, 4 }
  0x85   :  { %v9867_v34 = vsel %vm9683_vm14, %v323_v14, %v330_v19  ;;  %v357_v14 = vrot.slane %v9797_v44, 4  ;;  %v449_v55 = vld [vmem:[#allocation2 + $0xb8] sm:$0x11]  ;;  %v507_v44 = vshll.u32 %v9716_v0, 16  ;;  %v531_v60 = vshll.u32 %v9726_v16, 16 }
  0x86   :  { %1670 = vmatpush1.bf16.msra.mxu0 %v8946_v22  ;;  %v429_v22 = vsel %vm9670_vm6, %v315_v7, %v428_v21  ;;  %v7793_v49 = vcombine.low %v9766_v15, %v9867_v34  ;;  %v8970_v21 = vld [vmem:[#allocation6 + $0x1b0] ss:$8 sps:$4 sm:$0xff]   ;;  %v541_v18 = vshrl.u32 %v9815_v4, 16  ;;  %v8987_v36 = vld [vmem:[#allocation6 + $0x204] ss:$8 sps:$4 sm:$0xff]  }
  0x87   :  { %1671 = vmatprep.subr.bf16.mxu0 %v8951_v30  ;;  %430 = vst [vmem:[#allocation2 + $0x70] sm:$0x11] %v429_v22  ;;  %v112_v30 = vsel %vm9784_vm2, 0, %v111_v23  ;;  %v486_v22 = vor.u32 %v485_v8, %v482_v62  ;;  %v509_v46 = vrot.slane %v507_v44, 5  ;;  %v530_v62 = vrot.slane %v528_v59, 4 }
  0x88   :  { %113 = vst [vmem:[#allocation2 + $0xa0] sm:$0x11] %v112_v30  ;;  %v499_v30 = vshll.u32 %v9893_v20, 16  ;;  %v533_v8 = vrot.slane %v531_v60, 5 }
  0x89   :  { %1603 = vmatmul.mubr.bf16.gmra.mrb[8].mxu0 %v7787_v27  ;;  %v8961_v27 = vld [vmem:[#allocation6 + $0x180] ss:$8 sps:$4 sm:$0xff]  }
  0x8a   :  { %1672 = vmatpush1.bf16.msra.mxu0 %v8949_v41  ;;  %1612 = vmatprep.mubr.bf16.mxu0 %v7790_v42  ;;  %v7794_v42 = vcombine.high %v9766_v15, %v9867_v34 }
  0x8b   :  { %1673 = vmatprep.subr.bf16.mxu0 %v8954_v47  ;;  %v435_v41 = vld [vmem:[#allocation2 + $0x88] sm:$0x11]  ;;  %v8966_v47 = vld [vmem:[#allocation6 + $0x194] ss:$8 sps:$4 sm:$0xff]  }
  0x8c   :  { %v436_v45 = vsel %vm9670_vm6, %v332_v25, %v435_v41  ;;  %v8975_v25 = vld [vmem:[#allocation6 + $0x1c4] ss:$8 sps:$4 sm:$0xff]   ;;  %v487_v41 = vrot.slane %v486_v22, 4 }
  0x8d   :  { %437 = vst [vmem:[#allocation2 + $0x88] sm:$0x11] %v436_v45  ;;  %v9033_v22 = vld [vmem:[#allocation6 + $0x4] ss:$8 sps:$4 sm:$0xff]  }
  0x8e   :  { %1674 = vmatpush1.bf16.msra.mxu0 %v8952_v32  ;;  %v361_v32 = vrot.slane %v359_v43, 7  ;;  %3372 = vmatprep.subr.bf16.mxu1 %v9033_v22 }
  0x8f   :  { %1675 = vmatprep.subr.bf16.mxu0 %v8957_v61  ;;  %v489_v61 = vshll.u32 %v9700_v48, 16  ;;  %v442_v1 = vld [vmem:[#allocation2 + $0xa0] sm:$0x11] }
  0x90   :  { %v443_v6 = vsel %vm9670_vm6, %v349_v52, %v442_v1  ;;  %v366_v7 = vrot.slane %v361_v32, 4  ;;  %v364_v19 = vor.u32 %v362_v5, %v361_v32  ;;  %v8976_v52 = vld [vmem:[#allocation6 + $0x1d0] ss:$8 sps:$4 sm:$0xff]  }
  0x91   :  { %1613 = vmatmul.mubr.bf16.gmra.mrb[12].mxu0 %v7789_v9  ;;  %444 = vst [vmem:[#allocation2 + $0xa0] sm:$0x11] %v443_v6  ;;  %v8967_v9 = vld [vmem:[#allocation6 + $0x1a0] ss:$8 sps:$4 sm:$0xff]   ;;  %v523_v6 = vshll.u32 %v9916_v56, 16 }
  0x92   :  { %1676 = vmatpush1.bf16.msra.mxu0 %v8955_v35  ;;  %1622 = vmatprep.mubr.bf16.mxu0 %v7792_v13  ;;  %v7796_v35 = vcombine.high %v9792_v39, %v9884_v29  ;;  %v8972_v13 = vld [vmem:[#allocation6 + $0x1b4] ss:$8 sps:$4 sm:$0xff]   ;;  %v450_v53 = vsel %vm9670_vm6, %v366_v7, %v449_v55  ;;  %v9901_v28 = vsel %vm9683_vm14, %v357_v14, %v364_v19  ;;  %v8979_v7 = vld [vmem:[#allocation6 + $0x1e0] ss:$8 sps:$4 sm:$0xff]   ;;  %v552_v55 = vshrl.u32 %v9736_v31, 16 }
  0x93   :  { %1677 = vmatprep.subr.bf16.mxu0 %v8960_v10  ;;  %v491_v10 = vrot.slane %v489_v61, 5  ;;  %451 = vst [vmem:[#allocation2 + $0xb8] sm:$0x11] %v450_v53  ;;  %v537_v61 = vshll.u32 %v9815_v4, 16  ;;  %v7797_v16 = vcombine.low %v9810_v2, %v9901_v28  ;;  %v525_v19 = vrot.slane %v523_v6, 5 }
  0x94   :  { %v534_v53 = vor.u32 %v533_v8, %v530_v62  ;;  %v576_v6 = vshrl.u32 %v9746_v54, 16  ;;  %v9044_v62 = vld [vmem:[#allocation6 + $0x30] ss:$8 sps:$4 sm:$0xff]  }
  0x95   :  { %v496_v23 = vor.u32 %v495_v11, %v491_v10  ;;  %v9922_v32 = vsel %vm9912_vm5, %v487_v41, %v491_v10  ;;  %v539_v10 = vrot.slane %v537_v61, 5  ;;  %v543_v11 = vrot.slane %v541_v18, 4  ;;  %v9038_v41 = vld [vmem:[#allocation6 + $0x10] ss:$8 sps:$4 sm:$0xff]   ;;  %v9041_v18 = vld [vmem:[#allocation6 + $0x20] ss:$8 sps:$4 sm:$0xff]  }
  0x96   :  { %1678 = vmatpush1.bf16.msra.mxu0 %v8958_v17  ;;  %v504_v17 = vshrl.u32 %v9716_v0, 16  ;;  %v7798_v0 = vcombine.high %v9810_v2, %v9901_v28 }
  0x97   :  { %1679 = vmatprep.subr.bf16.mxu0 %v8963_v57  ;;  %v513_v57 = vshll.u32 %v9778_v26, 16  ;;  %v497_v43 = vrot.slane %v496_v23, 4  ;;  %v9035_v23 = vld [vmem:[#allocation6] ss:$8 sps:$4 sm:$0xff]   ;;  %v544_v44 = vor.u32 %v543_v11, %v539_v10 }
  0x98   :  { %v506_v45 = vrot.slane %v504_v17, 4  ;;  %v8982_v17 = vld [vmem:[#allocation6 + $0x1f0] ss:$8 sps:$4 sm:$0xff]   ;;  %3373 = vmatpush1.bf16.msra.mxu1 %v9035_v23 }
  0x99   :  { %1623 = vmatmul.mubr.bf16.gmra.mrb[16].mxu0 %v7791_v40  ;;  %v7795_v40 = vcombine.low %v9792_v39, %v9884_v29  ;;  %v515_v50 = vrot.slane %v513_v57, 5  ;;  %v9036_v57 = vld [vmem:[#allocation6 + $0x14] ss:$8 sps:$4 sm:$0xff]  }
  0x9a   :  { %1680 = vmatpush1.bf16.msra.mxu0 %v8961_v27  ;;  %1632 = vmatprep.mubr.bf16.mxu0 %v7794_v42  ;;  %v8978_v27 = vld [vmem:[#allocation6 + $0x1d4] ss:$8 sps:$4 sm:$0xff]  }
  0x9b   :  { %1681 = vmatprep.subr.bf16.mxu0 %v8966_v47  ;;  %v501_v47 = vrot.slane %v499_v30, 5  ;;  %v520_v5 = vor.u32 %v519_v51, %v515_v50  ;;  %v565_v30 = vshrl.u32 %v9832_v24, 16  ;;  %3374 = vmatprep.subr.bf16.mxu1 %v9036_v57  ;;  %v9039_v51 = vld [vmem:[#allocation6 + $0x24] ss:$8 sps:$4 sm:$0xff]   ;;  %v9959_v23 = vld [vmem:[#allocation2 + $0x70] sm:$0x11] }
  0x9c   :  { %3375 = vmatpush1.bf16.msra.mxu1 %v9038_v41 }
  0x9d   :  { %v502_v1 = vsel %vm9912_vm5, %v497_v43, %v501_v47  ;;  %v521_v14 = vrot.slane %v520_v5, 4  ;;  %v8990_v43 = vld [vmem:[#allocation6 + $0x214] ss:$8 sps:$4 sm:$0xff]   ;;  %v567_v60 = vrot.slane %v565_v30, 4  ;;  %v8988_v5 = vld [vmem:[#allocation6 + $0x210] ss:$8 sps:$4 sm:$0xff]   ;;  %3376 = vmatprep.subr.bf16.mxu1 %v9039_v51 }
  0x9e   :  { %1682 = vmatpush1.bf16.msra.mxu0 %v8964_v58  ;;  %v8981_v58 = vld [vmem:[#allocation6 + $0x1e4] ss:$8 sps:$4 sm:$0xff]   ;;  %v609_v51 = vshll.u32 %v9867_v34, 16 }
  0x9f   :  { %1683 = vmatprep.subr.bf16.mxu0 %v8969_v3  ;;  %v510_v3 = vor.u32 %v509_v46, %v506_v45  ;;  %v535_v45 = vrot.slane %v534_v53, 4  ;;  %v554_v46 = vrot.slane %v552_v55, 4  ;;  %v8996_v55 = vld [vmem:[#allocation6 + $0x234] ss:$8 sps:$4 sm:$0xff]  }
  0xa0   :  { %3377 = vmatpush1.bf16.msra.mxu1 %v9041_v18 }
  0xa1   :  { %1633 = vmatmul.mubr.bf16.gmra.mrb[20].mxu0 %v7793_v49  ;;  %v8984_v49 = vld [vmem:[#allocation6 + $0x1f4] ss:$8 sps:$4 sm:$0xff]   ;;  %v540_v8 = vsel %vm9912_vm5, %v535_v45, %v539_v10  ;;  %v9050_v45 = vld [vmem:[#allocation6 + $0x50] ss:$8 sps:$4 sm:$0xff]  }
  0xa2   :  { %1684 = vmatpush1.bf16.msra.mxu0 %v8967_v9  ;;  %1642 = vmatprep.mubr.bf16.mxu0 %v7796_v35  ;;  %v7800_v9 = vcombine.high %v9922_v32, %v502_v1  ;;  %v9932_v35 = vld [vmem:[#allocation2 + $0x40] sm:$0x11] }
  0xa3   :  { %1685 = vmatprep.subr.bf16.mxu0 %v8972_v13  ;;  %v511_v13 = vrot.slane %v510_v3, 4  ;;  %v9042_v3 = vld [vmem:[#allocation6 + $0x34] ss:$8 sps:$4 sm:$0xff]  }
  0xa4   :  { %3378 = vmatprep.subr.bf16.mxu1 %v9042_v3 }
  0xa5   :  { %3379 = vmatpush1.bf16.msra.mxu1 %v9044_v62  ;;  %v9054_v62 = vld [vmem:[#allocation6 + $0x74] ss:$8 sps:$4 sm:$0xff]  }
  0xa6   :  { %1686 = vmatpush1.bf16.msra.mxu0 %v8970_v21  ;;  %v555_v21 = vshll.u32 %v9736_v31, 16  ;;  %v526_v31 = vsel %vm9912_vm5, %v521_v14, %v525_v19  ;;  %v9045_v14 = vld [vmem:[#allocation6 + $0x44] ss:$8 sps:$4 sm:$0xff]   ;;  %v8991_v19 = vld [vmem:[#allocation6 + $0x220] ss:$8 sps:$4 sm:$0xff]  }
  0xa7   :  { %1687 = vmatprep.subr.bf16.mxu0 %v8975_v25  ;;  %v561_v25 = vshll.u32 %v9832_v24, 16  ;;  %3380 = vmatprep.subr.bf16.mxu1 %v9045_v14 }
  0xa8   :  { %v557_v47 = vrot.slane %v555_v21, 5  ;;  %v578_v21 = vrot.slane %v576_v6, 4  ;;  %v9053_v6 = vld [vmem:[#allocation6 + $0x60] ss:$8 sps:$4 sm:$0xff]  }
  0xa9   :  { %1643 = vmatmul.mubr.bf16.gmra.mrb[24].mxu0 %v7795_v40  ;;  %v547_v40 = vshll.u32 %v9932_v35, 16  ;;  %v563_v59 = vrot.slane %v561_v25, 5  ;;  %v9047_v25 = vld [vmem:[#allocation6 + $0x40] ss:$8 sps:$4 sm:$0xff]  }
  0xaa   :  { %1688 = vmatpush1.bf16.msra.mxu0 %v8973_v37  ;;  %1652 = vmatprep.mubr.bf16.mxu0 %v7798_v0  ;;  %v9940_v37 = vsel %vm9912_vm5, %v511_v13, %v515_v50  ;;  %v7799_v0 = vcombine.low %v9922_v32, %v502_v1  ;;  %v8993_v32 = vld [vmem:[#allocation6 + $0x224] ss:$8 sps:$4 sm:$0xff]   ;;  %v558_v1 = vor.u32 %v557_v47, %v554_v46  ;;  %v595_v47 = vshll.u32 %v9959_v23, 16 }
  0xab   :  { %1689 = vmatprep.subr.bf16.mxu0 %v8978_v27  ;;  %v8985_v27 = vld [vmem:[#allocation6 + $0x200] ss:$8 sps:$4 sm:$0xff]   ;;  %v7802_v50 = vcombine.high %v9940_v37, %v526_v31  ;;  %v549_v61 = vrot.slane %v547_v40, 5  ;;  %v568_v11 = vor.u32 %v567_v60, %v563_v59  ;;  %v8994_v40 = vld [vmem:[#allocation6 + $0x230] ss:$8 sps:$4 sm:$0xff]   ;;  %3381 = vmatpush1.bf16.msra.mxu1 %v9047_v25 }
  0xac   :  { %v559_v53 = vrot.slane %v558_v1, 4  ;;  %v8997_v60 = vld [vmem:[#allocation6 + $0x240] ss:$8 sps:$4 sm:$0xff]  }
  0xad   :  { %v569_v30 = vrot.slane %v568_v11, 4  ;;  %v9000_v11 = vld [vmem:[#allocation6 + $0x250] ss:$8 sps:$4 sm:$0xff]  }
  0xae   :  { %1690 = vmatpush1.bf16.msra.mxu0 %v8976_v52  ;;  %v545_v52 = vrot.slane %v544_v44, 4 }
  0xaf   :  { %1691 = vmatprep.subr.bf16.mxu0 %v8981_v58  ;;  %v9947_v58 = vld [vmem:[#allocation2 + $0x58] sm:$0x11] }
  0xb0   :  { %v571_v13 = vshll.u32 %v9947_v58, 16 }
  0xb1   :  { %1653 = vmatmul.mubr.bf16.gmra.mrb[28].mxu0 %v7797_v16  ;;  %v585_v16 = vshll.u32 %v9850_v63, 16 }
  0xb2   :  { %1692 = vmatpush1.bf16.msra.mxu0 %v8979_v7  ;;  %1695 = vmatprep.mubr.bf16.mxu0 %v7800_v9  ;;  %v579_v7 = vshll.u32 %v9746_v54, 16  ;;  %v550_v9 = vsel %vm9912_vm5, %v545_v52, %v549_v61  ;;  %v7801_v54 = vcombine.low %v9940_v37, %v526_v31  ;;  %v573_v57 = vrot.slane %v571_v13, 5  ;;  %v8999_v37 = vld [vmem:[#allocation6 + $0x244] ss:$8 sps:$4 sm:$0xff]   ;;  %v9002_v61 = vld [vmem:[#allocation6 + $0x254] ss:$8 sps:$4 sm:$0xff]  }
  0xb3   :  { %1693 = vmatprep.subr.bf16.mxu0 %v8984_v49  ;;  %v589_v49 = vshrl.u32 %v9850_v63, 16  ;;  %v7804_v22 = vcombine.high %v540_v8, %v550_v9  ;;  %v600_v31 = vshrl.u32 %v9766_v15, 16  ;;  %v9051_v52 = vld [vmem:[#allocation6 + $0x64] ss:$8 sps:$4 sm:$0xff]   ;;  %v627_v13 = vshll.u32 %v9792_v39, 16 }
  0xb4   :  { %v581_v10 = vrot.slane %v579_v7, 5  ;;  %v574_v46 = vsel %vm9912_vm5, %v569_v30, %v573_v57  ;;  %v597_v7 = vrot.slane %v595_v47, 5  ;;  %v9008_v30 = vld [vmem:[#allocation6 + $0x274] ss:$8 sps:$4 sm:$0xff]   ;;  %v9006_v47 = vld [vmem:[#allocation6 + $0x270] ss:$8 sps:$4 sm:$0xff]  }
  0xb5   :  { %v591_v44 = vrot.slane %v589_v49, 4  ;;  %v602_v18 = vrot.slane %v600_v31, 4  ;;  %v9985_v31 = vld [vmem:[#allocation2 + $0xa0] sm:$0x11] }
  0xb6   :  { %1694 = vmatpush1.bf16.msra.mxu0 %v8982_v17  ;;  %v587_v17 = vrot.slane %v585_v16, 5  ;;  %v582_v41 = vor.u32 %v581_v10, %v578_v21  ;;  %v611_v16 = vrot.slane %v609_v51, 5  ;;  %v9011_v51 = vld [vmem:[#allocation6 + $0x284] ss:$8 sps:$4 sm:$0xff]  }
  0xb7   :  { %1776 = vmatprep.subr.bf16.mxu0 %v8987_v36  ;;  %v9048_v36 = vld [vmem:[#allocation6 + $0x54] ss:$8 sps:$4 sm:$0xff]  }
  0xb8   :  { %3382 = vmatprep.subr.bf16.mxu1 %v9048_v36  ;;  %v583_v3 = vrot.slane %v582_v41, 4  ;;  %v629_v36 = vrot.slane %v627_v13, 5 }
  0xb9   :  { %1696 = vmatmul.mubr.bf16.vlgmr.msra.gmra.mrb[0].mxu0 %v7799_v0  ;;  %v592_v0 = vor.u32 %v591_v44, %v587_v17  ;;  %3383 = vmatpush1.bf16.msra.mxu1 %v9050_v45  ;;  %v9003_v44 = vld [vmem:[#allocation6 + $0x260] ss:$8 sps:$4 sm:$0xff]  }
  0xba   :  { %1777 = vmatpush1.bf16.msra.mxu0 %v8985_v27  ;;  %1705 = vmatprep.mubr.bf16.mxu0 %v7802_v50  ;;  %v9964_v27 = vsel %vm9912_vm5, %v559_v53, %v563_v59  ;;  %v613_v50 = vshrl.u32 %v9867_v34, 16  ;;  %v7803_v59 = vcombine.low %v540_v8, %v550_v9  ;;  %v9005_v8 = vld [vmem:[#allocation6 + $0x264] ss:$8 sps:$4 sm:$0xff]   ;;  %v624_v9 = vshrl.u32 %v9792_v39, 16 }
  0xbb   :  { %1778 = vmatprep.subr.bf16.mxu0 %v8990_v43  ;;  %v603_v43 = vshll.u32 %v9766_v15, 16  ;;  %v7806_v15 = vcombine.high %v9964_v27, %v574_v46  ;;  %3384 = vmatprep.subr.bf16.mxu1 %v9051_v52  ;;  %v588_v53 = vsel %vm9912_vm5, %v583_v3, %v587_v17  ;;  %v9057_v39 = vld [vmem:[#allocation6 + $0x84] ss:$8 sps:$4 sm:$0xff]   ;;  %v7805_v25 = vcombine.low %v9964_v27, %v574_v46  ;;  %v9009_v3 = vld [vmem:[#allocation6 + $0x280] ss:$8 sps:$4 sm:$0xff]  }
  0xbc   :  { %v615_v49 = vrot.slane %v613_v50, 4  ;;  %v626_v57 = vrot.slane %v624_v9, 4  ;;  %v648_v27 = vshrl.u32 %v9810_v2, 16  ;;  %v661_v2 = vshrl.u32 %v9901_v28, 16 }
  0xbd   :  { %v605_v1 = vrot.slane %v603_v43, 5  ;;  %3385 = vmatpush1.bf16.msra.mxu1 %v9053_v6 }
  0xbe   :  { %1779 = vmatpush1.bf16.msra.mxu0 %v8988_v5  ;;  %v593_v5 = vrot.slane %v592_v0, 4  ;;  %3386 = vmatprep.subr.bf16.mxu1 %v9054_v62  ;;  %v9059_v0 = vld [vmem:[#allocation6 + $0x80] ss:$8 sps:$4 sm:$0xff]   ;;  %v630_v50 = vor.u32 %v629_v36, %v626_v57  ;;  %v650_v6 = vrot.slane %v648_v27, 4  ;;  %v9995_v62 = vld [vmem:[#allocation2 + $0xb8] sm:$0x11] }
  0xbf   :  { %1780 = vmatprep.subr.bf16.mxu0 %v8993_v32  ;;  %v9973_v32 = vld [vmem:[#allocation2 + $0x88] sm:$0x11]  ;;  %v606_v14 = vor.u32 %v605_v1, %v602_v18  ;;  %v643_v18 = vshll.u32 %v9985_v31, 16  ;;  %v9014_v1 = vld [vmem:[#allocation6 + $0x294] ss:$8 sps:$4 sm:$0xff]   ;;  %v663_v13 = vrot.slane %v661_v2, 4 }
  0xc0   :  { %v598_v21 = vsel %vm9912_vm5, %v593_v5, %v597_v7  ;;  %v619_v10 = vshll.u32 %v9973_v32, 16  ;;  %v9026_v27 = vld [vmem:[#allocation6 + $0x2d4] ss:$8 sps:$4 sm:$0xff]   ;;  %v715_v2 = vrot.slane %v9778_v26, 5 }
  0xc1   :  { %1706 = vmatmul.mubr.bf16.gmra.mrb[4].mxu0 %v7801_v54  ;;  %v637_v54 = vshrl.u32 %v9884_v29, 16  ;;  %v7807_v5 = vcombine.low %v588_v53, %v598_v21 }
  0xc2   :  { %1781 = vmatpush1.bf16.msra.mxu0 %v8991_v19  ;;  %1715 = vmatprep.mubr.bf16.mxu0 %v7804_v22  ;;  %v633_v19 = vshll.u32 %v9884_v29, 16  ;;  %v616_v22 = vor.u32 %v615_v49, %v611_v16  ;;  %v621_v45 = vrot.slane %v619_v10, 5  ;;  %v9015_v10 = vld [vmem:[#allocation6 + $0x2a0] ss:$8 sps:$4 sm:$0xff]  }
  0xc3   :  { %1782 = vmatprep.subr.bf16.mxu0 %v8996_v55  ;;  %v9056_v55 = vld [vmem:[#allocation6 + $0x70] ss:$8 sps:$4 sm:$0xff]   ;;  %v639_v41 = vrot.slane %v637_v54, 4 }
  0xc4   :  { %v635_v17 = vrot.slane %v633_v19, 5  ;;  %v617_v43 = vrot.slane %v616_v22, 4  ;;  %3387 = vmatpush1.bf16.msra.mxu1 %v9056_v55  ;;  %v9017_v19 = vld [vmem:[#allocation6 + $0x2a4] ss:$8 sps:$4 sm:$0xff]   ;;  %v667_v22 = vshll.u32 %v9995_v62, 16 }
  0xc5   :  { %3388 = vmatprep.subr.bf16.mxu1 %v9057_v39 }
  0xc6   :  { %1783 = vmatpush1.bf16.msra.mxu0 %v8994_v40  ;;  %v7808_v40 = vcombine.high %v588_v53, %v598_v21  ;;  %v640_v52 = vor.u32 %v639_v41, %v635_v17  ;;  %v669_v36 = vrot.slane %v667_v22, 5  ;;  %v671_v41 = vld [vmem:[#allocation2] sm:$0xee]  ;;  %v729_v22 = vrot.slane %v9832_v24, 5 }
  0xc7   :  { %1784 = vmatprep.subr.bf16.mxu0 %v8999_v37  ;;  %v607_v37 = vrot.slane %v606_v14, 4  ;;  %v9012_v14 = vld [vmem:[#allocation6 + $0x290] ss:$8 sps:$4 sm:$0xff]  }
  0xc8   :  { %3389 = vmatpush1.bf16.msra.mxu1 %v9059_v0  ;;  %v641_v49 = vrot.slane %v640_v52, 4 }
  0xc9   :  { %1716 = vmatmul.mubr.bf16.gmra.mrb[8].mxu0 %v7803_v59  ;;  %v612_v46 = vsel %vm9912_vm5, %v607_v37, %v611_v16  ;;  %v631_v16 = vrot.slane %v630_v50, 4  ;;  %v7775_v50 = vrot.slane %v671_v41, 9  ;;  %v6654_v37 = vld [vmem:[#allocation8 + $0x2] sm:$0x3] }
  0xca   :  { %1785 = vmatpush1.bf16.msra.mxu0 %v8997_v60  ;;  %1725 = vmatprep.mubr.bf16.mxu0 %v7806_v15  ;;  %v9465_v60 = vld [vmem:[#allocation2 + $0xa8] sm:$0xff]  ;;  %v657_v15 = vshll.u32 %v9901_v28, 16 }
  0xcb   :  { %1786 = vmatprep.subr.bf16.mxu0 %v9002_v61  ;;  %v651_v59 = vshll.u32 %v9465_v60, 16  ;;  %v622_v61 = vsel %vm9912_vm5, %v617_v43, %v621_v45  ;;  %v636_v54 = vsel %vm9912_vm5, %v631_v16, %v635_v17  ;;  %v9023_v17 = vld [vmem:[#allocation6 + $0x2c4] ss:$8 sps:$4 sm:$0xff]   ;;  %v708_v45 = vrot.slane %v9700_v48, 5 }
  0xcc   :  { %v7810_v7 = vcombine.high %v612_v46, %v622_v61  ;;  %v659_v9 = vrot.slane %v657_v15, 5  ;;  %v7809_v39 = vcombine.low %v612_v46, %v622_v61  ;;  %v711_v60 = vrot.slane %v9893_v20, 5  ;;  %v9029_v61 = vld [vmem:[#allocation6 + $0x2e4] ss:$8 sps:$4 sm:$0xff]  }
  0xcd   :  { %v710_v52 = vrot.slane %v708_v45, 4  ;;  %v709_v48 = vsel %vm10002_vm9, %v7775_v50, %v708_v45  ;;  %v718_v16 = vrot.slane %v9916_v56, 5  ;;  %v725_v56 = vrot.slane %v9932_v35, 5  ;;  %v675_v35 = vld [vmem:[#allocation2 + $0x60] sm:$0xee] }
  0xce   :  { %1787 = vmatpush1.bf16.msra.mxu0 %v9000_v11  ;;  %v653_v11 = vrot.slane %v651_v59, 5  ;;  %v664_v21 = vor.u32 %v663_v13, %v659_v9  ;;  %v9024_v59 = vld [vmem:[#allocation6 + $0x2d0] ss:$8 sps:$4 sm:$0xff]   ;;  %v7779_v24 = vrot.slane %v675_v35, 9  ;;  %v743_v45 = vrot.slane %v9867_v34, 5 }
  0xcf   :  { %1788 = vmatprep.subr.bf16.mxu0 %v9005_v8  ;;  %v645_v8 = vrot.slane %v643_v18, 5  ;;  %v672_v18 = vld [vmem:[#allocation2 + $0x18] sm:$0xee]  ;;  %v712_v15 = vsel %vm10002_vm9, %v710_v52, %v711_v60  ;;  %v746_v50 = vrot.slane %v9973_v32, 5  ;;  %v750_v60 = vrot.slane %v9884_v29, 5 }
  0xd0   :  { %v654_v53 = vor.u32 %v653_v11, %v650_v6  ;;  %v665_v57 = vrot.slane %v664_v21, 4  ;;  %v7816_v20 = vcombine.high %v709_v48, %v712_v15  ;;  %v7776_v6 = vrot.slane %v672_v18, 9  ;;  %v673_v11 = vld [vmem:[#allocation2 + $0x30] sm:$0xee]  ;;  %v1058_v35 = vld [vmem:[#allocation8] sm:$0x3] }
  0xd1   :  { %1726 = vmatmul.mubr.bf16.gmra.mrb[12].mxu0 %v7805_v25  ;;  %v646_v55 = vsel %vm9912_vm5, %v641_v49, %v645_v8  ;;  %v9030_v49 = vld [vmem:[#allocation6 + $0x2f0] ss:$8 sps:$4 sm:$0xff]   ;;  %v7815_v13 = vcombine.low %v709_v48, %v712_v15  ;;  %v752_v48 = vrot.slane %v750_v60, 4  ;;  %v753_v15 = vrot.slane %v9985_v31, 5 }
  0xd2   :  { %1789 = vmatpush1.bf16.msra.mxu0 %v9003_v44  ;;  %1735 = vmatprep.mubr.bf16.mxu0 %v7808_v40  ;;  %v9020_v44 = vld [vmem:[#allocation6 + $0x2b4] ss:$8 sps:$4 sm:$0xff]   ;;  %v7812_v25 = vcombine.high %v636_v54, %v646_v55  ;;  %v9018_v40 = vld [vmem:[#allocation6 + $0x2b0] ss:$8 sps:$4 sm:$0xff]   ;;  %v670_v43 = vsel %vm9912_vm5, %v665_v57, %v669_v36  ;;  %v716_v8 = vsel %vm10002_vm9, %v7776_v6, %v715_v2  ;;  %v736_v36 = vrot.slane %v9850_v63, 5 }
  0xd3   :  { %1790 = vmatprep.subr.bf16.mxu0 %v9008_v30  ;;  %v655_v30 = vrot.slane %v654_v53, 4 }
  0xd4   :  { %v738_v41 = vrot.slane %v736_v36, 4 }
  0xd5   :  { %v660_v0 = vsel %vm9912_vm5, %v655_v30, %v659_v9  ;;  %v722_v9 = vrot.slane %v9815_v4, 5 }
  0xd6   :  { %1791 = vmatpush1.bf16.msra.mxu0 %v9006_v47  ;;  %v9021_v47 = vld [vmem:[#allocation6 + $0x2c0] ss:$8 sps:$4 sm:$0xff]   ;;  %v7814_v46 = vcombine.high %v660_v0, %v670_v43 }
  0xd7   :  { %1792 = vmatprep.subr.bf16.mxu0 %v9011_v51  ;;  %v7811_v51 = vcombine.low %v636_v54, %v646_v55  ;;  %v724_v54 = vrot.slane %v722_v9, 4  ;;  %v674_v55 = vld [vmem:[#allocation2 + $0x48] sm:$0xee] }
  0xd9   :  { %1736 = vmatmul.mubr.bf16.gmra.mrb[16].mxu0 %v7807_v5  ;;  %v7813_v5 = vcombine.low %v660_v0, %v670_v43  ;;  %v726_v21 = vsel %vm10002_vm9, %v724_v54, %v725_v56  ;;  %v739_v0 = vrot.slane %v9959_v23, 5  ;;  %v9071_v54 = vld [vmem:[#allocation6 + $0xc0] ss:$8 sps:$4 sm:$0xff]   ;;  %v9072_v56 = vld [vmem:[#allocation6 + $0xd4] ss:$8 sps:$4 sm:$0xff]  }
  0xda   :  { %1793 = vmatpush1.bf16.msra.mxu0 %v9009_v3  ;;  %1745 = vmatprep.mubr.bf16.mxu0 %v7810_v7  ;;  %v9027_v3 = vld [vmem:[#allocation6 + $0x2e0] ss:$8 sps:$4 sm:$0xff]   ;;  %v717_v7 = vrot.slane %v715_v2, 4  ;;  %v754_v2 = vsel %vm10002_vm9, %v752_v48, %v753_v15 }
  0xdb   :  { %1794 = vmatprep.subr.bf16.mxu0 %v9014_v1  ;;  %v9032_v1 = vld [vmem:[#allocation6 + $0x2f4] ss:$8 sps:$4 sm:$0xff]   ;;  %v740_v43 = vsel %vm10002_vm9, %v738_v41, %v739_v0 }
  0xdc   :  { %v719_v26 = vsel %vm10002_vm9, %v717_v7, %v718_v16  ;;  %v760_v7 = vrot.slane %v9995_v62, 5  ;;  %v9065_v62 = vld [vmem:[#allocation6 + $0xa0] ss:$8 sps:$4 sm:$0xff]  }
  0xde   :  { %1795 = vmatpush1.bf16.msra.mxu0 %v9012_v14  ;;  %v7818_v14 = vcombine.high %v716_v8, %v719_v26 }
  0xdf   :  { %1796 = vmatprep.subr.bf16.mxu0 %v9017_v19  ;;  %v7777_v19 = vrot.slane %v673_v11, 9 }
  0xe1   :  { %1746 = vmatmul.mubr.bf16.gmra.mrb[20].mxu0 %v7809_v39  ;;  %v723_v53 = vsel %vm10002_vm9, %v7777_v19, %v722_v9  ;;  %v7778_v39 = vrot.slane %v674_v55, 9  ;;  %v9063_v9 = vld [vmem:[#allocation6 + $0xa4] ss:$8 sps:$4 sm:$0xff]   ;;  %v9074_v55 = vld [vmem:[#allocation6 + $0xd0] ss:$8 sps:$4 sm:$0xff]  }
  0xe2   :  { %1797 = vmatpush1.bf16.msra.mxu0 %v9015_v10  ;;  %1755 = vmatprep.mubr.bf16.mxu0 %v7812_v25  ;;  %v7817_v10 = vcombine.low %v716_v8, %v719_v26  ;;  %v7820_v4 = vcombine.high %v723_v53, %v726_v21  ;;  %v732_v25 = vrot.slane %v9947_v58, 5  ;;  %v737_v58 = vsel %vm10002_vm9, %v7779_v24, %v736_v36  ;;  %v9060_v8 = vld [vmem:[#allocation6 + $0x94] ss:$8 sps:$4 sm:$0xff]   ;;  %v9062_v26 = vld [vmem:[#allocation6 + $0x90] ss:$8 sps:$4 sm:$0xff]  }
  0xe3   :  { %1798 = vmatprep.subr.bf16.mxu0 %v9020_v44  ;;  %v731_v44 = vrot.slane %v729_v22, 4  ;;  %v730_v30 = vsel %vm10002_vm9, %v7778_v39, %v729_v22  ;;  %3390 = vmatprep.subr.bf16.mxu1 %v9060_v8  ;;  %v9069_v19 = vld [vmem:[#allocation6 + $0xc4] ss:$8 sps:$4 sm:$0xff]   ;;  %v9078_v22 = vld [vmem:[#allocation6 + $0xf4] ss:$8 sps:$4 sm:$0xff]   ;;  %v1060_v39 = vlaneseq }
  0xe4   :  { %3391 = vmatpush1.bf16.msra.mxu1 %v9062_v26 }
  0xe5   :  { %v733_v57 = vsel %vm10002_vm9, %v731_v44, %v732_v25  ;;  %3392 = vmatprep.subr.bf16.mxu1 %v9063_v9  ;;  %v1061_v44 = vshrl.u32 %v1060_v39, 7 }
  0xe6   :  { %1799 = vmatpush1.bf16.msra.mxu0 %v9018_v40  ;;  %v7819_v40 = vcombine.low %v723_v53, %v726_v21  ;;  %v9075_v53 = vld [vmem:[#allocation6 + $0xe4] ss:$8 sps:$4 sm:$0xff]   ;;  %v9077_v21 = vld [vmem:[#allocation6 + $0xe0] ss:$8 sps:$4 sm:$0xff]  }
  0xe7   :  { %1800 = vmatprep.subr.bf16.mxu0 %v9023_v17  ;;  %v7822_v17 = vcombine.high %v730_v30, %v733_v57  ;;  %v10058_v25 = vsub.s32 0, %v1061_v44 }
  0xe8   :  { %3393 = vmatpush1.bf16.msra.mxu1 %v9065_v62  ;;  %v9466_v62 = vld [vmem:[#allocation2] sm:$0xff] }
  0xe9   :  { %1756 = vmatmul.mubr.bf16.gmra.mrb[24].mxu0 %v7811_v51  ;;  %v7821_v51 = vcombine.low %v730_v30, %v733_v57  ;;  %v10060_v30 = vsub.s32 1, %v1061_v44  ;;  %v10063_v57 = vrot.slane %v1058_v35, %v10058_v25 }
  0xea   :  { %1801 = vmatpush1.bf16.msra.mxu0 %v9021_v47  ;;  %1765 = vmatprep.mubr.bf16.mxu0 %v7814_v46  ;;  %v676_v47 = vld [vmem:[#allocation2 + $0x78] sm:$0xee]  ;;  %v745_v46 = vrot.slane %v743_v45, 4 }
  0xeb   :  { %1802 = vmatprep.subr.bf16.mxu0 %v9026_v27  ;;  %v7824_v27 = vcombine.high %v737_v58, %v740_v43  ;;  %v7780_v63 = vrot.slane %v676_v47, 9  ;;  %v10066_v36 = vrot.slane %v1058_v35, %v10060_v30 }
  0xec   :  { %v747_v52 = vsel %vm10002_vm9, %v745_v46, %v746_v50 }
  0xed   :  { %v744_v23 = vsel %vm10002_vm9, %v7780_v63, %v743_v45 }
  0xee   :  { %1803 = vmatpush1.bf16.msra.mxu0 %v9024_v59  ;;  %v677_v59 = vld [vmem:[#allocation2 + $0x90] sm:$0xee]  ;;  %v7826_v34 = vcombine.high %v744_v23, %v747_v52 }
  0xef   :  { %1804 = vmatprep.subr.bf16.mxu0 %v9029_v61  ;;  %v7823_v61 = vcombine.low %v737_v58, %v740_v43  ;;  %v7781_v18 = vrot.slane %v677_v59, 9 }
  0xf1   :  { %1766 = vmatmul.mubr.bf16.gmra.mrb[28].mxu0 %v7813_v5  ;;  %v751_v32 = vsel %vm10002_vm9, %v7781_v18, %v750_v60  ;;  %v678_v5 = vld [vmem:[#allocation2 + $0xa8] sm:$0xee] }
  0xf2   :  { %1805 = vmatpush1.bf16.msra.mxu0 %v9027_v3  ;;  %1808 = vmatprep.mubr.bf16.mxu0 %v7816_v20  ;;  %v757_v3 = vrot.slane %v9901_v28, 5  ;;  %v7828_v29 = vcombine.high %v751_v32, %v754_v2  ;;  %v7782_v20 = vrot.slane %v678_v5, 9 }
  0xf3   :  { %1806 = vmatprep.subr.bf16.mxu0 %v9032_v1  ;;  %v7825_v1 = vcombine.low %v744_v23, %v747_v52 }
  0xf4   :  { %v759_v6 = vrot.slane %v757_v3, 4  ;;  %v758_v31 = vsel %vm10002_vm9, %v7782_v20, %v757_v3 }
  0xf6   :  { %1807 = vmatpush1.bf16.msra.mxu0 %v9030_v49  ;;  %v761_v16 = vsel %vm10002_vm9, %v759_v6, %v760_v7  ;;  %v7827_v49 = vcombine.low %v751_v32, %v754_v2 }
  0xf7   :  { %v7830_v11 = vcombine.high %v758_v31, %v761_v16  ;;  %v7829_v28 = vcombine.low %v758_v31, %v761_v16 }
  0xf9   :  { %1809 = vmatmul.mubr.bf16.vlgmr.msra.gmra.mrb[0].mxu0 %v7815_v13  ;;  %v9066_v13 = vld [vmem:[#allocation6 + $0xb4] ss:$8 sps:$4 sm:$0xff]  }
  0xfa   :  { %1818 = vmatprep.mubr.bf16.mxu0 %v7818_v14  ;;  %v9068_v14 = vld [vmem:[#allocation6 + $0xb0] ss:$8 sps:$4 sm:$0xff]   ;;  %3394 = vmatprep.subr.bf16.mxu1 %v9066_v13 }
  0xfb   :  { %3395 = vmatpush1.bf16.msra.mxu1 %v9068_v14 }
  0xfc   :  { %3396 = vmatprep.subr.bf16.mxu1 %v9069_v19 }
  0xff   :  { %3397 = vmatpush1.bf16.msra.mxu1 %v9071_v54 }
 0x100   :  { %3398 = vmatprep.subr.bf16.mxu1 %v9072_v56 }
 0x101   :  { %1819 = vmatmul.mubr.bf16.gmra.mrb[4].mxu0 %v7817_v10  ;;  %v9080_v10 = vld [vmem:[#allocation6 + $0xf0] ss:$8 sps:$4 sm:$0xff]  }
 0x102   :  { %1828 = vmatprep.mubr.bf16.mxu0 %v7820_v4  ;;  %v9083_v4 = vld [vmem:[#allocation6 + $0x104] ss:$8 sps:$4 sm:$0xff]  }
 0x103   :  { %3399 = vmatpush1.bf16.msra.mxu1 %v9074_v55 }
 0x104   :  { %3400 = vmatprep.subr.bf16.mxu1 %v9075_v53 }
 0x107   :  { %3401 = vmatpush1.bf16.msra.mxu1 %v9077_v21 }
 0x108   :  { %3402 = vmatprep.subr.bf16.mxu1 %v9078_v22 }
 0x109   :  { %1829 = vmatmul.mubr.bf16.gmra.mrb[8].mxu0 %v7819_v40 }
 0x10a   :  { %1838 = vmatprep.mubr.bf16.mxu0 %v7822_v17 }
 0x10b   :  { %3403 = vmatpush1.bf16.msra.mxu1 %v9080_v10 }
 0x10c   :  { %3485 = vmatprep.subr.bf16.mxu1 %v9083_v4 }
 0x111   :  { %1839 = vmatmul.mubr.bf16.gmra.mrb[12].mxu0 %v7821_v51 }
 0x112   :  { %1848 = vmatprep.mubr.bf16.mxu0 %v7824_v27 }
 0x119   :  { %1849 = vmatmul.mubr.bf16.gmra.mrb[16].mxu0 %v7823_v61 }
 0x11a   :  { %1858 = vmatprep.mubr.bf16.mxu0 %v7826_v34 }
 0x121   :  { %1859 = vmatmul.mubr.bf16.gmra.mrb[20].mxu0 %v7825_v1 }
 0x122   :  { %1868 = vmatprep.mubr.bf16.mxu0 %v7828_v29 }
 0x129   :  { %1869 = vmatmul.mubr.bf16.gmra.mrb[24].mxu0 %v7827_v49 }
 0x12a   :  { %1878 = vmatprep.mubr.bf16.mxu0 %v7830_v11 }
 0x131   :  { %1879 = vmatmul.mubr.bf16.gmra.mrb[28].mxu0 %v7829_v28  ;;  %v2228_v28 = vld [vmem:[#allocation2 + $0x10] sm:$0x11] }
 0x1cc   :  { %v1810_v40 = vpop.f32.mrb[0].mxu0 }
 0x1cd   :  { %v8495_v17 = vadd.f32 %v1810_v40, %v10063_v57  ;;  %v1812_v24 = vpop.f32.mrb[1].mxu0 }
 0x1ce   :  { %v8496_v41 = vadd.f32 %v1812_v24, %v10066_v36  ;;  %v1814_v0 = vpop.f32.mrb[2].mxu0 }
 0x1cf   :  { %vm1889_vm10 = vcmp.gt.f32.partialorder %v8495_v17, 0.0  ;;  %v1921_v58 = vmul.f32 0.01, %v8495_v17  ;;  %v8497_v43 = vadd.f32 %v1814_v0, %v10063_v57  ;;  %v1816_v45 = vpop.f32.mrb[3].mxu0 }
 0x1d0   :  { %vm1890_vm11 = vcmp.gt.f32.partialorder %v8496_v41, 0.0  ;;  %v1922_v47 = vmul.f32 0.01, %v8496_v41  ;;  %v8498_v51 = vadd.f32 %v1816_v45, %v10066_v36 }
 0x1d1   :  { %v1953_v27 = vsel %vm1889_vm10, %v8495_v17, %v1921_v58  ;;  %vm1891_vm12 = vcmp.gt.f32.partialorder %v8497_v43, 0.0  ;;  %v1923_v63 = vmul.f32 0.01, %v8497_v43  ;;  %v2231_v58 = vld [vmem:[#allocation2 + $0x18] sm:$0xff] }
 0x1d2   :  { %v1954_v46 = vsel %vm1890_vm11, %v8496_v41, %v1922_v47  ;;  %vm1892_vm13 = vcmp.gt.f32.partialorder %v8498_v51, 0.0  ;;  %v1924_v50 = vmul.f32 0.01, %v8498_v51  ;;  %v9081_v41 = vld [vmem:[#allocation6 + $0x100] ss:$8 sps:$4 sm:$0xff]  }
 0x1d3   :  { %v8447_v23 = vpack.c.bf16 %v1954_v46, %v1953_v27  ;;  %v1955_v52 = vsel %vm1891_vm12, %v8497_v43, %v1923_v63  ;;  %v9086_v27 = vld [vmem:[#allocation6 + $0x114] ss:$8 sps:$4 sm:$0xff]  }
 0x1d4   :  { %v1956_v60 = vsel %vm1892_vm13, %v8498_v51, %v1924_v50  ;;  %v1820_v59 = vpop.f32.mrb[4].mxu0 }
 0x1d5   :  { %v2066_v61 = vshrl.u32 %v8447_v23, 16  ;;  %v8448_v34 = vpack.c.bf16 %v1956_v60, %v1955_v52  ;;  %v8499_v18 = vadd.f32 %v1820_v59, %v10063_v57  ;;  %v1822_v48 = vpop.f32.mrb[5].mxu0  ;;  %v2069_v15 = vshll.u32 %v8447_v23, 16 }
 0x1d6   :  { %v8500_v32 = vadd.f32 %v1822_v48, %v10066_v36  ;;  %v1824_v2 = vpop.f32.mrb[6].mxu0 }
 0x1d7   :  { %v2068_v3 = vrot.slane %v2066_v61, 7  ;;  %v2074_v5 = vshrl.u32 %v8448_v34, 16  ;;  %v2077_v1 = vshll.u32 %v8448_v34, 16  ;;  %vm1893_vm1 = vcmp.gt.f32.partialorder %v8499_v18, 0.0  ;;  %v1826_v29 = vpop.f32.mrb[7].mxu0 }
 0x1d8   :  { %v1925_v20 = vmul.f32 0.01, %v8499_v18  ;;  %vm1894_vm0 = vcmp.gt.f32.partialorder %v8500_v32, 0.0  ;;  %v1926_v6 = vmul.f32 0.01, %v8500_v32  ;;  %v8501_v7 = vadd.f32 %v1824_v2, %v10063_v57 }
 0x1d9   :  { %v2071_v31 = vor.u32 %v2069_v15, %v2068_v3  ;;  %v2072_v16 = vrot.slane %v2068_v3, 4  ;;  %v2076_v49 = vrot.slane %v2074_v5, 7  ;;  %v8502_v11 = vadd.f32 %v1826_v29, %v10066_v36  ;;  %v9084_v34 = vld [vmem:[#allocation6 + $0x110] ss:$8 sps:$4 sm:$0xff]   ;;  %v9089_v2 = vld [vmem:[#allocation6 + $0x124] ss:$8 sps:$4 sm:$0xff]  }
 0x1da   :  { %v1957_v8 = vsel %vm1893_vm1, %v8499_v18, %v1925_v20  ;;  %v1958_v26 = vsel %vm1894_vm0, %v8500_v32, %v1926_v6  ;;  %vm1895_vm2 = vcmp.gt.f32.partialorder %v8501_v7, 0.0  ;;  %v1927_v9 = vmul.f32 0.01, %v8501_v7  ;;  %v2235_v5 = vld [vmem:[#allocation2 + $0x28] sm:$0x11] }
 0x1db   :  { %v10078_v13 = vsel %vm9693_vm15, %v2071_v31, %v9466_v62  ;;  %v2079_v14 = vor.u32 %v2077_v1, %v2076_v49  ;;  %v2081_v19 = vrot.slane %v2076_v49, 4  ;;  %v8449_v54 = vpack.c.bf16 %v1958_v26, %v1957_v8  ;;  %v9087_v26 = vld [vmem:[#allocation6 + $0x120] ss:$8 sps:$4 sm:$0xff]  }
 0x1dc   :  { %2226 = vst [vmem:[#allocation2] sm:$0xff] %v10078_v13  ;;  %v1959_v56 = vsel %vm1895_vm2, %v8501_v7, %v1927_v9  ;;  %vm1896_vm3 = vcmp.gt.f32.partialorder %v8502_v11, 0.0  ;;  %v1928_v55 = vmul.f32 0.01, %v8502_v11  ;;  %v1830_v53 = vpop.f32.mrb[8].mxu0 }
 0x1dd   :  { %v10083_v21 = vsel %vm9683_vm14, %v2072_v16, %v2079_v14  ;;  %v2229_v22 = vsel %vm9670_vm6, %v2081_v19, %v2228_v28  ;;  %v2083_v10 = vshrl.u32 %v8449_v54, 16  ;;  %v2086_v4 = vshll.u32 %v8449_v54, 16  ;;  %v1832_v39 = vpop.f32.mrb[9].mxu0 }
 0x1de   :  { %2230 = vst [vmem:[#allocation2 + $0x10] sm:$0x11] %v2229_v22  ;;  %v1960_v44 = vsel %vm1896_vm3, %v8502_v11, %v1928_v55  ;;  %v8503_v35 = vadd.f32 %v1830_v53, %v10063_v57  ;;  %v8504_v40 = vadd.f32 %v1832_v39, %v10066_v36  ;;  %v1834_v17 = vpop.f32.mrb[10].mxu0  ;;  %v7952_v24 = vcombine.high %v10078_v13, %v10083_v21  ;;  %v2238_v55 = vld [vmem:[#allocation2 + $0x30] sm:$0xff] }
 0x1df   :  { %v2085_v0 = vrot.slane %v2083_v10, 7  ;;  %v8450_v43 = vpack.c.bf16 %v1960_v44, %v1959_v56  ;;  %v8505_v45 = vadd.f32 %v1834_v17, %v10063_v57  ;;  %v1836_v47 = vpop.f32.mrb[11].mxu0  ;;  %v7951_v51 = vcombine.low %v10078_v13, %v10083_v21  ;;  %v9092_v56 = vld [vmem:[#allocation6 + $0x134] ss:$8 sps:$4 sm:$0xff]  }
 0x1e0   :  { %vm1897_vm4 = vcmp.gt.f32.partialorder %v8503_v35, 0.0  ;;  %v1929_v63 = vmul.f32 0.01, %v8503_v35  ;;  %vm1898_vm7 = vcmp.gt.f32.partialorder %v8504_v40, 0.0  ;;  %v1930_v46 = vmul.f32 0.01, %v8504_v40  ;;  %3404 = vmatprep.mubr.bf16.mxu1 %v7952_v24 }
 0x1e1   :  { %v2088_v50 = vor.u32 %v2086_v4, %v2085_v0  ;;  %v2091_v23 = vshrl.u32 %v8450_v43, 16  ;;  %v2094_v52 = vshll.u32 %v8450_v43, 16  ;;  %3405 = vmatmul.mubr.bf16.vlgmr.msra.gmra.mrb[0].mxu1 %v7951_v51  ;;  %vm1899_vm8 = vcmp.gt.f32.partialorder %v8505_v45, 0.0  ;;  %v9090_v24 = vld [vmem:[#allocation6 + $0x130] ss:$8 sps:$4 sm:$0xff]  }
 0x1e2   :  { %v1961_v60 = vsel %vm1897_vm4, %v8503_v35, %v1929_v63  ;;  %v1962_v59 = vsel %vm1898_vm7, %v8504_v40, %v1930_v46  ;;  %v1931_v61 = vmul.f32 0.01, %v8505_v45  ;;  %3486 = vmatpush1.bf16.msra.mxu1 %v9081_v41  ;;  %v8506_v32 = vadd.f32 %v1836_v47, %v10066_v36 }
 0x1e3   :  { %v10096_v18 = vsel %vm9693_vm15, %v2088_v50, %v2231_v58  ;;  %v2093_v48 = vrot.slane %v2091_v23, 7  ;;  %v8451_v15 = vpack.c.bf16 %v1962_v59, %v1961_v60  ;;  %3487 = vmatprep.subr.bf16.mxu1 %v9086_v27  ;;  %v2089_v3 = vrot.slane %v2085_v0, 4  ;;  %v2242_v50 = vld [vmem:[#allocation2 + $0x40] sm:$0x11] }
 0x1e4   :  { %2233 = vst [vmem:[#allocation2 + $0x18] sm:$0xff] %v10096_v18  ;;  %v1963_v1 = vsel %vm1899_vm8, %v8505_v45, %v1931_v61  ;;  %v1840_v29 = vpop.f32.mrb[12].mxu0  ;;  %vm1900_vm10 = vcmp.gt.f32.partialorder %v8506_v32, 0.0  ;;  %v1932_v49 = vmul.f32 0.01, %v8506_v32 }
 0x1e5   :  { %v2096_v20 = vor.u32 %v2094_v52, %v2093_v48  ;;  %v2098_v6 = vrot.slane %v2093_v48, 4  ;;  %v2100_v7 = vshrl.u32 %v8451_v15, 16  ;;  %v2103_v31 = vshll.u32 %v8451_v15, 16  ;;  %v1842_v16 = vpop.f32.mrb[13].mxu0  ;;  %v9095_v45 = vld [vmem:[#allocation6 + $0x144] ss:$8 sps:$4 sm:$0xff]  }
 0x1e6   :  { %v8507_v11 = vadd.f32 %v1840_v29, %v10063_v57  ;;  %v8508_v28 = vadd.f32 %v1842_v16, %v10066_v36  ;;  %v1844_v8 = vpop.f32.mrb[14].mxu0  ;;  %3488 = vmatpush1.bf16.msra.mxu1 %v9084_v34  ;;  %v1964_v53 = vsel %vm1900_vm10, %v8506_v32, %v1932_v49 }
 0x1e7   :  { %v10104_v9 = vsel %vm9683_vm14, %v2089_v3, %v2096_v20  ;;  %v2236_v62 = vsel %vm9670_vm6, %v2098_v6, %v2235_v5  ;;  %v2102_v14 = vrot.slane %v2100_v7, 7  ;;  %v8509_v19 = vadd.f32 %v1844_v8, %v10063_v57  ;;  %v1846_v54 = vpop.f32.mrb[15].mxu0  ;;  %3489 = vmatprep.subr.bf16.mxu1 %v9089_v2  ;;  %v9093_v2 = vld [vmem:[#allocation6 + $0x140] ss:$8 sps:$4 sm:$0xff]   ;;  %v9098_v20 = vld [vmem:[#allocation6 + $0x154] ss:$8 sps:$4 sm:$0xff]  }
 0x1e8   :  { %2237 = vst [vmem:[#allocation2 + $0x28] sm:$0x11] %v2236_v62  ;;  %vm1901_vm11 = vcmp.gt.f32.partialorder %v8507_v11, 0.0  ;;  %v1933_v22 = vmul.f32 0.01, %v8507_v11  ;;  %vm1902_vm12 = vcmp.gt.f32.partialorder %v8508_v28, 0.0  ;;  %v8452_v39 = vpack.c.bf16 %v1964_v53, %v1963_v1 }
 0x1e9   :  { %v2105_v10 = vor.u32 %v2103_v31, %v2102_v14  ;;  %v2106_v4 = vrot.slane %v2102_v14, 4  ;;  %v1934_v44 = vmul.f32 0.01, %v8508_v28  ;;  %vm1903_vm13 = vcmp.gt.f32.partialorder %v8509_v19, 0.0 }
 0x1ea   :  { %v1965_v35 = vsel %vm1901_vm11, %v8507_v11, %v1933_v22  ;;  %v1935_v40 = vmul.f32 0.01, %v8509_v19  ;;  %v8510_v17 = vadd.f32 %v1846_v54, %v10066_v36  ;;  %3490 = vmatpush1.bf16.msra.mxu1 %v9087_v26  ;;  %v2108_v0 = vshrl.u32 %v8452_v39, 16  ;;  %v2245_v11 = vld [vmem:[#allocation2 + $0x48] sm:$0xff]  ;;  %v9096_v54 = vld [vmem:[#allocation6 + $0x150] ss:$8 sps:$4 sm:$0xff]  }
 0x1eb   :  { %v10113_v41 = vsel %vm9693_vm15, %v2105_v10, %v2238_v55  ;;  %v2111_v58 = vshll.u32 %v8452_v39, 16  ;;  %v1966_v43 = vsel %vm1902_vm12, %v8508_v28, %v1934_v44  ;;  %3491 = vmatprep.subr.bf16.mxu1 %v9092_v56  ;;  %v7954_v60 = vcombine.high %v10096_v18, %v10104_v9  ;;  %v9101_v10 = vld [vmem:[#allocation6 + $0x164] ss:$8 sps:$4 sm:$0xff]   ;;  %v2249_v44 = vld [vmem:[#allocation2 + $0x58] sm:$0x11] }
 0x1ec   :  { %2240 = vst [vmem:[#allocation2 + $0x30] sm:$0xff] %v10113_v41  ;;  %v8453_v47 = vpack.c.bf16 %v1966_v43, %v1965_v35  ;;  %v1967_v51 = vsel %vm1903_vm13, %v8509_v19, %v1935_v40  ;;  %vm1904_vm1 = vcmp.gt.f32.partialorder %v8510_v17, 0.0  ;;  %v1936_v27 = vmul.f32 0.01, %v8510_v17  ;;  %v1850_v63 = vpop.f32.mrb[16].mxu0 }
 0x1ed   :  { %v2110_v46 = vrot.slane %v2108_v0, 7  ;;  %v8511_v23 = vadd.f32 %v1850_v63, %v10063_v57  ;;  %v1852_v52 = vpop.f32.mrb[17].mxu0  ;;  %v7953_v59 = vcombine.low %v10096_v18, %v10104_v9  ;;  %3414 = vmatprep.mubr.bf16.mxu1 %v7954_v60  ;;  %v2305_v8 = vshrl.u32 %v10078_v13, 16  ;;  %v9104_v60 = vld [vmem:[#allocation6 + $0x174] ss:$8 sps:$4 sm:$0xff]  }
 0x1ee   :  { %v2117_v61 = vshrl.u32 %v8453_v47, 16  ;;  %v2120_v34 = vshll.u32 %v8453_v47, 16  ;;  %v1968_v48 = vsel %vm1904_vm1, %v8510_v17, %v1936_v27  ;;  %v8512_v15 = vadd.f32 %v1852_v52, %v10066_v36  ;;  %v1854_v32 = vpop.f32.mrb[18].mxu0  ;;  %3492 = vmatpush1.bf16.msra.mxu1 %v9090_v24  ;;  %v9099_v47 = vld [vmem:[#allocation6 + $0x160] ss:$8 sps:$4 sm:$0xff]  }
 0x1ef   :  { %v2113_v3 = vor.u32 %v2111_v58, %v2110_v46  ;;  %v2115_v5 = vrot.slane %v2110_v46, 4  ;;  %v8454_v1 = vpack.c.bf16 %v1968_v48, %v1967_v51  ;;  %vm1905_vm0 = vcmp.gt.f32.partialorder %v8511_v23, 0.0  ;;  %v1856_v29 = vpop.f32.mrb[19].mxu0  ;;  %3493 = vmatprep.subr.bf16.mxu1 %v9095_v45  ;;  %3415 = vmatmul.mubr.bf16.gmra.mrb[4].mxu1 %v7953_v59  ;;  %v2252_v59 = vld [vmem:[#allocation2 + $0x60] sm:$0xff] }
 0x1f0   :  { %v2119_v6 = vrot.slane %v2117_v61, 7  ;;  %v1937_v7 = vmul.f32 0.01, %v8511_v23  ;;  %vm1906_vm2 = vcmp.gt.f32.partialorder %v8512_v15, 0.0  ;;  %v1938_v31 = vmul.f32 0.01, %v8512_v15 }
 0x1f1   :  { %v10124_v16 = vsel %vm9683_vm14, %v2106_v4, %v2113_v3  ;;  %v2243_v49 = vsel %vm9670_vm6, %v2115_v5, %v2242_v50  ;;  %v2125_v28 = vshrl.u32 %v8454_v1, 16  ;;  %v2128_v62 = vshll.u32 %v8454_v1, 16  ;;  %v9102_v1 = vld [vmem:[#allocation6 + $0x170] ss:$8 sps:$4 sm:$0xff]  }
 0x1f2   :  { %2244 = vst [vmem:[#allocation2 + $0x40] sm:$0x11] %v2243_v49  ;;  %v2122_v26 = vor.u32 %v2120_v34, %v2119_v6  ;;  %v1969_v14 = vsel %vm1905_vm0, %v8511_v23, %v1937_v7  ;;  %v1970_v19 = vsel %vm1906_vm2, %v8512_v15, %v1938_v31  ;;  %3494 = vmatpush1.bf16.msra.mxu1 %v9093_v2  ;;  %v2123_v4 = vrot.slane %v2119_v6, 4 }
 0x1f3   :  { %v2127_v56 = vrot.slane %v2125_v28, 7  ;;  %v8455_v55 = vpack.c.bf16 %v1970_v19, %v1969_v14  ;;  %v8513_v53 = vadd.f32 %v1854_v32, %v10063_v57  ;;  %v8514_v22 = vadd.f32 %v1856_v29, %v10066_v36  ;;  %3495 = vmatprep.subr.bf16.mxu1 %v9098_v20 }
 0x1f4   :  { %v10134_v39 = vsel %vm9693_vm15, %v2122_v26, %v2245_v11  ;;  %v1860_v35 = vpop.f32.mrb[20].mxu0  ;;  %v7956_v40 = vcombine.high %v10113_v41, %v10124_v16  ;;  %v7955_v17 = vcombine.low %v10113_v41, %v10124_v16  ;;  %v9107_v11 = vld [vmem:[#allocation6 + $0x184] ss:$8 sps:$4 sm:$0xff]  }
 0x1f5   :  { %2247 = vst [vmem:[#allocation2 + $0x48] sm:$0xff] %v10134_v39  ;;  %v2130_v24 = vor.u32 %v2128_v62, %v2127_v56  ;;  %v2132_v0 = vrot.slane %v2127_v56, 4  ;;  %v2134_v58 = vshrl.u32 %v8455_v55, 16  ;;  %v2137_v43 = vshll.u32 %v8455_v55, 16  ;;  %v1862_v45 = vpop.f32.mrb[21].mxu0 }
 0x1f6   :  { %vm1907_vm3 = vcmp.gt.f32.partialorder %v8513_v53, 0.0  ;;  %v1939_v51 = vmul.f32 0.01, %v8513_v53  ;;  %vm1908_vm4 = vcmp.gt.f32.partialorder %v8514_v22, 0.0  ;;  %v1940_v27 = vmul.f32 0.01, %v8514_v22  ;;  %3424 = vmatprep.mubr.bf16.mxu1 %v7956_v40  ;;  %3496 = vmatpush1.bf16.msra.mxu1 %v9096_v54 }
 0x1f7   :  { %v10143_v63 = vsel %vm9683_vm14, %v2123_v4, %v2130_v24  ;;  %v2250_v46 = vsel %vm9670_vm6, %v2132_v0, %v2249_v44  ;;  %v10147_v50 = vrot.slane %v2134_v58, 7  ;;  %v8515_v23 = vadd.f32 %v1860_v35, %v10063_v57  ;;  %v1864_v52 = vpop.f32.mrb[22].mxu0  ;;  %3497 = vmatprep.subr.bf16.mxu1 %v9101_v10  ;;  %3425 = vmatmul.mubr.bf16.gmra.mrb[8].mxu1 %v7955_v17  ;;  %v2256_v56 = vld [vmem:[#allocation2 + $0x70] sm:$0x11]  ;;  %v9105_v17 = vld [vmem:[#allocation6 + $0x180] ss:$8 sps:$4 sm:$0xff]  }
 0x1f8   :  { %2251 = vst [vmem:[#allocation2 + $0x58] sm:$0x11] %v2250_v46  ;;  %v1971_v61 = vsel %vm1907_vm3, %v8513_v53, %v1939_v51  ;;  %v1972_v34 = vsel %vm1908_vm4, %v8514_v22, %v1940_v27  ;;  %v8516_v48 = vadd.f32 %v1862_v45, %v10066_v36  ;;  %v8517_v15 = vadd.f32 %v1864_v52, %v10063_v57  ;;  %v1866_v32 = vpop.f32.mrb[23].mxu0 }
 0x1f9   :  { %v2139_v2 = vor.u32 %v2137_v43, %v10147_v50  ;;  %v2140_v3 = vrot.slane %v10147_v50, 4  ;;  %v8456_v5 = vpack.c.bf16 %v1972_v34, %v1971_v61  ;;  %vm1909_vm7 = vcmp.gt.f32.partialorder %v8515_v23, 0.0 }
 0x1fa   :  { %v1941_v29 = vmul.f32 0.01, %v8515_v23  ;;  %vm1910_vm8 = vcmp.gt.f32.partialorder %v8516_v48, 0.0  ;;  %v1942_v20 = vmul.f32 0.01, %v8516_v48  ;;  %vm1911_vm10 = vcmp.gt.f32.partialorder %v8517_v15, 0.0  ;;  %3498 = vmatpush1.bf16.msra.mxu1 %v9099_v47 }
 0x1fb   :  { %v10156_v6 = vsel %vm9693_vm15, %v2139_v2, %v2252_v59  ;;  %v2142_v7 = vshrl.u32 %v8456_v5, 16  ;;  %v2145_v31 = vshll.u32 %v8456_v5, 16  ;;  %v1943_v49 = vmul.f32 0.01, %v8517_v15  ;;  %3499 = vmatprep.subr.bf16.mxu1 %v9104_v60  ;;  %v9110_v47 = vld [vmem:[#allocation6 + $0x194] ss:$8 sps:$4 sm:$0xff]  }
 0x1fc   :  { %2254 = vst [vmem:[#allocation2 + $0x60] sm:$0xff] %v10156_v6  ;;  %v1973_v28 = vsel %vm1909_vm7, %v8515_v23, %v1941_v29  ;;  %v1974_v26 = vsel %vm1910_vm8, %v8516_v48, %v1942_v20  ;;  %v8518_v62 = vadd.f32 %v1866_v32, %v10066_v36  ;;  %v1870_v14 = vpop.f32.mrb[24].mxu0  ;;  %v7958_v19 = vcombine.high %v10134_v39, %v10143_v63  ;;  %v2259_v60 = vld [vmem:[#allocation2 + $0x78] sm:$0xff] }
 0x1fd   :  { %v2144_v54 = vrot.slane %v2142_v7, 7  ;;  %v8457_v55 = vpack.c.bf16 %v1974_v26, %v1973_v28  ;;  %v1975_v53 = vsel %vm1911_vm10, %v8517_v15, %v1943_v49  ;;  %v8519_v22 = vadd.f32 %v1870_v14, %v10063_v57  ;;  %v1872_v10 = vpop.f32.mrb[25].mxu0  ;;  %v9108_v15 = vld [vmem:[#allocation6 + $0x190] ss:$8 sps:$4 sm:$0xff]  }
 0x1fe   :  { %vm1912_vm11 = vcmp.gt.f32.partialorder %v8518_v62, 0.0  ;;  %v1944_v4 = vmul.f32 0.01, %v8518_v62  ;;  %v8520_v44 = vadd.f32 %v1872_v10, %v10066_v36  ;;  %v1874_v35 = vpop.f32.mrb[26].mxu0  ;;  %3434 = vmatprep.mubr.bf16.mxu1 %v7958_v19  ;;  %v7957_v40 = vcombine.low %v10134_v39, %v10143_v63  ;;  %3500 = vmatpush1.bf16.msra.mxu1 %v9102_v1  ;;  %v9113_v1 = vld [vmem:[#allocation6 + $0x1a4] ss:$8 sps:$4 sm:$0xff]  }
 0x1ff   :  { %v2147_v24 = vor.u32 %v2145_v31, %v2144_v54  ;;  %v2149_v0 = vrot.slane %v2144_v54, 4  ;;  %v2151_v58 = vshrl.u32 %v8457_v55, 16  ;;  %v2154_v43 = vshll.u32 %v8457_v55, 16  ;;  %v1876_v45 = vpop.f32.mrb[27].mxu0  ;;  %3501 = vmatprep.subr.bf16.mxu1 %v9107_v11 }
 0x200   :  { %v1976_v51 = vsel %vm1912_vm11, %v8518_v62, %v1944_v4  ;;  %vm1913_vm12 = vcmp.gt.f32.partialorder %v8519_v22, 0.0  ;;  %v1945_v27 = vmul.f32 0.01, %v8519_v22  ;;  %vm1914_vm13 = vcmp.gt.f32.partialorder %v8520_v44, 0.0  ;;  %3435 = vmatmul.mubr.bf16.gmra.mrb[12].mxu1 %v7957_v40  ;;  %v2263_v62 = vld [vmem:[#allocation2 + $0x88] sm:$0x11] }
 0x201   :  { %v10169_v46 = vsel %vm9683_vm14, %v2140_v3, %v2147_v24  ;;  %v2257_v50 = vsel %vm9670_vm6, %v2149_v0, %v2256_v56  ;;  %v2153_v23 = vrot.slane %v2151_v58, 7  ;;  %v8458_v52 = vpack.c.bf16 %v1976_v51, %v1975_v53  ;;  %v9111_v53 = vld [vmem:[#allocation6 + $0x1a0] ss:$8 sps:$4 sm:$0xff]   ;;  %v9116_v40 = vld [vmem:[#allocation6 + $0x1b4] ss:$8 sps:$4 sm:$0xff]  }
 0x202   :  { %2258 = vst [vmem:[#allocation2 + $0x70] sm:$0x11] %v2257_v50  ;;  %v1977_v59 = vsel %vm1913_vm12, %v8519_v22, %v1945_v27  ;;  %v1946_v61 = vmul.f32 0.01, %v8520_v44  ;;  %v8521_v34 = vadd.f32 %v1874_v35, %v10063_v57  ;;  %v8522_v48 = vadd.f32 %v1876_v45, %v10066_v36  ;;  %3502 = vmatpush1.bf16.msra.mxu1 %v9105_v17 }
 0x203   :  { %v2156_v32 = vor.u32 %v2154_v43, %v2153_v23  ;;  %v2157_v2 = vrot.slane %v2153_v23, 4  ;;  %v2159_v5 = vshrl.u32 %v8458_v52, 16  ;;  %v2162_v3 = vshll.u32 %v8458_v52, 16  ;;  %3503 = vmatprep.subr.bf16.mxu1 %v9110_v47  ;;  %v2266_v47 = vld [vmem:[#allocation2 + $0x90] sm:$0xff] }
 0x204   :  { %v1978_v29 = vsel %vm1914_vm13, %v8520_v44, %v1946_v61  ;;  %vm1915_vm1 = vcmp.gt.f32.partialorder %v8521_v34, 0.0  ;;  %v1947_v20 = vmul.f32 0.01, %v8521_v34  ;;  %vm1916_vm0 = vcmp.gt.f32.partialorder %v8522_v48, 0.0  ;;  %v1880_v7 = vpop.f32.mrb[28].mxu0 }
 0x205   :  { %v10178_v31 = vsel %vm9693_vm15, %v2156_v32, %v2259_v60  ;;  %v2161_v49 = vrot.slane %v2159_v5, 7  ;;  %v8459_v11 = vpack.c.bf16 %v1978_v29, %v1977_v59  ;;  %v1948_v28 = vmul.f32 0.01, %v8522_v48  ;;  %v1882_v26 = vpop.f32.mrb[29].mxu0  ;;  %v9114_v52 = vld [vmem:[#allocation6 + $0x1b0] ss:$8 sps:$4 sm:$0xff]  }
 0x206   :  { %2261 = vst [vmem:[#allocation2 + $0x78] sm:$0xff] %v10178_v31  ;;  %v1979_v14 = vsel %vm1915_vm1, %v8521_v34, %v1947_v20  ;;  %v8523_v19 = vadd.f32 %v1880_v7, %v10063_v57  ;;  %v8524_v54 = vadd.f32 %v1882_v26, %v10066_v36  ;;  %v1884_v56 = vpop.f32.mrb[30].mxu0  ;;  %v7960_v55 = vcombine.high %v10156_v6, %v10169_v46  ;;  %v9119_v34 = vld [vmem:[#allocation6 + $0x1c4] ss:$8 sps:$4 sm:$0xff]  }
 0x207   :  { %3504 = vmatpush1.bf16.msra.mxu1 %v9108_v15  ;;  %v2164_v22 = vor.u32 %v2162_v3, %v2161_v49  ;;  %v2166_v10 = vrot.slane %v2161_v49, 4  ;;  %v2168_v4 = vshrl.u32 %v8459_v11, 16  ;;  %v2171_v44 = vshll.u32 %v8459_v11, 16  ;;  %v1886_v35 = vpop.f32.mrb[31].mxu0  ;;  %v2270_v3 = vld [vmem:[#allocation2 + $0xa0] sm:$0x11] }
 0x208   :  { %3505 = vmatprep.subr.bf16.mxu1 %v9113_v1  ;;  %v1980_v17 = vsel %vm1916_vm0, %v8522_v48, %v1948_v28  ;;  %vm1917_vm2 = vcmp.gt.f32.partialorder %v8523_v19, 0.0  ;;  %v1949_v24 = vmul.f32 0.01, %v8523_v19  ;;  %vm1918_vm3 = vcmp.gt.f32.partialorder %v8524_v54, 0.0  ;;  %3444 = vmatprep.mubr.bf16.mxu1 %v7960_v55  ;;  %v9117_v49 = vld [vmem:[#allocation6 + $0x1c0] ss:$8 sps:$4 sm:$0xff]  }
 0x209   :  { %v10188_v0 = vsel %vm9683_vm14, %v2157_v2, %v2164_v22  ;;  %v2264_v58 = vsel %vm9670_vm6, %v2166_v10, %v2263_v62  ;;  %v2170_v43 = vrot.slane %v2168_v4, 7  ;;  %v8460_v45 = vpack.c.bf16 %v1980_v17, %v1979_v14  ;;  %v9122_v14 = vld [vmem:[#allocation6 + $0x1d4] ss:$8 sps:$4 sm:$0xff]  }
 0x20a   :  { %2265 = vst [vmem:[#allocation2 + $0x88] sm:$0x11] %v2264_v58  ;;  %v1981_v51 = vsel %vm1917_vm2, %v8523_v19, %v1949_v24  ;;  %v1950_v27 = vmul.f32 0.01, %v8524_v54  ;;  %v8525_v50 = vadd.f32 %v1884_v56, %v10063_v57  ;;  %v8526_v23 = vadd.f32 %v1886_v35, %v10066_v36  ;;  %v2273_v35 = vld [vmem:[#allocation2 + $0xa8] sm:$0xff] }
 0x20b   :  { %3506 = vmatpush1.bf16.msra.mxu1 %v9111_v53  ;;  %v2173_v60 = vor.u32 %v2171_v44, %v2170_v43  ;;  %v2176_v59 = vshrl.u32 %v8460_v45, 16  ;;  %v2179_v61 = vshll.u32 %v8460_v45, 16  ;;  %v2314_v48 = vshll.u32 %v10083_v21, 16  ;;  %v10216_v44 = vld [vmem:[#allocation2 + $0x10] sm:$0x11] }
 0x20c   :  { %3507 = vmatprep.subr.bf16.mxu1 %v9116_v40  ;;  %v1982_v15 = vsel %vm1918_vm3, %v8524_v54, %v1950_v27  ;;  %vm1919_vm4 = vcmp.gt.f32.partialorder %v8525_v50, 0.0  ;;  %v1951_v32 = vmul.f32 0.01, %v8525_v50  ;;  %vm1920_vm7 = vcmp.gt.f32.partialorder %v8526_v23, 0.0  ;;  %v9120_v24 = vld [vmem:[#allocation6 + $0x1d0] ss:$8 sps:$4 sm:$0xff]  }
 0x20d   :  { %v10198_v2 = vsel %vm9693_vm15, %v2173_v60, %v2266_v47  ;;  %v2178_v57 = vrot.slane %v2176_v59, 7  ;;  %v8461_v36 = vpack.c.bf16 %v1982_v15, %v1981_v51  ;;  %v1952_v5 = vmul.f32 0.01, %v8526_v23  ;;  %v9125_v51 = vld [vmem:[#allocation6 + $0x1e4] ss:$8 sps:$4 sm:$0xff]  }
 0x20e   :  { %2268 = vst [vmem:[#allocation2 + $0x90] sm:$0xff] %v10198_v2  ;;  %v1983_v1 = vsel %vm1919_vm4, %v8525_v50, %v1951_v32  ;;  %v7959_v29 = vcombine.low %v10156_v6, %v10169_v46  ;;  %v7962_v20 = vcombine.high %v10178_v31, %v10188_v0  ;;  %v7961_v7 = vcombine.low %v10178_v31, %v10188_v0 }
 0x20f   :  { %3508 = vmatpush1.bf16.msra.mxu1 %v9114_v52  ;;  %v2174_v11 = vrot.slane %v2170_v43, 4  ;;  %v2181_v28 = vor.u32 %v2179_v61, %v2178_v57  ;;  %v2183_v26 = vrot.slane %v2178_v57, 4  ;;  %v2185_v62 = vshrl.u32 %v8461_v36, 16 }
 0x210   :  { %3509 = vmatprep.subr.bf16.mxu1 %v9119_v34  ;;  %v2188_v19 = vshll.u32 %v8461_v36, 16  ;;  %v1984_v54 = vsel %vm1920_vm7, %v8526_v23, %v1952_v5  ;;  %3445 = vmatmul.mubr.bf16.gmra.mrb[16].mxu1 %v7959_v29  ;;  %v2308_v56 = vshll.u32 %v10078_v13, 16  ;;  %v2318_v55 = vshrl.u32 %v10083_v21, 16  ;;  %v2277_v23 = vld [vmem:[#allocation2 + $0xb8] sm:$0x11] }
 0x211   :  { %v10212_v53 = vsel %vm9683_vm14, %v2174_v11, %v2181_v28  ;;  %v2271_v22 = vsel %vm9670_vm6, %v2183_v26, %v2270_v3  ;;  %v2187_v10 = vrot.slane %v2185_v62, 7  ;;  %v8462_v4 = vpack.c.bf16 %v1984_v54, %v1983_v1  ;;  %3454 = vmatprep.mubr.bf16.mxu1 %v7962_v20  ;;  %v9128_v29 = vld [vmem:[#allocation6 + $0x1f4] ss:$8 sps:$4 sm:$0xff]  }
 0x212   :  { %2272 = vst [vmem:[#allocation2 + $0xa0] sm:$0x11] %v2271_v22  ;;  %v7964_v40 = vcombine.high %v10198_v2, %v10212_v53  ;;  %v7963_v17 = vcombine.low %v10198_v2, %v10212_v53  ;;  %v10222_v58 = vrot.slane %v2314_v48, 5  ;;  %v2320_v43 = vrot.slane %v2318_v55, 4  ;;  %v10232_v48 = vld [vmem:[#allocation2 + $0x28] sm:$0x11] }
 0x213   :  { %3510 = vmatpush1.bf16.msra.mxu1 %v9117_v49  ;;  %v2190_v45 = vor.u32 %v2188_v19, %v2187_v10  ;;  %v2193_v47 = vshrl.u32 %v8462_v4, 16  ;;  %v2307_v27 = vrot.slane %v2305_v8, 4  ;;  %v2196_v50 = vshll.u32 %v8462_v4, 16  ;;  %v9123_v8 = vld [vmem:[#allocation6 + $0x1e0] ss:$8 sps:$4 sm:$0xff]  }
 0x214   :  { %3511 = vmatprep.subr.bf16.mxu1 %v9122_v14  ;;  %v2310_v52 = vrot.slane %v2308_v56, 5  ;;  %v2324_v60 = vshll.u32 %v10216_v44, 16  ;;  %v2329_v59 = vshrl.u32 %v10096_v18, 16  ;;  %v2332_v15 = vshll.u32 %v10096_v18, 16  ;;  %v9126_v56 = vld [vmem:[#allocation6 + $0x1f0] ss:$8 sps:$4 sm:$0xff]  }
 0x215   :  { %v10230_v61 = vsel %vm9693_vm15, %v2190_v45, %v2273_v35  ;;  %v2195_v34 = vrot.slane %v2193_v47, 7  ;;  %v2338_v32 = vshll.u32 %v10104_v9, 16  ;;  %v2191_v13 = vrot.slane %v2187_v10, 4  ;;  %v9131_v4 = vld [vmem:[#allocation6 + $0x204] ss:$8 sps:$4 sm:$0xff]  }
 0x216   :  { %2275 = vst [vmem:[#allocation2 + $0xa8] sm:$0xff] %v10230_v61  ;;  %v2321_v57 = vor.u32 %v2320_v43, %v10222_v58  ;;  %v2331_v36 = vrot.slane %v2329_v59, 4  ;;  %v2342_v5 = vshrl.u32 %v10104_v9, 16  ;;  %v2334_v20 = vrot.slane %v2332_v15, 5  ;;  %v10252_v43 = vld [vmem:[#allocation2 + $0x40] sm:$0x11] }
 0x217   :  { %3512 = vmatpush1.bf16.msra.mxu1 %v9120_v24  ;;  %v2198_v3 = vor.u32 %v2196_v50, %v2195_v34  ;;  %v2200_v1 = vrot.slane %v2195_v34, 4  ;;  %v2340_v49 = vrot.slane %v2338_v32, 5  ;;  %v2311_v18 = vor.u32 %v2310_v52, %v2307_v27 }
 0x218   :  { %3513 = vmatprep.subr.bf16.mxu1 %v9125_v51  ;;  %3455 = vmatmul.mubr.bf16.gmra.mrb[20].mxu1 %v7961_v7  ;;  %v2344_v11 = vrot.slane %v2342_v5, 4  ;;  %v2348_v28 = vshll.u32 %v10232_v48, 16  ;;  %v2326_v14 = vrot.slane %v2324_v60, 5  ;;  %v2353_v19 = vshrl.u32 %v10113_v41, 16 }
 0x219   :  { %v10242_v26 = vsel %vm9683_vm14, %v2191_v13, %v2198_v3  ;;  %v2278_v62 = vsel %vm9670_vm6, %v2200_v1, %v2277_v23  ;;  %3464 = vmatprep.mubr.bf16.mxu1 %v7964_v40  ;;  %v2335_v55 = vor.u32 %v2334_v20, %v2331_v36  ;;  %v2322_v10 = vrot.slane %v2321_v57, 4 }
 0x21a   :  { %2279 = vst [vmem:[#allocation2 + $0xb8] sm:$0x11] %v2278_v62  ;;  %v7966_v54 = vcombine.high %v10230_v61, %v10242_v26  ;;  %v7965_v7 = vcombine.low %v10230_v61, %v10242_v26  ;;  %v2345_v22 = vor.u32 %v2344_v11, %v2340_v49  ;;  %v2356_v35 = vshll.u32 %v10113_v41, 16 }
 0x21b   :  { %3514 = vmatpush1.bf16.msra.mxu1 %v9123_v8  ;;  %v2312_v40 = vrot.slane %v2311_v18, 4  ;;  %v2350_v24 = vrot.slane %v2348_v28, 5  ;;  %v2362_v45 = vshll.u32 %v10124_v16, 16  ;;  %v2366_v47 = vshrl.u32 %v10124_v16, 16 }
 0x21c   :  { %3515 = vmatprep.subr.bf16.mxu1 %v9128_v29  ;;  %v10258_v51 = vsel %vm9912_vm5, %v2322_v10, %v2326_v14  ;;  %v2336_v27 = vrot.slane %v2335_v55, 4  ;;  %v2346_v50 = vrot.slane %v2345_v22, 4  ;;  %v2355_v23 = vrot.slane %v2353_v19, 4  ;;  %v10291_v29 = vld [vmem:[#allocation2 + $0x70] sm:$0x11] }
 0x21d   :  { %v2358_v52 = vrot.slane %v2356_v35, 5  ;;  %v2372_v41 = vshll.u32 %v10252_v43, 16  ;;  %v10267_v60 = vsel %vm9912_vm5, %v2312_v40, %v10222_v58  ;;  %v10273_v34 = vrot.slane %v2362_v45, 5  ;;  %v10307_v35 = vld [vmem:[#allocation2 + $0x88] sm:$0x11] }
 0x21e   :  { %v10271_v59 = vsel %vm9912_vm5, %v2346_v50, %v2350_v24  ;;  %v2368_v15 = vrot.slane %v2366_v47, 4  ;;  %v7967_v32 = vcombine.low %v10267_v60, %v10258_v51  ;;  %v2377_v13 = vshrl.u32 %v10134_v39, 16 }
 0x21f   :  { %3516 = vmatpush1.bf16.msra.mxu1 %v9126_v56  ;;  %v2404_v8 = vshll.u32 %v10156_v6, 16  ;;  %v7968_v58 = vcombine.high %v10267_v60, %v10258_v51  ;;  %v10284_v57 = vsel %vm9912_vm5, %v2336_v27, %v2340_v49  ;;  %v2359_v36 = vor.u32 %v2358_v52, %v2355_v23  ;;  %v9177_v23 = vld [vmem:[#allocation6 + $0x300] ss:$8 sps:$4 sm:$0xff]   ;;  %v10357_v51 = vld [vmem:[#allocation2 + $0x58] sm:$0x11] }
 0x220   :  { %3598 = vmatprep.subr.bf16.mxu1 %v9131_v4  ;;  %3465 = vmatmul.mubr.bf16.gmra.mrb[24].mxu1 %v7963_v17  ;;  %v2401_v17 = vshrl.u32 %v10156_v6, 16  ;;  %v2380_v5 = vshll.u32 %v10134_v39, 16  ;;  %v7970_v3 = vcombine.high %v10284_v57, %v10271_v59  ;;  %v10289_v1 = vrot.slane %v2372_v41, 5 }
 0x221   :  { %3474 = vmatprep.mubr.bf16.mxu1 %v7966_v54  ;;  %v2406_v18 = vrot.slane %v2404_v8, 5  ;;  %v2369_v11 = vor.u32 %v2368_v15, %v10273_v34  ;;  %v2386_v49 = vshll.u32 %v10143_v63, 16  ;;  %v2410_v28 = vshll.u32 %v10169_v46, 16 }
 0x222   :  { %v2403_v20 = vrot.slane %v2401_v17, 4  ;;  %v10298_v62 = vrot.slane %v2377_v13, 4  ;;  %v2390_v39 = vshrl.u32 %v10143_v63, 16  ;;  %v2414_v19 = vshrl.u32 %v10169_v46, 16 }
 0x223   :  { %v10302_v54 = vrot.slane %v2359_v36, 4  ;;  %v10304_v56 = vrot.slane %v2380_v5, 5  ;;  %v2412_v55 = vrot.slane %v2410_v28, 5  ;;  %v2420_v22 = vshll.u32 %v10291_v29, 16 }
 0x224   :  { %v2407_v14 = vor.u32 %v2406_v18, %v2403_v20  ;;  %v2416_v4 = vrot.slane %v2414_v19, 4  ;;  %v2425_v40 = vshrl.u32 %v10178_v31, 16  ;;  %v2428_v24 = vshll.u32 %v10178_v31, 16  ;;  %v9179_v31 = vld [vmem:[#allocation6 + $0x304] ss:$8 sps:$4 sm:$0xff]  }
 0x225   :  { %v10311_v45 = vrot.slane %v2369_v11, 4  ;;  %v10313_v47 = vrot.slane %v2386_v49, 5  ;;  %v2434_v27 = vshll.u32 %v10188_v0, 16  ;;  %v2438_v50 = vshrl.u32 %v10188_v0, 16  ;;  %5324 = vmatprep.subr.bf16.mxu0 %v9179_v31 }
 0x226   :  { %v2408_v10 = vrot.slane %v2407_v14, 4  ;;  %v10317_v52 = vrot.slane %v2390_v39, 4  ;;  %v2417_v15 = vor.u32 %v2416_v4, %v2412_v55  ;;  %v2422_v13 = vrot.slane %v2420_v22, 5  ;;  %v10326_v39 = vld [vmem:[#allocation2 + $0xa0] sm:$0x11]  ;;  %5325 = vmatpush1.bf16.msra.mxu0 %v9177_v23 }
 0x227   :  { %v2427_v17 = vrot.slane %v2425_v40, 4  ;;  %v2430_v8 = vrot.slane %v2428_v24, 5  ;;  %v2436_v36 = vrot.slane %v2434_v27, 5  ;;  %v2440_v5 = vrot.slane %v2438_v50, 4  ;;  %v9129_v22 = vld [vmem:[#allocation6 + $0x200] ss:$8 sps:$4 sm:$0xff]  }
 0x228   :  { %3475 = vmatmul.mubr.bf16.gmra.mrb[28].mxu1 %v7965_v7  ;;  %v10321_v41 = vsel %vm9912_vm5, %v2408_v10, %v2412_v55  ;;  %v9182_v7 = vld [vmem:[#allocation6 + $0x314] ss:$8 sps:$4 sm:$0xff]   ;;  %v2418_v20 = vrot.slane %v2417_v15, 4  ;;  %v2444_v18 = vshll.u32 %v10307_v35, 16  ;;  %v2449_v11 = vshrl.u32 %v10198_v2, 16 }
 0x229   :  { %3517 = vmatprep.mubr.bf16.mxu1 %v7968_v58  ;;  %v2452_v58 = vshll.u32 %v10198_v2, 16  ;;  %v2431_v49 = vor.u32 %v2430_v8, %v2427_v17  ;;  %v2441_v28 = vor.u32 %v2440_v5, %v2436_v36  ;;  %v2458_v14 = vshll.u32 %v10212_v53, 16  ;;  %v9180_v55 = vld [vmem:[#allocation6 + $0x310] ss:$8 sps:$4 sm:$0xff]   ;;  %5326 = vmatprep.subr.bf16.mxu0 %v9182_v7  ;;  %v9134_v2 = vld [vmem:[#allocation6 + $0x214] ss:$8 sps:$4 sm:$0xff]  }
 0x22a   :  { %v2462_v19 = vshrl.u32 %v10212_v53, 16  ;;  %v10332_v10 = vsel %vm9912_vm5, %v2418_v20, %v2422_v13  ;;  %v2446_v4 = vrot.slane %v2444_v18, 5  ;;  %v2451_v40 = vrot.slane %v2449_v11, 4  ;;  %v9185_v23 = vld [vmem:[#allocation6 + $0x324] ss:$8 sps:$4 sm:$0xff]   ;;  %5327 = vmatpush1.bf16.msra.mxu0 %v9180_v55 }
 0x22b   :  { %v2454_v24 = vrot.slane %v2452_v58, 5  ;;  %v7976_v27 = vcombine.high %v10321_v41, %v10332_v10  ;;  %v7975_v50 = vcombine.low %v10321_v41, %v10332_v10  ;;  %v2432_v15 = vrot.slane %v2431_v49, 4  ;;  %v9132_v17 = vld [vmem:[#allocation6 + $0x210] ss:$8 sps:$4 sm:$0xff]   ;;  %v9183_v49 = vld [vmem:[#allocation6 + $0x320] ss:$8 sps:$4 sm:$0xff]   ;;  %5328 = vmatprep.subr.bf16.mxu0 %v9185_v23 }
 0x22c   :  { %v2442_v31 = vrot.slane %v2441_v28, 4  ;;  %v2460_v5 = vrot.slane %v2458_v14, 5  ;;  %v2464_v6 = vrot.slane %v2462_v19, 4  ;;  %v2468_v13 = vshll.u32 %v10326_v39, 16  ;;  %v10350_v18 = vld [vmem:[#allocation2 + $0xb8] sm:$0x11] }
 0x22d   :  { %v2455_v8 = vor.u32 %v2454_v24, %v2451_v40  ;;  %v10344_v7 = vsel %vm9912_vm5, %v2432_v15, %v2436_v36  ;;  %v2473_v11 = vshrl.u32 %v10230_v61, 16  ;;  %v2476_v58 = vshll.u32 %v10230_v61, 16  ;;  %v9188_v14 = vld [vmem:[#allocation6 + $0x334] ss:$8 sps:$4 sm:$0xff]   ;;  %v9137_v61 = vld [vmem:[#allocation6 + $0x224] ss:$8 sps:$4 sm:$0xff]  }
 0x22e   :  { %v10348_v20 = vsel %vm9912_vm5, %v2442_v31, %v2446_v4  ;;  %v2465_v28 = vor.u32 %v2464_v6, %v2460_v5  ;;  %v2470_v19 = vrot.slane %v2468_v13, 5  ;;  %v2482_v40 = vshll.u32 %v10242_v26, 16  ;;  %5329 = vmatpush1.bf16.msra.mxu0 %v9183_v49  ;;  %v9186_v23 = vld [vmem:[#allocation6 + $0x330] ss:$8 sps:$4 sm:$0xff]   ;;  %v9135_v13 = vld [vmem:[#allocation6 + $0x220] ss:$8 sps:$4 sm:$0xff]  }
 0x22f   :  { %v7978_v60 = vcombine.high %v10344_v7, %v10348_v20  ;;  %v2456_v36 = vrot.slane %v2455_v8, 4  ;;  %v2475_v55 = vrot.slane %v2473_v11, 4  ;;  %v2478_v4 = vrot.slane %v2476_v58, 5  ;;  %5330 = vmatprep.subr.bf16.mxu0 %v9188_v14  ;;  %v9162_v41 = vld [vmem:[#allocation6 + $0x2b0] ss:$8 sps:$4 sm:$0xff]  }
 0x230   :  { %3518 = vmatmul.mubr.bf16.vlgmr.msra.gmra.mrb[0].mxu1 %v7967_v32  ;;  %v7977_v32 = vcombine.low %v10344_v7, %v10348_v20  ;;  %v2486_v24 = vshrl.u32 %v10242_v26, 16  ;;  %v2492_v15 = vshll.u32 %v10350_v18, 16  ;;  %v2375_v6 = vsel %vm9912_vm5, %v10311_v45, %v10289_v1  ;;  %v9140_v45 = vld [vmem:[#allocation6 + $0x234] ss:$8 sps:$4 sm:$0xff]   ;;  %v9167_v10 = vld [vmem:[#allocation6 + $0x2c4] ss:$8 sps:$4 sm:$0xff]  }
 0x231   :  { %3527 = vmatprep.mubr.bf16.mxu1 %v7970_v3  ;;  %3599 = vmatpush1.bf16.msra.mxu1 %v9129_v22  ;;  %v10366_v3 = vsel %vm9912_vm5, %v2456_v36, %v2460_v5  ;;  %v2466_v22 = vrot.slane %v2465_v28, 4  ;;  %v2479_v31 = vor.u32 %v2478_v4, %v2475_v55  ;;  %v2484_v8 = vrot.slane %v2482_v40, 5  ;;  %v9191_v36 = vld [vmem:[#allocation6 + $0x344] ss:$8 sps:$4 sm:$0xff]   ;;  %v9138_v55 = vld [vmem:[#allocation6 + $0x230] ss:$8 sps:$4 sm:$0xff]  }
 0x232   :  { %3600 = vmatprep.subr.bf16.mxu1 %v9134_v2  ;;  %v2396_v2 = vshll.u32 %v10357_v51, 16  ;;  %v2365_v5 = vsel %vm9912_vm5, %v10302_v54, %v10273_v34  ;;  %v2383_v11 = vor.u32 %v10304_v56, %v10298_v62  ;;  %v2488_v1 = vrot.slane %v2486_v24, 4  ;;  %5331 = vmatpush1.bf16.msra.mxu0 %v9186_v23  ;;  %v9194_v40 = vld [vmem:[#allocation6 + $0x354] ss:$8 sps:$4 sm:$0xff]   ;;  %v9141_v23 = vld [vmem:[#allocation6 + $0x240] ss:$8 sps:$4 sm:$0xff]  }
 0x233   :  { %v10383_v58 = vsel %vm9912_vm5, %v2466_v22, %v2470_v19  ;;  %v2480_v54 = vrot.slane %v2479_v31, 4  ;;  %v7972_v62 = vcombine.high %v2365_v5, %v2375_v6  ;;  %v2494_v28 = vrot.slane %v2492_v15, 5  ;;  %v9143_v22 = vld [vmem:[#allocation6 + $0x244] ss:$8 sps:$4 sm:$0xff]   ;;  %5332 = vmatprep.subr.bf16.mxu0 %v9191_v36  ;;  %v9144_v36 = vld [vmem:[#allocation6 + $0x250] ss:$8 sps:$4 sm:$0xff]  }
 0x234   :  { %v7980_v49 = vcombine.high %v10366_v3, %v10383_v58  ;;  %v7979_v34 = vcombine.low %v10366_v3, %v10383_v58  ;;  %v2489_v56 = vor.u32 %v2488_v1, %v2484_v8  ;;  %v11566_v19 = vcombine.low %v10284_v57, %v10271_v59  ;;  %v9146_v1 = vld [vmem:[#allocation6 + $0x254] ss:$8 sps:$4 sm:$0xff]   ;;  %v9168_v20 = vld [vmem:[#allocation6 + $0x2d0] ss:$8 sps:$4 sm:$0xff]  }
 0x235   :  { %3601 = vmatpush1.bf16.msra.mxu1 %v9132_v17  ;;  %v2393_v17 = vor.u32 %v10317_v52, %v10313_v47  ;;  %v2398_v14 = vrot.slane %v2396_v2, 5  ;;  %v9189_v52 = vld [vmem:[#allocation6 + $0x340] ss:$8 sps:$4 sm:$0xff]   ;;  %v2384_v24 = vrot.slane %v2383_v11, 4  ;;  %v2533_v7 = vrot.slane %v10216_v44, 5 }
 0x236   :  { %3602 = vmatprep.subr.bf16.mxu1 %v9137_v61  ;;  %v10396_v61 = vsel %vm9912_vm5, %v2480_v54, %v2484_v8  ;;  %v2490_v4 = vrot.slane %v2489_v56, 4  ;;  %5333 = vmatpush1.bf16.msra.mxu0 %v9189_v52  ;;  %v9192_v8 = vld [vmem:[#allocation6 + $0x350] ss:$8 sps:$4 sm:$0xff]   ;;  %v9195_v54 = vld [vmem:[#allocation6 + $0x360] ss:$8 sps:$4 sm:$0xff]   ;;  %v2537_v58 = vrot.slane %v10104_v9, 5 }
 0x237   :  { %v2394_v15 = vrot.slane %v2393_v17, 4  ;;  %5334 = vmatprep.subr.bf16.mxu0 %v9194_v40  ;;  %v2389_v11 = vsel %vm9912_vm5, %v2384_v24, %v10313_v47  ;;  %v9149_v56 = vld [vmem:[#allocation6 + $0x264] ss:$8 sps:$4 sm:$0xff]   ;;  %v9152_v47 = vld [vmem:[#allocation6 + $0x274] ss:$8 sps:$4 sm:$0xff]   ;;  %v2530_v24 = vrot.slane %v10083_v21, 5 }
 0x238   :  { %3528 = vmatmul.mubr.bf16.gmra.mrb[4].mxu1 %v11566_v19  ;;  %v10400_v59 = vsel %vm9912_vm5, %v2490_v4, %v2494_v28  ;;  %v9150_v19 = vld [vmem:[#allocation6 + $0x270] ss:$8 sps:$4 sm:$0xff]   ;;  %v9153_v52 = vld [vmem:[#allocation6 + $0x280] ss:$8 sps:$4 sm:$0xff]   ;;  %v9176_v44 = vld [vmem:[#allocation6 + $0x2f4] ss:$8 sps:$4 sm:$0xff]  }
 0x239   :  { %3537 = vmatprep.mubr.bf16.mxu1 %v7972_v62  ;;  %3603 = vmatpush1.bf16.msra.mxu1 %v9135_v13  ;;  %v2399_v57 = vsel %vm9912_vm5, %v2394_v15, %v2398_v14  ;;  %v7982_v2 = vcombine.high %v10396_v61, %v10400_v59  ;;  %v7981_v31 = vcombine.low %v10396_v61, %v10400_v59  ;;  %v9200_v62 = vld [vmem:[#allocation6 + $0x374] ss:$8 sps:$4 sm:$0xff]   ;;  %v9155_v14 = vld [vmem:[#allocation6 + $0x284] ss:$8 sps:$4 sm:$0xff]   ;;  %v9156_v4 = vld [vmem:[#allocation6 + $0x290] ss:$8 sps:$4 sm:$0xff]  }
 0x23a   :  { %3604 = vmatprep.subr.bf16.mxu1 %v9140_v45  ;;  %v7971_v13 = vcombine.low %v2365_v5, %v2375_v6  ;;  %v9197_v45 = vld [vmem:[#allocation6 + $0x364] ss:$8 sps:$4 sm:$0xff]   ;;  %v7974_v17 = vcombine.high %v2389_v11, %v2399_v57  ;;  %5335 = vmatpush1.bf16.msra.mxu0 %v9192_v8  ;;  %v9198_v6 = vld [vmem:[#allocation6 + $0x370] ss:$8 sps:$4 sm:$0xff]   ;;  %v9147_v5 = vld [vmem:[#allocation6 + $0x260] ss:$8 sps:$4 sm:$0xff]   ;;  %v7973_v28 = vcombine.low %v2389_v11, %v2399_v57 }
 0x23b   :  { %5336 = vmatprep.subr.bf16.mxu0 %v9197_v45  ;;  %v9159_v40 = vld [vmem:[#allocation6 + $0x2a0] ss:$8 sps:$4 sm:$0xff]   ;;  %v2532_v57 = vrot.slane %v2530_v24, 4  ;;  %v2498_v59 = vld [vmem:[#allocation2 + $0x30] sm:$0xee] }
 0x23c   :  { %v2496_v15 = vld [vmem:[#allocation2] sm:$0xee] }
 0x23d   :  { %3605 = vmatpush1.bf16.msra.mxu1 %v9138_v55  ;;  %v9158_v55 = vld [vmem:[#allocation6 + $0x294] ss:$8 sps:$4 sm:$0xff]   ;;  %v2534_v21 = vsel %vm10002_vm9, %v2532_v57, %v2533_v7  ;;  %v9171_v8 = vld [vmem:[#allocation6 + $0x2e0] ss:$8 sps:$4 sm:$0xff]   ;;  %v2572_v57 = vrot.slane %v10212_v53, 5  ;;  %v2582_v53 = vrot.slane %v10350_v18, 5 }
 0x23e   :  { %3606 = vmatprep.subr.bf16.mxu1 %v9143_v22  ;;  %5337 = vmatpush1.bf16.msra.mxu0 %v9195_v54  ;;  %v9164_v22 = vld [vmem:[#allocation6 + $0x2b4] ss:$8 sps:$4 sm:$0xff]   ;;  %v2544_v54 = vrot.slane %v10124_v16, 5  ;;  %v2554_v16 = vrot.slane %v10357_v51, 5  ;;  %v9204_v18 = vld [vmem:[#allocation6 + $0x390] ss:$8 sps:$4 sm:$0xff]  }
 0x23f   :  { %5338 = vmatprep.subr.bf16.mxu0 %v9200_v62 }
 0x240   :  { %3538 = vmatmul.mubr.bf16.gmra.mrb[8].mxu1 %v7971_v13  ;;  %v9174_v13 = vld [vmem:[#allocation6 + $0x2f0] ss:$8 sps:$4 sm:$0xff]  }
 0x241   :  { %3547 = vmatprep.mubr.bf16.mxu1 %v7974_v17  ;;  %3607 = vmatpush1.bf16.msra.mxu1 %v9141_v23  ;;  %v2540_v23 = vrot.slane %v10232_v48, 5  ;;  %v2547_v48 = vrot.slane %v10252_v43, 5 }
 0x242   :  { %3608 = vmatprep.subr.bf16.mxu1 %v9146_v1  ;;  %5339 = vmatpush1.bf16.msra.mxu0 %v9198_v6  ;;  %v2539_v1 = vrot.slane %v2537_v58, 4 }
 0x244   :  { %v2541_v45 = vsel %vm10002_vm9, %v2539_v1, %v2540_v23 }
 0x245   :  { %3609 = vmatpush1.bf16.msra.mxu1 %v9144_v36  ;;  %v2546_v36 = vrot.slane %v2544_v54, 4 }
 0x246   :  { %3610 = vmatprep.subr.bf16.mxu1 %v9149_v56 }
 0x247   :  { %v2548_v62 = vsel %vm10002_vm9, %v2546_v36, %v2547_v48  ;;  %v9207_v48 = vld [vmem:[#allocation6 + $0x3a0] ss:$8 sps:$4 sm:$0xff]   ;;  %v9210_v36 = vld [vmem:[#allocation6 + $0x3b0] ss:$8 sps:$4 sm:$0xff]  }
 0x248   :  { %3548 = vmatmul.mubr.bf16.gmra.mrb[12].mxu1 %v7973_v28 }
 0x249   :  { %3557 = vmatprep.mubr.bf16.mxu1 %v7976_v27  ;;  %3611 = vmatpush1.bf16.msra.mxu1 %v9147_v5  ;;  %v9161_v27 = vld [vmem:[#allocation6 + $0x2a4] ss:$8 sps:$4 sm:$0xff]   ;;  %v2551_v5 = vrot.slane %v10143_v63, 5  ;;  %v2561_v63 = vrot.slane %v10291_v29, 5 }
 0x24a   :  { %3612 = vmatprep.subr.bf16.mxu1 %v9152_v47  ;;  %v2499_v47 = vld [vmem:[#allocation2 + $0x48] sm:$0xee] }
 0x24b   :  { %v2553_v43 = vrot.slane %v2551_v5, 4 }
 0x24d   :  { %3613 = vmatpush1.bf16.msra.mxu1 %v9150_v19  ;;  %v7946_v19 = vrot.slane %v2499_v47, 9  ;;  %v9219_v47 = vld [vmem:[#allocation6 + $0x3e0] ss:$8 sps:$4 sm:$0xff]  }
 0x24e   :  { %3614 = vmatprep.subr.bf16.mxu1 %v9155_v14  ;;  %v2555_v14 = vsel %vm10002_vm9, %v2553_v43, %v2554_v16  ;;  %v9221_v16 = vld [vmem:[#allocation6 + $0x3e4] ss:$8 sps:$4 sm:$0xff]   ;;  %v9224_v43 = vld [vmem:[#allocation6 + $0x3f4] ss:$8 sps:$4 sm:$0xff]  }
 0x250   :  { %3558 = vmatmul.mubr.bf16.gmra.mrb[16].mxu1 %v7975_v50  ;;  %v9165_v50 = vld [vmem:[#allocation6 + $0x2c0] ss:$8 sps:$4 sm:$0xff]  }
 0x251   :  { %3567 = vmatprep.mubr.bf16.mxu1 %v7978_v60  ;;  %3615 = vmatpush1.bf16.msra.mxu1 %v9153_v52  ;;  %v9170_v60 = vld [vmem:[#allocation6 + $0x2d4] ss:$8 sps:$4 sm:$0xff]  }
 0x252   :  { %3616 = vmatprep.subr.bf16.mxu1 %v9158_v55  ;;  %v2552_v55 = vsel %vm10002_vm9, %v7946_v19, %v2551_v5  ;;  %v9216_v5 = vld [vmem:[#allocation6 + $0x3d0] ss:$8 sps:$4 sm:$0xff]  }
 0x253   :  { %v9222_v19 = vld [vmem:[#allocation6 + $0x3f0] ss:$8 sps:$4 sm:$0xff]  }
 0x255   :  { %3617 = vmatpush1.bf16.msra.mxu1 %v9156_v4  ;;  %v2558_v4 = vrot.slane %v10169_v46, 5  ;;  %v2568_v46 = vrot.slane %v10307_v35, 5  ;;  %v2574_v35 = vrot.slane %v2572_v57, 4 }
 0x256   :  { %3618 = vmatprep.subr.bf16.mxu1 %v9161_v27  ;;  %v7990_v27 = vcombine.high %v2552_v55, %v2555_v14 }
 0x257   :  { %v2560_v51 = vrot.slane %v2558_v4, 4 }
 0x258   :  { %3568 = vmatmul.mubr.bf16.gmra.mrb[20].mxu1 %v7977_v32  ;;  %v9173_v32 = vld [vmem:[#allocation6 + $0x2e4] ss:$8 sps:$4 sm:$0xff]  }
 0x259   :  { %3577 = vmatprep.mubr.bf16.mxu1 %v7980_v49  ;;  %3619 = vmatpush1.bf16.msra.mxu1 %v9159_v40  ;;  %v7943_v49 = vrot.slane %v2496_v15, 9  ;;  %v2500_v40 = vld [vmem:[#allocation2 + $0x60] sm:$0xee]  ;;  %v2501_v15 = vld [vmem:[#allocation2 + $0x78] sm:$0xee] }
 0x25a   :  { %3620 = vmatprep.subr.bf16.mxu1 %v9164_v22  ;;  %v7947_v22 = vrot.slane %v2500_v40, 9  ;;  %v7948_v7 = vrot.slane %v2501_v15, 9 }
 0x25b   :  { %v2531_v3 = vsel %vm10002_vm9, %v7943_v49, %v2530_v24 }
 0x25c   :  { %v7983_v17 = vcombine.low %v2531_v3, %v2534_v21 }
 0x25d   :  { %3621 = vmatpush1.bf16.msra.mxu1 %v9162_v41  ;;  %v2562_v41 = vsel %vm10002_vm9, %v2560_v51, %v2561_v63 }
 0x25e   :  { %3622 = vmatprep.subr.bf16.mxu1 %v9167_v10  ;;  %v7989_v10 = vcombine.low %v2552_v55, %v2555_v14  ;;  %v9227_v14 = vld [vmem:[#allocation6 + $0x404] ss:$8 sps:$4 sm:$0xff]  }
 0x260   :  { %3578 = vmatmul.mubr.bf16.gmra.mrb[24].mxu1 %v7979_v34  ;;  %v7984_v34 = vcombine.high %v2531_v3, %v2534_v21 }
 0x261   :  { %3587 = vmatprep.mubr.bf16.mxu1 %v7982_v2  ;;  %3623 = vmatpush1.bf16.msra.mxu1 %v9165_v50  ;;  %v2497_v2 = vld [vmem:[#allocation2 + $0x18] sm:$0xee]  ;;  %v2559_v50 = vsel %vm10002_vm9, %v7947_v22, %v2558_v4 }
 0x262   :  { %3624 = vmatprep.subr.bf16.mxu1 %v9170_v60  ;;  %v7944_v11 = vrot.slane %v2497_v2, 9  ;;  %v2565_v60 = vrot.slane %v10188_v0, 5  ;;  %v7992_v24 = vcombine.high %v2559_v50, %v2562_v41  ;;  %v2575_v0 = vrot.slane %v10326_v39, 5 }
 0x263   :  { %v2579_v2 = vrot.slane %v10242_v26, 5  ;;  %v9201_v26 = vld [vmem:[#allocation6 + $0x380] ss:$8 sps:$4 sm:$0xff]  }
 0x264   :  { %v2538_v9 = vsel %vm10002_vm9, %v7944_v11, %v2537_v58  ;;  %v2567_v29 = vrot.slane %v2565_v60, 4  ;;  %v2566_v49 = vsel %vm10002_vm9, %v7948_v7, %v2565_v60  ;;  %v9467_v7 = vld [vmem:[#allocation3] sm:$0xff] }
 0x265   :  { %3625 = vmatpush1.bf16.msra.mxu1 %v9168_v20  ;;  %v7986_v61 = vcombine.high %v2538_v9, %v2541_v45  ;;  %v7985_v56 = vcombine.low %v2538_v9, %v2541_v45  ;;  %v2581_v39 = vrot.slane %v2579_v2, 4 }
 0x266   :  { %3626 = vmatprep.subr.bf16.mxu1 %v9173_v32  ;;  %v2569_v20 = vsel %vm10002_vm9, %v2567_v29, %v2568_v46  ;;  %v7991_v32 = vcombine.low %v2559_v50, %v2562_v41 }
 0x267   :  { %v7994_v21 = vcombine.high %v2566_v49, %v2569_v20  ;;  %v7993_v58 = vcombine.low %v2566_v49, %v2569_v20  ;;  %v2583_v1 = vsel %vm10002_vm9, %v2581_v39, %v2582_v53  ;;  %v9468_v49 = vld [vmem:[#allocation3 + $0x8] sm:$0xff] }
 0x268   :  { %3588 = vmatmul.mubr.bf16.gmra.mrb[28].mxu1 %v7981_v31  ;;  %v7945_v31 = vrot.slane %v2498_v59, 9  ;;  %v9206_v59 = vld [vmem:[#allocation6 + $0x394] ss:$8 sps:$4 sm:$0xff]  }
 0x269   :  { %3627 = vmatpush1.bf16.msra.mxu1 %v9171_v8  ;;  %3630 = vmatprep.mubr.bf16.mxu1 %v7984_v34  ;;  %v2502_v8 = vld [vmem:[#allocation2 + $0x90] sm:$0xee] }
 0x26a   :  { %3628 = vmatprep.subr.bf16.mxu1 %v9176_v44  ;;  %v2545_v6 = vsel %vm10002_vm9, %v7945_v31, %v2544_v54  ;;  %v7949_v3 = vrot.slane %v2502_v8, 9  ;;  %v2576_v44 = vsel %vm10002_vm9, %v2574_v35, %v2575_v0  ;;  %v9209_v31 = vld [vmem:[#allocation6 + $0x3a4] ss:$8 sps:$4 sm:$0xff]   ;;  %v9469_v0 = vld [vmem:[#allocation3 + $0x10] sm:$0xff] }
 0x26b   :  { %v7988_v28 = vcombine.high %v2545_v6, %v2548_v62  ;;  %v7987_v52 = vcombine.low %v2545_v6, %v2548_v62  ;;  %v9212_v62 = vld [vmem:[#allocation6 + $0x3b4] ss:$8 sps:$4 sm:$0xff]   ;;  %v9215_v6 = vld [vmem:[#allocation6 + $0x3c4] ss:$8 sps:$4 sm:$0xff]  }
 0x26c   :  { %v2573_v34 = vsel %vm10002_vm9, %v7949_v3, %v2572_v57 }
 0x26d   :  { %3629 = vmatpush1.bf16.msra.mxu1 %v9174_v13  ;;  %v7996_v23 = vcombine.high %v2573_v34, %v2576_v44  ;;  %v2503_v13 = vld [vmem:[#allocation2 + $0xa8] sm:$0xee]  ;;  %v7995_v45 = vcombine.low %v2573_v34, %v2576_v44  ;;  %v9470_v34 = vld [vmem:[#allocation3 + $0x18] sm:$0xff] }
 0x26e   :  { %v7950_v11 = vrot.slane %v2503_v13, 9 }
 0x270   :  { %3631 = vmatmul.mubr.bf16.vlgmr.msra.gmra.mrb[0].mxu1 %v7983_v17  ;;  %v2580_v17 = vsel %vm10002_vm9, %v7950_v11, %v2579_v2 }
 0x271   :  { %3640 = vmatprep.mubr.bf16.mxu1 %v7986_v61  ;;  %v7998_v9 = vcombine.high %v2580_v17, %v2583_v1  ;;  %v7997_v54 = vcombine.low %v2580_v17, %v2583_v1  ;;  %v9203_v61 = vld [vmem:[#allocation6 + $0x384] ss:$8 sps:$4 sm:$0xff]  }
 0x272   :  { %5340 = vmatprep.subr.bf16.mxu0 %v9203_v61 }
 0x273   :  { %5341 = vmatpush1.bf16.msra.mxu0 %v9201_v26 }
 0x274   :  { %5342 = vmatprep.subr.bf16.mxu0 %v9206_v59 }
 0x277   :  { %5343 = vmatpush1.bf16.msra.mxu0 %v9204_v18 }
 0x278   :  { %3641 = vmatmul.mubr.bf16.gmra.mrb[4].mxu1 %v7985_v56  ;;  %5344 = vmatprep.subr.bf16.mxu0 %v9209_v31  ;;  %v9213_v56 = vld [vmem:[#allocation6 + $0x3c0] ss:$8 sps:$4 sm:$0xff]  }
 0x279   :  { %3650 = vmatprep.mubr.bf16.mxu1 %v7988_v28  ;;  %v9218_v28 = vld [vmem:[#allocation6 + $0x3d4] ss:$8 sps:$4 sm:$0xff]  }
 0x27b   :  { %5345 = vmatpush1.bf16.msra.mxu0 %v9207_v48 }
 0x27c   :  { %5346 = vmatprep.subr.bf16.mxu0 %v9212_v62 }
 0x27f   :  { %5347 = vmatpush1.bf16.msra.mxu0 %v9210_v36 }
 0x280   :  { %3651 = vmatmul.mubr.bf16.gmra.mrb[8].mxu1 %v7987_v52  ;;  %5348 = vmatprep.subr.bf16.mxu0 %v9215_v6  ;;  %v2880_v52 = vld [vmem:[#allocation8] sm:$0x3] }
 0x281   :  { %3660 = vmatprep.mubr.bf16.mxu1 %v7990_v27  ;;  %v10484_v55 = vrot.slane %v2880_v52, %v10058_v25  ;;  %v10487_v4 = vrot.slane %v2880_v52, %v10060_v30  ;;  %v9471_v6 = vld [vmem:[#allocation3 + $0x20] sm:$0xff] }
 0x283   :  { %5349 = vmatpush1.bf16.msra.mxu0 %v9213_v56 }
 0x284   :  { %5350 = vmatprep.subr.bf16.mxu0 %v9218_v28 }
 0x287   :  { %5351 = vmatpush1.bf16.msra.mxu0 %v9216_v5 }
 0x288   :  { %3661 = vmatmul.mubr.bf16.gmra.mrb[12].mxu1 %v7989_v10  ;;  %5352 = vmatprep.subr.bf16.mxu0 %v9221_v16 }
 0x289   :  { %3670 = vmatprep.mubr.bf16.mxu1 %v7992_v24 }
 0x28b   :  { %5353 = vmatpush1.bf16.msra.mxu0 %v9219_v47 }
 0x28c   :  { %5354 = vmatprep.subr.bf16.mxu0 %v9224_v43 }
 0x28f   :  { %5355 = vmatpush1.bf16.msra.mxu0 %v9222_v19 }
 0x290   :  { %3671 = vmatmul.mubr.bf16.gmra.mrb[16].mxu1 %v7991_v32  ;;  %5437 = vmatprep.subr.bf16.mxu0 %v9227_v14  ;;  %v9472_v14 = vld [vmem:[#allocation3 + $0x28] sm:$0xff] }
 0x291   :  { %3680 = vmatprep.mubr.bf16.mxu1 %v7994_v21 }
 0x298   :  { %3681 = vmatmul.mubr.bf16.gmra.mrb[20].mxu1 %v7993_v58 }
 0x299   :  { %3690 = vmatprep.mubr.bf16.mxu1 %v7996_v23 }
 0x2a0   :  { %3691 = vmatmul.mubr.bf16.gmra.mrb[24].mxu1 %v7995_v45 }
 0x2a1   :  { %3700 = vmatprep.mubr.bf16.mxu1 %v7998_v9 }
 0x2a8   :  { %3701 = vmatmul.mubr.bf16.gmra.mrb[28].mxu1 %v7997_v54 }
 0x343   :  { %v3632_v27 = vpop.f32.mrb[0].mxu1 }
 0x344   :  { %v8527_v40 = vadd.f32 %v3632_v27, %v10484_v55  ;;  %v3634_v63 = vpop.f32.mrb[1].mxu1 }
 0x345   :  { %v8528_v22 = vadd.f32 %v3634_v63, %v10487_v4  ;;  %v3636_v51 = vpop.f32.mrb[2].mxu1 }
 0x346   :  { %vm3711_vm8 = vcmp.gt.f32.partialorder %v8527_v40, 0.0  ;;  %v3743_v41 = vmul.f32 0.01, %v8527_v40  ;;  %v8529_v10 = vadd.f32 %v3636_v51, %v10484_v55  ;;  %v3638_v50 = vpop.f32.mrb[3].mxu1 }
 0x347   :  { %vm3712_vm10 = vcmp.gt.f32.partialorder %v8528_v22, 0.0  ;;  %v3744_v60 = vmul.f32 0.01, %v8528_v22  ;;  %v8530_v24 = vadd.f32 %v3638_v50, %v10487_v4 }
 0x348   :  { %v3775_v15 = vsel %vm3711_vm8, %v8527_v40, %v3743_v41  ;;  %vm3713_vm11 = vcmp.gt.f32.partialorder %v8529_v10, 0.0  ;;  %v3745_v46 = vmul.f32 0.01, %v8529_v10 }
 0x349   :  { %v3807_v29 = vadd.f32 %v9467_v7, %v3775_v15  ;;  %v3776_v20 = vsel %vm3712_vm10, %v8528_v22, %v3744_v60  ;;  %vm3714_vm12 = vcmp.gt.f32.partialorder %v8530_v24, 0.0  ;;  %v3746_v32 = vmul.f32 0.01, %v8530_v24  ;;  %v9473_v15 = vld [vmem:[#allocation3 + $0x30] sm:$0xff] }
 0x34a   :  { %v3808_v57 = vadd.f32 %v9468_v49, %v3776_v20  ;;  %v3777_v21 = vsel %vm3713_vm11, %v8529_v10, %v3745_v46 }
 0x34b   :  { %vm3839_vm13 = vcmp.gt.f32.partialorder %v3807_v29, 0.0  ;;  %v3871_v8 = vmul.f32 0.01, %v3807_v29  ;;  %v3809_v3 = vadd.f32 %v9469_v0, %v3777_v21  ;;  %v3778_v35 = vsel %vm3714_vm12, %v8530_v24, %v3746_v32  ;;  %v3642_v44 = vpop.f32.mrb[4].mxu1  ;;  %v9474_v32 = vld [vmem:[#allocation2] sm:$0xff] }
 0x34c   :  { %vm3840_vm1 = vcmp.gt.f32.partialorder %v3808_v57, 0.0  ;;  %v3872_v58 = vmul.f32 0.01, %v3808_v57  ;;  %v3810_v2 = vadd.f32 %v9470_v34, %v3778_v35  ;;  %v8531_v23 = vadd.f32 %v3642_v44, %v10484_v55  ;;  %v3644_v13 = vpop.f32.mrb[5].mxu1 }
 0x34d   :  { %v10494_v53 = vsel %vm3839_vm13, %v3807_v29, %v3871_v8  ;;  %vm3841_vm0 = vcmp.gt.f32.partialorder %v3809_v3, 0.0  ;;  %v3873_v11 = vmul.f32 0.01, %v3809_v3  ;;  %v8532_v39 = vadd.f32 %v3644_v13, %v10487_v4  ;;  %v3646_v1 = vpop.f32.mrb[6].mxu1  ;;  %v4178_v8 = vld [vmem:[#allocation2 + $0x10] sm:$0x11] }
 0x34e   :  { %v10497_v45 = vsel %vm3840_vm1, %v3808_v57, %v3872_v58  ;;  %vm3842_vm2 = vcmp.gt.f32.partialorder %v3810_v2, 0.0  ;;  %v3874_v17 = vmul.f32 0.01, %v3810_v2  ;;  %vm3715_vm3 = vcmp.gt.f32.partialorder %v8531_v23, 0.0  ;;  %v3648_v9 = vpop.f32.mrb[7].mxu1 }
 0x34f   :  { %v8463_v54 = vpack.c.bf16 %v10497_v45, %v10494_v53  ;;  %v10501_v26 = vsel %vm3841_vm0, %v3809_v3, %v3873_v11  ;;  %v3747_v61 = vmul.f32 0.01, %v8531_v23  ;;  %vm3716_vm4 = vcmp.gt.f32.partialorder %v8532_v39, 0.0 }
 0x350   :  { %v10503_v59 = vsel %vm3842_vm2, %v3810_v2, %v3874_v17  ;;  %v3748_v18 = vmul.f32 0.01, %v8532_v39  ;;  %v8533_v48 = vadd.f32 %v3646_v1, %v10484_v55  ;;  %v8534_v56 = vadd.f32 %v3648_v9, %v10487_v4  ;;  %v9475_v2 = vld [vmem:[#allocation3 + $0x38] sm:$0xff] }
 0x351   :  { %v4016_v31 = vshrl.u32 %v8463_v54, 16  ;;  %v8464_v36 = vpack.c.bf16 %v10503_v59, %v10501_v26  ;;  %v3779_v62 = vsel %vm3715_vm3, %v8531_v23, %v3747_v61  ;;  %v4019_v19 = vshll.u32 %v8463_v54, 16 }
 0x352   :  { %v3811_v5 = vadd.f32 %v9471_v6, %v3779_v62  ;;  %v3780_v28 = vsel %vm3716_vm4, %v8532_v39, %v3748_v18  ;;  %vm3717_vm7 = vcmp.gt.f32.partialorder %v8533_v48, 0.0  ;;  %v3749_v47 = vmul.f32 0.01, %v8533_v48 }
 0x353   :  { %v10509_v16 = vrot.slane %v4016_v31, 7  ;;  %v4024_v43 = vshrl.u32 %v8464_v36, 16  ;;  %v3812_v52 = vadd.f32 %v9472_v14, %v3780_v28  ;;  %v3652_v27 = vpop.f32.mrb[8].mxu1  ;;  %v4027_v40 = vshll.u32 %v8464_v36, 16 }
 0x354   :  { %vm3843_vm8 = vcmp.gt.f32.partialorder %v3811_v5, 0.0  ;;  %v3875_v63 = vmul.f32 0.01, %v3811_v5  ;;  %v3781_v22 = vsel %vm3717_vm7, %v8533_v48, %v3749_v47  ;;  %v3654_v51 = vpop.f32.mrb[9].mxu1  ;;  %vm3718_vm11 = vcmp.gt.f32.partialorder %v8534_v56, 0.0 }
 0x355   :  { %v4021_v41 = vor.u32 %v4019_v19, %v10509_v16  ;;  %v4026_v10 = vrot.slane %v4024_v43, 7  ;;  %vm3844_vm10 = vcmp.gt.f32.partialorder %v3812_v52, 0.0  ;;  %v3656_v50 = vpop.f32.mrb[10].mxu1  ;;  %v3876_v24 = vmul.f32 0.01, %v3812_v52 }
 0x356   :  { %v10512_v60 = vsel %vm3843_vm8, %v3811_v5, %v3875_v63  ;;  %v3813_v46 = vadd.f32 %v9473_v15, %v3781_v22  ;;  %v3750_v7 = vmul.f32 0.01, %v8534_v56  ;;  %v3658_v29 = vpop.f32.mrb[11].mxu1  ;;  %v4022_v20 = vrot.slane %v10509_v16, 4  ;;  %v9477_v22 = vld [vmem:[#allocation3 + $0x48] sm:$0xff] }
 0x357   :  { %v10517_v49 = vsel %vm9693_vm15, %v4021_v41, %v9474_v32  ;;  %v4031_v57 = vrot.slane %v4026_v10, 4  ;;  %v8535_v21 = vadd.f32 %v3652_v27, %v10484_v55  ;;  %v10522_v0 = vsel %vm3844_vm10, %v3812_v52, %v3876_v24  ;;  %v9478_v24 = vld [vmem:[#allocation3 + $0x50] sm:$0xff] }
 0x358   :  { %4176 = vst [vmem:[#allocation2] sm:$0xff] %v10517_v49  ;;  %vm3845_vm12 = vcmp.gt.f32.partialorder %v3813_v46, 0.0  ;;  %v3877_v3 = vmul.f32 0.01, %v3813_v46  ;;  %v3782_v35 = vsel %vm3718_vm11, %v8534_v56, %v3750_v7  ;;  %v4029_v44 = vor.u32 %v4027_v40, %v4026_v10  ;;  %v9476_v56 = vld [vmem:[#allocation3 + $0x40] sm:$0xff]  ;;  %v4181_v40 = vld [vmem:[#allocation2 + $0x18] sm:$0xff] }
 0x359   :  { %v4179_v58 = vsel %vm9670_vm6, %v4031_v57, %v4178_v8  ;;  %v8465_v34 = vpack.c.bf16 %v10522_v0, %v10512_v60  ;;  %v3814_v23 = vadd.f32 %v9475_v2, %v3782_v35  ;;  %vm3719_vm13 = vcmp.gt.f32.partialorder %v8535_v21, 0.0  ;;  %v4185_v2 = vld [vmem:[#allocation2 + $0x28] sm:$0x11] }
 0x35a   :  { %4180 = vst [vmem:[#allocation2 + $0x10] sm:$0x11] %v4179_v58  ;;  %v10529_v13 = vsel %vm3845_vm12, %v3813_v46, %v3877_v3  ;;  %v3751_v11 = vmul.f32 0.01, %v8535_v21  ;;  %v8536_v39 = vadd.f32 %v3654_v51, %v10487_v4  ;;  %v8537_v48 = vadd.f32 %v3656_v50, %v10484_v55 }
 0x35b   :  { %v4033_v1 = vshrl.u32 %v8465_v34, 16  ;;  %v4036_v17 = vshll.u32 %v8465_v34, 16  ;;  %vm3846_vm1 = vcmp.gt.f32.partialorder %v3814_v23, 0.0  ;;  %v3878_v9 = vmul.f32 0.01, %v3814_v23  ;;  %v3662_v54 = vpop.f32.mrb[12].mxu1 }
 0x35c   :  { %v3783_v61 = vsel %vm3719_vm13, %v8535_v21, %v3751_v11  ;;  %vm3720_vm0 = vcmp.gt.f32.partialorder %v8536_v39, 0.0  ;;  %v3752_v18 = vmul.f32 0.01, %v8536_v39  ;;  %v3664_v31 = vpop.f32.mrb[13].mxu1  ;;  %v8538_v5 = vadd.f32 %v3658_v29, %v10487_v4  ;;  %v9479_v11 = vld [vmem:[#allocation3 + $0x58] sm:$0xff] }
 0x35d   :  { %v10533_v36 = vrot.slane %v4033_v1, 7  ;;  %v10535_v62 = vsel %vm3846_vm1, %v3814_v23, %v3878_v9  ;;  %v3815_v6 = vadd.f32 %v9476_v56, %v3783_v61  ;;  %v3666_v28 = vpop.f32.mrb[14].mxu1  ;;  %vm3721_vm2 = vcmp.gt.f32.partialorder %v8537_v48, 0.0 }
 0x35e   :  { %v8466_v47 = vpack.c.bf16 %v10535_v62, %v10529_v13  ;;  %v3784_v16 = vsel %vm3720_vm0, %v8536_v39, %v3752_v18  ;;  %v3753_v19 = vmul.f32 0.01, %v8537_v48  ;;  %v3668_v43 = vpop.f32.mrb[15].mxu1  ;;  %v10543_v27 = vsel %vm9683_vm14, %v4022_v20, %v4029_v44 }
 0x35f   :  { %v4038_v14 = vor.u32 %v4036_v17, %v10533_v36  ;;  %vm3847_vm3 = vcmp.gt.f32.partialorder %v3815_v6, 0.0  ;;  %v3879_v52 = vmul.f32 0.01, %v3815_v6  ;;  %v3816_v51 = vadd.f32 %v9477_v22, %v3784_v16 }
 0x360   :  { %v4041_v63 = vshrl.u32 %v8466_v47, 16  ;;  %v3785_v41 = vsel %vm3721_vm2, %v8537_v48, %v3753_v19  ;;  %vm3722_vm4 = vcmp.gt.f32.partialorder %v8538_v5, 0.0  ;;  %v3754_v29 = vmul.f32 0.01, %v8538_v5  ;;  %v9480_v19 = vld [vmem:[#allocation3 + $0x60] sm:$0xff] }
 0x361   :  { %v10547_v10 = vsel %vm9693_vm15, %v4038_v14, %v4181_v40  ;;  %v10549_v50 = vsel %vm3847_vm3, %v3815_v6, %v3879_v52  ;;  %v3817_v15 = vadd.f32 %v9478_v24, %v3785_v41  ;;  %vm3848_vm7 = vcmp.gt.f32.partialorder %v3816_v51, 0.0 }
 0x362   :  { %4183 = vst [vmem:[#allocation2 + $0x18] sm:$0xff] %v10547_v10  ;;  %v4043_v46 = vrot.slane %v4041_v63, 7  ;;  %v3880_v7 = vmul.f32 0.01, %v3816_v51  ;;  %v8539_v32 = vadd.f32 %v3662_v54, %v10484_v55  ;;  %v8540_v57 = vadd.f32 %v3664_v31, %v10487_v4 }
 0x363   :  { %vm3849_vm8 = vcmp.gt.f32.partialorder %v3817_v15, 0.0  ;;  %v3881_v20 = vmul.f32 0.01, %v3817_v15  ;;  %v3672_v21 = vpop.f32.mrb[16].mxu1  ;;  %v4044_v8 = vshll.u32 %v8466_v47, 16  ;;  %v3786_v44 = vsel %vm3722_vm4, %v8538_v5, %v3754_v29 }
 0x364   :  { %v4048_v3 = vrot.slane %v4043_v46, 4  ;;  %v10554_v35 = vsel %vm3848_vm7, %v3816_v51, %v3880_v7  ;;  %v10556_v58 = vpop.f32.mrb[17].mxu1  ;;  %v4039_v34 = vrot.slane %v10533_v36, 4  ;;  %v3818_v39 = vadd.f32 %v9479_v11, %v3786_v44  ;;  %v9481_v7 = vld [vmem:[#allocation3 + $0x68] sm:$0xff] }
 0x365   :  { %v8467_v23 = vpack.c.bf16 %v10554_v35, %v10549_v50  ;;  %vm3723_vm10 = vcmp.gt.f32.partialorder %v8539_v32, 0.0  ;;  %v10561_v1 = vpop.f32.mrb[18].mxu1  ;;  %v4046_v17 = vor.u32 %v4044_v8, %v4043_v46  ;;  %v10566_v54 = vsel %vm3849_vm8, %v3817_v15, %v3881_v20 }
 0x366   :  { %v4186_v9 = vsel %vm9670_vm6, %v4048_v3, %v4185_v2  ;;  %11567 = vst [vmem:[#allocation13_spill] sm:$0xff] %v10566_v54  ;;  %v3755_v61 = vmul.f32 0.01, %v8539_v32  ;;  %v10568_v18 = vpop.f32.mrb[19].mxu1  ;;  %vm3850_vm11 = vcmp.gt.f32.partialorder %v3818_v39, 0.0  ;;  %vm3724_vm12 = vcmp.gt.f32.partialorder %v8540_v57, 0.0 }
 0x367   :  { %4187 = vst [vmem:[#allocation2 + $0x28] sm:$0x11] %v4186_v9  ;;  %v4050_v48 = vshrl.u32 %v8467_v23, 16  ;;  %v3882_v31 = vmul.f32 0.01, %v3818_v39  ;;  %v4053_v36 = vshll.u32 %v8467_v23, 16  ;;  %v8541_v5 = vadd.f32 %v3666_v28, %v10484_v55 }
 0x368   :  { %v3787_v56 = vsel %vm3723_vm10, %v8539_v32, %v3755_v61  ;;  %v3756_v6 = vmul.f32 0.01, %v8540_v57  ;;  %v8542_v52 = vadd.f32 %v3668_v43, %v10487_v4  ;;  %v8543_v28 = vadd.f32 %v3672_v21, %v10484_v55  ;;  %v4188_v43 = vld [vmem:[#allocation2 + $0x30] sm:$0xff] }
 0x369   :  { %v10571_v47 = vrot.slane %v4050_v48, 7  ;;  %v10573_v16 = vsel %vm3850_vm11, %v3818_v39, %v3882_v31  ;;  %v3819_v14 = vadd.f32 %v9480_v19, %v3787_v56  ;;  %vm3725_vm13 = vcmp.gt.f32.partialorder %v8541_v5, 0.0  ;;  %v9482_v21 = vld [vmem:[#allocation3 + $0x70] sm:$0xff]  ;;  %v4192_v56 = vld [vmem:[#allocation2 + $0x40] sm:$0x11] }
 0x36a   :  { %11568 = vst [vmem:[#allocation14_spill] sm:$0xff] %v10573_v16  ;;  %v10578_v40 = vpack.c.bf16 %v10573_v16, %v10566_v54  ;;  %v3788_v63 = vsel %vm3724_vm12, %v8540_v57, %v3756_v6  ;;  %v3757_v22 = vmul.f32 0.01, %v8541_v5  ;;  %v10586_v15 = vsel %vm9683_vm14, %v4039_v34, %v4046_v17 }
 0x36b   :  { %v4055_v51 = vor.u32 %v4053_v36, %v10571_v47  ;;  %vm3851_vm1 = vcmp.gt.f32.partialorder %v3819_v14, 0.0  ;;  %v3883_v41 = vmul.f32 0.01, %v3819_v14  ;;  %v10582_v24 = vpop.f32.mrb[20].mxu1  ;;  %v3820_v29 = vadd.f32 %v9481_v7, %v3788_v63 }
 0x36c   :  { %v4058_v46 = vshrl.u32 %v10578_v40, 16  ;;  %v3789_v20 = vsel %vm3725_vm13, %v8541_v5, %v3757_v22  ;;  %v10589_v32 = vpop.f32.mrb[21].mxu1  ;;  %vm3726_vm0 = vcmp.gt.f32.partialorder %v8542_v52, 0.0  ;;  %v3758_v23 = vmul.f32 0.01, %v8542_v52  ;;  %v9483_v5 = vld [vmem:[#allocation3 + $0x78] sm:$0xff] }
 0x36d   :  { %v10593_v57 = vsel %vm9693_vm15, %v4055_v51, %v4188_v43  ;;  %v10595_v8 = vsel %vm3851_vm1, %v3819_v14, %v3883_v41  ;;  %v3821_v3 = vadd.f32 %v9482_v21, %v3789_v20  ;;  %v10597_v44 = vpop.f32.mrb[22].mxu1  ;;  %vm3852_vm2 = vcmp.gt.f32.partialorder %v3820_v29, 0.0  ;;  %v9484_v51 = vld [vmem:[#allocation3 + $0x80] sm:$0xff] }
 0x36e   :  { %11569 = vst [vmem:[#allocation15_spill] sm:$0xff] %v10595_v8  ;;  %4190 = vst [vmem:[#allocation2 + $0x30] sm:$0xff] %v10593_v57  ;;  %v4060_v34 = vrot.slane %v4058_v46, 7  ;;  %v3884_v2 = vmul.f32 0.01, %v3820_v29  ;;  %vm3727_vm4 = vcmp.gt.f32.partialorder %v8543_v28, 0.0  ;;  %v3790_v48 = vsel %vm3726_vm0, %v8542_v52, %v3758_v23 }
 0x36f   :  { %vm3853_vm3 = vcmp.gt.f32.partialorder %v3821_v3, 0.0  ;;  %v3885_v11 = vmul.f32 0.01, %v3821_v3  ;;  %v3759_v39 = vmul.f32 0.01, %v8543_v28  ;;  %v10603_v31 = vpop.f32.mrb[23].mxu1  ;;  %v3822_v19 = vadd.f32 %v9483_v5, %v3790_v48 }
 0x370   :  { %v4065_v9 = vrot.slane %v4060_v34, 4  ;;  %v10601_v61 = vsel %vm3852_vm2, %v3820_v29, %v3884_v2  ;;  %v4061_v36 = vshll.u32 %v10578_v40, 16  ;;  %v8544_v52 = vadd.f32 %v10556_v58, %v10487_v4  ;;  %v9225_v2 = vld [vmem:[#allocation6 + $0x400] ss:$8 sps:$4 sm:$0xff]  }
 0x371   :  { %11570 = vst [vmem:[#allocation16_spill] sm:$0xff] %v10601_v61  ;;  %v8469_v6 = vpack.c.bf16 %v10601_v61, %v10595_v8  ;;  %v3791_v14 = vsel %vm3727_vm4, %v8543_v28, %v3759_v39  ;;  %v10611_v22 = vsel %vm3853_vm3, %v3821_v3, %v3885_v11  ;;  %vm3854_vm7 = vcmp.gt.f32.partialorder %v3822_v19, 0.0 }
 0x372   :  { %v4193_v63 = vsel %vm9670_vm6, %v4065_v9, %v4192_v56  ;;  %11571 = vst [vmem:[#allocation17_spill] sm:$0xff] %v10611_v22  ;;  %v3823_v41 = vadd.f32 %v9484_v51, %v3791_v14  ;;  %v3886_v46 = vmul.f32 0.01, %v3822_v19  ;;  %vm3728_vm10 = vcmp.gt.f32.partialorder %v8544_v52, 0.0  ;;  %v9230_v56 = vld [vmem:[#allocation6 + $0x414] ss:$8 sps:$4 sm:$0xff]  }
 0x373   :  { %4194 = vst [vmem:[#allocation2 + $0x40] sm:$0x11] %v4193_v63  ;;  %v4067_v40 = vshrl.u32 %v8469_v6, 16  ;;  %v4070_v43 = vshll.u32 %v8469_v6, 16  ;;  %v10615_v7 = vpop.f32.mrb[24].mxu1  ;;  %v8120_v3 = vcombine.high %v10517_v49, %v10543_v27  ;;  %v8545_v58 = vadd.f32 %v10561_v1, %v10484_v55  ;;  %v9485_v1 = vld [vmem:[#allocation3 + $0x88] sm:$0xff] }
 0x374   :  { %vm3855_vm8 = vcmp.gt.f32.partialorder %v3823_v41, 0.0  ;;  %v3887_v28 = vmul.f32 0.01, %v3823_v41  ;;  %v3760_v29 = vmul.f32 0.01, %v8544_v52  ;;  %v10619_v21 = vsel %vm3854_vm7, %v3822_v19, %v3886_v46  ;;  %v10625_v23 = vpop.f32.mrb[25].mxu1 }
 0x375   :  { %v10617_v20 = vrot.slane %v4067_v40, 7  ;;  %11572 = vst [vmem:[#allocation18_spill] sm:$0xff] %v10619_v21  ;;  %v10627_v11 = vor.u32 %v4061_v36, %v4060_v34  ;;  %v8470_v39 = vpack.c.bf16 %v10619_v21, %v10611_v22  ;;  %v8119_v48 = vcombine.low %v10517_v49, %v10543_v27  ;;  %v10633_v6 = vpop.f32.mrb[26].mxu1  ;;  %5356 = vmatprep.mubr.bf16.mxu0 %v8120_v3  ;;  %v4195_v36 = vld [vmem:[#allocation2 + $0x48] sm:$0xff]  ;;  %v9228_v46 = vld [vmem:[#allocation6 + $0x410] ss:$8 sps:$4 sm:$0xff]  }
 0x376   :  { %v3792_v9 = vsel %vm3728_vm10, %v8544_v52, %v3760_v29  ;;  %v10637_v19 = vsel %vm3855_vm8, %v3823_v41, %v3887_v28  ;;  %vm3729_vm11 = vcmp.gt.f32.partialorder %v8545_v58, 0.0  ;;  %v10639_v34 = vpop.f32.mrb[27].mxu1  ;;  %v3761_v52 = vmul.f32 0.01, %v8545_v58 }
 0x377   :  { %v4072_v5 = vor.u32 %v4070_v43, %v10617_v20  ;;  %11573 = vst [vmem:[#allocation19_spill] sm:$0xff] %v10637_v19  ;;  %v3824_v14 = vadd.f32 %v9485_v1, %v3792_v9  ;;  %v4075_v63 = vshrl.u32 %v8470_v39, 16  ;;  %v4078_v51 = vshll.u32 %v8470_v39, 16  ;;  %5357 = vmatmul.mubr.bf16.vlgmr.msra.gmra.mrb[32].mxu0 %v8119_v48  ;;  %v9486_v48 = vld [vmem:[#allocation3 + $0x90] sm:$0xff] }
 0x378   :  { %v8546_v40 = vadd.f32 %v10568_v18, %v10487_v4  ;;  %5438 = vmatpush1.bf16.msra.mxu0 %v9225_v2  ;;  %v8547_v28 = vadd.f32 %v10582_v24, %v10484_v55  ;;  %v3793_v3 = vsel %vm3729_vm11, %v8545_v58, %v3761_v52  ;;  %v9233_v18 = vld [vmem:[#allocation6 + $0x424] ss:$8 sps:$4 sm:$0xff]   ;;  %v4199_v24 = vld [vmem:[#allocation2 + $0x58] sm:$0x11]  ;;  %v4073_v22 = vrot.slane %v10617_v20, 4 }
 0x379   :  { %v10645_v43 = vsel %vm9693_vm15, %v4072_v5, %v4195_v36  ;;  %vm3856_vm12 = vcmp.gt.f32.partialorder %v3824_v14, 0.0  ;;  %v3888_v41 = vmul.f32 0.01, %v3824_v14  ;;  %v4077_v29 = vrot.slane %v4075_v63, 7  ;;  %5439 = vmatprep.subr.bf16.mxu0 %v9230_v56  ;;  %v9487_v52 = vld [vmem:[#allocation3 + $0x98] sm:$0xff] }
 0x37a   :  { %4197 = vst [vmem:[#allocation2 + $0x48] sm:$0xff] %v10645_v43  ;;  %vm3730_vm13 = vcmp.gt.f32.partialorder %v8546_v40, 0.0  ;;  %v3762_v39 = vmul.f32 0.01, %v8546_v40  ;;  %v3825_v5 = vadd.f32 %v9486_v48, %v3793_v3  ;;  %vm3731_vm1 = vcmp.gt.f32.partialorder %v8547_v28, 0.0 }
 0x37b   :  { %v10651_v9 = vsel %vm3856_vm12, %v3824_v14, %v3888_v41  ;;  %v3763_v1 = vmul.f32 0.01, %v8547_v28  ;;  %v10653_v2 = vpop.f32.mrb[28].mxu1  ;;  %v4080_v36 = vor.u32 %v4078_v51, %v4077_v29  ;;  %v4082_v17 = vrot.slane %v4077_v29, 4  ;;  %v9231_v3 = vld [vmem:[#allocation6 + $0x420] ss:$8 sps:$4 sm:$0xff]  }
 0x37c   :  { %11574 = vst [vmem:[#allocation20_spill] sm:$0xff] %v10651_v9  ;;  %v8471_v63 = vpack.c.bf16 %v10651_v9, %v10637_v19  ;;  %v3794_v21 = vsel %vm3730_vm13, %v8546_v40, %v3762_v39  ;;  %v10657_v58 = vpop.f32.mrb[29].mxu1  ;;  %vm3857_vm0 = vcmp.gt.f32.partialorder %v3825_v5, 0.0  ;;  %v3889_v56 = vmul.f32 0.01, %v3825_v5  ;;  %5440 = vmatpush1.bf16.msra.mxu0 %v9228_v46  ;;  %v9488_v46 = vld [vmem:[#allocation3 + $0xa0] sm:$0xff] }
 0x37d   :  { %v3826_v14 = vadd.f32 %v9487_v52, %v3794_v21  ;;  %v3795_v41 = vsel %vm3731_vm1, %v8547_v28, %v3763_v1  ;;  %v10659_v48 = vpop.f32.mrb[30].mxu1  ;;  %v4200_v51 = vsel %vm9670_vm6, %v4082_v17, %v4199_v24  ;;  %5441 = vmatprep.subr.bf16.mxu0 %v9233_v18  ;;  %v9236_v40 = vld [vmem:[#allocation6 + $0x434] ss:$8 sps:$4 sm:$0xff]   ;;  %v8548_v20 = vadd.f32 %v10589_v32, %v10487_v4  ;;  %v9234_v52 = vld [vmem:[#allocation6 + $0x430] ss:$8 sps:$4 sm:$0xff]  }
 0x37e   :  { %v4084_v29 = vshrl.u32 %v8471_v63, 16  ;;  %v4087_v61 = vshll.u32 %v8471_v63, 16  ;;  %v10664_v39 = vpop.f32.mrb[31].mxu1  ;;  %4201 = vst [vmem:[#allocation2 + $0x58] sm:$0x11] %v4200_v51  ;;  %v10667_v9 = vsel %vm3857_vm0, %v3825_v5, %v3889_v56  ;;  %v3827_v28 = vadd.f32 %v9488_v46, %v3795_v41  ;;  %v4202_v41 = vld [vmem:[#allocation2 + $0x60] sm:$0xff] }
 0x37f   :  { %11575 = vst [vmem:[#allocation21_spill] sm:$0xff] %v10667_v9  ;;  %vm3858_vm2 = vcmp.gt.f32.partialorder %v3826_v14, 0.0  ;;  %v3890_v21 = vmul.f32 0.01, %v3826_v14  ;;  %v8122_v17 = vcombine.high %v10547_v10, %v10586_v15  ;;  %v8549_v18 = vadd.f32 %v10597_v44, %v10484_v55 }
 0x380   :  { %v10669_v1 = vrot.slane %v4084_v29, 7  ;;  %v11576_v24 = vrot.slane %v10571_v47, 4  ;;  %v10686_v63 = vsel %vm9683_vm14, %v4073_v22, %v4080_v36  ;;  %v8121_v32 = vcombine.low %v10547_v10, %v10586_v15  ;;  %5442 = vmatpush1.bf16.msra.mxu0 %v9231_v3  ;;  %v9239_v22 = vld [vmem:[#allocation6 + $0x444] ss:$8 sps:$4 sm:$0xff]   ;;  %v9490_v3 = vld [vmem:[#allocation3 + $0xb0] sm:$0xff] }
 0x381   :  { %v10688_v56 = vsel %vm3858_vm2, %v3826_v14, %v3890_v21  ;;  %vm3732_vm3 = vcmp.gt.f32.partialorder %v8548_v20, 0.0  ;;  %5366 = vmatprep.mubr.bf16.mxu0 %v8122_v17  ;;  %5443 = vmatprep.subr.bf16.mxu0 %v9236_v40  ;;  %vm3859_vm4 = vcmp.gt.f32.partialorder %v3827_v28, 0.0  ;;  %v3764_v36 = vmul.f32 0.01, %v8548_v20 }
 0x382   :  { %v10682_v5 = vsel %vm9683_vm14, %v11576_v24, %v10627_v11  ;;  %11577 = vst [vmem:[#allocation22_spill] sm:$0xff] %v10688_v56  ;;  %v4089_v44 = vor.u32 %v4087_v61, %v10669_v1  ;;  %v10695_v47 = vpack.c.bf16 %v10688_v56, %v10667_v9  ;;  %v3891_v11 = vmul.f32 0.01, %v3827_v28  ;;  %5367 = vmatmul.mubr.bf16.gmra.mrb[36].mxu0 %v8121_v32  ;;  %v9237_v24 = vld [vmem:[#allocation6 + $0x440] ss:$8 sps:$4 sm:$0xff]  }
 0x383   :  { %vm3733_vm7 = vcmp.gt.f32.partialorder %v8549_v18, 0.0  ;;  %v3765_v14 = vmul.f32 0.01, %v8549_v18  ;;  %v8550_v29 = vadd.f32 %v10603_v31, %v10487_v4  ;;  %v3796_v40 = vsel %vm3732_vm3, %v8548_v20, %v3764_v36  ;;  %v9242_v31 = vld [vmem:[#allocation6 + $0x454] ss:$8 sps:$4 sm:$0xff]  }
 0x384   :  { %v10700_v61 = vsel %vm9693_vm15, %v4089_v44, %v4202_v41  ;;  %v4092_v51 = vshrl.u32 %v10695_v47, 16  ;;  %5444 = vmatpush1.bf16.msra.mxu0 %v9234_v52  ;;  %v8551_v46 = vadd.f32 %v10615_v7, %v10484_v55  ;;  %v8552_v17 = vadd.f32 %v10625_v23, %v10487_v4  ;;  %v9489_v44 = vld [vmem:[#allocation3 + $0xa8] sm:$0xff]  ;;  %v4206_v9 = vld [vmem:[#allocation2 + $0x70] sm:$0x11] }
 0x385   :  { %4204 = vst [vmem:[#allocation2 + $0x60] sm:$0xff] %v10700_v61  ;;  %v3797_v21 = vsel %vm3733_vm7, %v8549_v18, %v3765_v14  ;;  %v3828_v41 = vadd.f32 %v9489_v44, %v3796_v40  ;;  %vm3734_vm8 = vcmp.gt.f32.partialorder %v8550_v29, 0.0  ;;  %5445 = vmatprep.subr.bf16.mxu0 %v9239_v22  ;;  %v10711_v20 = vsel %vm3859_vm4, %v3827_v28, %v3891_v11  ;;  %v9491_v28 = vld [vmem:[#allocation3 + $0xb8] sm:$0xff]  ;;  %v9245_v44 = vld [vmem:[#allocation6 + $0x464] ss:$8 sps:$4 sm:$0xff]  }
 0x386   :  { %v4094_v32 = vrot.slane %v4092_v51, 7  ;;  %v3829_v56 = vadd.f32 %v9490_v3, %v3797_v21  ;;  %11578 = vst [vmem:[#allocation23_spill] sm:$0xff] %v10711_v20  ;;  %v3766_v18 = vmul.f32 0.01, %v8550_v29  ;;  %vm3735_vm10 = vcmp.gt.f32.partialorder %v8551_v46, 0.0 }
 0x387   :  { %v3767_v52 = vmul.f32 0.01, %v8551_v46  ;;  %v4095_v7 = vshll.u32 %v10695_v47, 16  ;;  %vm3860_vm11 = vcmp.gt.f32.partialorder %v3828_v41, 0.0  ;;  %v3892_v23 = vmul.f32 0.01, %v3828_v41 }
 0x388   :  { %v4099_v36 = vrot.slane %v4094_v32, 4  ;;  %vm3861_vm12 = vcmp.gt.f32.partialorder %v3829_v56, 0.0  ;;  %v3893_v14 = vmul.f32 0.01, %v3829_v56  ;;  %v3798_v51 = vsel %vm3734_vm8, %v8550_v29, %v3766_v18  ;;  %5446 = vmatpush1.bf16.msra.mxu0 %v9237_v24  ;;  %v9240_v3 = vld [vmem:[#allocation6 + $0x450] ss:$8 sps:$4 sm:$0xff]  }
 0x389   :  { %v3799_v40 = vsel %vm3735_vm10, %v8551_v46, %v3767_v52  ;;  %v10716_v21 = vsel %vm3860_vm11, %v3828_v41, %v3892_v23  ;;  %v3830_v11 = vadd.f32 %v9491_v28, %v3798_v51  ;;  %vm3736_vm13 = vcmp.gt.f32.partialorder %v8552_v17, 0.0  ;;  %5447 = vmatprep.subr.bf16.mxu0 %v9242_v31  ;;  %v9492_v29 = vld [vmem:[#allocation3 + $0xc0] sm:$0xff] }
 0x38a   :  { %v4207_v22 = vsel %vm9670_vm6, %v4099_v36, %v4206_v9  ;;  %11579 = vst [vmem:[#allocation24_spill] sm:$0xff] %v10716_v21  ;;  %v8473_v47 = vpack.c.bf16 %v10716_v21, %v10711_v20  ;;  %v10720_v19 = vsel %vm3861_vm12, %v3829_v56, %v3893_v14  ;;  %v3831_v46 = vadd.f32 %v9492_v29, %v3799_v40  ;;  %v9243_v23 = vld [vmem:[#allocation6 + $0x460] ss:$8 sps:$4 sm:$0xff]   ;;  %v9248_v40 = vld [vmem:[#allocation6 + $0x474] ss:$8 sps:$4 sm:$0xff]  }
 0x38b   :  { %4208 = vst [vmem:[#allocation2 + $0x70] sm:$0x11] %v4207_v22  ;;  %11580 = vst [vmem:[#allocation25_spill] sm:$0xff] %v10720_v19  ;;  %v3768_v24 = vmul.f32 0.01, %v8552_v17  ;;  %vm3862_vm1 = vcmp.gt.f32.partialorder %v3830_v11, 0.0  ;;  %v8124_v9 = vcombine.high %v10593_v57, %v10682_v5  ;;  %v8553_v41 = vadd.f32 %v10633_v6, %v10484_v55 }
 0x38c   :  { %v3894_v18 = vmul.f32 0.01, %v3830_v11  ;;  %v10726_v52 = vor.u32 %v4095_v7, %v4094_v32  ;;  %v4101_v31 = vshrl.u32 %v8473_v47, 16  ;;  %vm3863_vm0 = vcmp.gt.f32.partialorder %v3831_v46, 0.0  ;;  %5448 = vmatpush1.bf16.msra.mxu0 %v9240_v3  ;;  %v9493_v32 = vld [vmem:[#allocation3 + $0xc8] sm:$0xff] }
 0x38d   :  { %v3895_v36 = vmul.f32 0.01, %v3831_v46  ;;  %v3800_v14 = vsel %vm3736_vm13, %v8552_v17, %v3768_v24  ;;  %5376 = vmatprep.mubr.bf16.mxu0 %v8124_v9  ;;  %vm3737_vm2 = vcmp.gt.f32.partialorder %v8553_v41, 0.0  ;;  %v3769_v51 = vmul.f32 0.01, %v8553_v41  ;;  %5449 = vmatprep.subr.bf16.mxu0 %v9245_v44  ;;  %v4209_v24 = vld [vmem:[#allocation2 + $0x78] sm:$0xff] }
 0x38e   :  { %v10728_v56 = vsel %vm3862_vm1, %v3830_v11, %v3894_v18  ;;  %v10731_v22 = vrot.slane %v4101_v31, 7  ;;  %v4104_v28 = vshll.u32 %v8473_v47, 16  ;;  %v3832_v7 = vadd.f32 %v9493_v32, %v3800_v14  ;;  %v9246_v31 = vld [vmem:[#allocation6 + $0x470] ss:$8 sps:$4 sm:$0xff]  }
 0x38f   :  { %11581 = vst [vmem:[#allocation26_spill] sm:$0xff] %v10728_v56  ;;  %v8474_v6 = vpack.c.bf16 %v10728_v56, %v10720_v19  ;;  %v3801_v29 = vsel %vm3737_vm2, %v8553_v41, %v3769_v51  ;;  %v8123_v3 = vcombine.low %v10593_v57, %v10682_v5  ;;  %v8554_v17 = vadd.f32 %v10639_v34, %v10487_v4  ;;  %v9494_v14 = vld [vmem:[#allocation3 + $0xd0] sm:$0xff]  ;;  %v9251_v34 = vld [vmem:[#allocation6 + $0x484] ss:$8 sps:$4 sm:$0xff]  }
 0x390   :  { %v8555_v11 = vadd.f32 %v10653_v2, %v10484_v55  ;;  %v4106_v44 = vor.u32 %v4104_v28, %v10731_v22  ;;  %v10743_v9 = vsel %vm3863_vm0, %v3831_v46, %v3895_v36  ;;  %5450 = vmatpush1.bf16.msra.mxu0 %v9243_v23  ;;  %vm3864_vm3 = vcmp.gt.f32.partialorder %v3832_v7, 0.0 }
 0x391   :  { %v4109_v18 = vshrl.u32 %v8474_v6, 16  ;;  %v4112_v47 = vshll.u32 %v8474_v6, 16  ;;  %11582 = vst [vmem:[#allocation27_spill] sm:$0xff] %v10743_v9  ;;  %v3896_v41 = vmul.f32 0.01, %v3832_v7  ;;  %v3833_v51 = vadd.f32 %v9494_v14, %v3801_v29  ;;  %5377 = vmatmul.mubr.bf16.gmra.mrb[40].mxu0 %v8123_v3  ;;  %5451 = vmatprep.subr.bf16.mxu0 %v9248_v40  ;;  %v9495_v14 = vld [vmem:[#allocation3 + $0xd8] sm:$0xff] }
 0x392   :  { %vm3738_vm4 = vcmp.gt.f32.partialorder %v8554_v17, 0.0  ;;  %v10747_v2 = vsel %vm9693_vm15, %v4106_v44, %v4209_v24  ;;  %v3770_v32 = vmul.f32 0.01, %v8554_v17  ;;  %vm3739_vm7 = vcmp.gt.f32.partialorder %v8555_v11, 0.0  ;;  %v9249_v44 = vld [vmem:[#allocation6 + $0x480] ss:$8 sps:$4 sm:$0xff]  }
 0x393   :  { %v4111_v28 = vrot.slane %v4109_v18, 7  ;;  %4211 = vst [vmem:[#allocation2 + $0x78] sm:$0xff] %v10747_v2  ;;  %v10750_v46 = vsel %vm3864_vm3, %v3832_v7, %v3896_v41  ;;  %vm3865_vm8 = vcmp.gt.f32.partialorder %v3833_v51, 0.0  ;;  %v3897_v36 = vmul.f32 0.01, %v3833_v51 }
 0x394   :  { %11583 = vst [vmem:[#allocation28_spill] sm:$0xff] %v10750_v46  ;;  %v3771_v23 = vmul.f32 0.01, %v8555_v11  ;;  %v4107_v6 = vrot.slane %v10731_v22, 4  ;;  %v8475_v40 = vpack.c.bf16 %v10750_v46, %v10743_v9  ;;  %v3802_v3 = vsel %vm3738_vm4, %v8554_v17, %v3770_v32  ;;  %5452 = vmatpush1.bf16.msra.mxu0 %v9246_v31  ;;  %v4213_v18 = vld [vmem:[#allocation2 + $0x88] sm:$0x11] }
 0x395   :  { %v4116_v29 = vrot.slane %v4111_v28, 4  ;;  %v4114_v24 = vor.u32 %v4112_v47, %v4111_v28  ;;  %v3834_v56 = vadd.f32 %v9495_v14, %v3802_v3  ;;  %v8556_v7 = vadd.f32 %v10657_v58, %v10487_v4  ;;  %5453 = vmatprep.subr.bf16.mxu0 %v9251_v34  ;;  %v9254_v41 = vld [vmem:[#allocation6 + $0x494] ss:$8 sps:$4 sm:$0xff]   ;;  %v9496_v31 = vld [vmem:[#allocation3 + $0xe0] sm:$0xff] }
 0x396   :  { %v3803_v19 = vsel %vm3739_vm7, %v8555_v11, %v3771_v23  ;;  %v4118_v21 = vshrl.u32 %v8475_v40, 16  ;;  %v4121_v20 = vshll.u32 %v8475_v40, 16  ;;  %v10761_v17 = vsel %vm3865_vm8, %v3833_v51, %v3897_v36  ;;  %v9252_v23 = vld [vmem:[#allocation6 + $0x490] ss:$8 sps:$4 sm:$0xff]  }
 0x397   :  { %v4214_v22 = vsel %vm9670_vm6, %v4116_v29, %v4213_v18  ;;  %11584 = vst [vmem:[#allocation29_spill] sm:$0xff] %v10761_v17  ;;  %vm3866_vm10 = vcmp.gt.f32.partialorder %v3834_v56, 0.0  ;;  %v3898_v47 = vmul.f32 0.01, %v3834_v56  ;;  %v3835_v28 = vadd.f32 %v9496_v31, %v3803_v19  ;;  %v9257_v19 = vld [vmem:[#allocation6 + $0x4a4] ss:$8 sps:$4 sm:$0xff]  }
 0x398   :  { %4215 = vst [vmem:[#allocation2 + $0x88] sm:$0x11] %v4214_v22  ;;  %vm3740_vm11 = vcmp.gt.f32.partialorder %v8556_v7, 0.0  ;;  %v10763_v11 = vrot.slane %v4118_v21, 7  ;;  %v3772_v32 = vmul.f32 0.01, %v8556_v7  ;;  %v8126_v58 = vcombine.high %v10645_v43, %v10686_v63  ;;  %5454 = vmatpush1.bf16.msra.mxu0 %v9249_v44 }
 0x399   :  { %v8557_v34 = vadd.f32 %v10659_v48, %v10484_v55  ;;  %v10769_v29 = vsel %vm3866_vm10, %v3834_v56, %v3898_v47  ;;  %vm3867_vm12 = vcmp.gt.f32.partialorder %v3835_v28, 0.0  ;;  %v3899_v51 = vmul.f32 0.01, %v3835_v28  ;;  %5455 = vmatprep.subr.bf16.mxu0 %v9254_v41  ;;  %v4216_v44 = vld [vmem:[#allocation2 + $0x90] sm:$0xff]  ;;  %v9497_v18 = vld [vmem:[#allocation3 + $0xe8] sm:$0xff] }
 0x39a   :  { %11585 = vst [vmem:[#allocation30_spill] sm:$0xff] %v10769_v29  ;;  %v8125_v36 = vcombine.low %v10645_v43, %v10686_v63  ;;  %v11586_v21 = vrot.slane %v10669_v1, 4  ;;  %v4123_v55 = vor.u32 %v4121_v20, %v10763_v11  ;;  %v8476_v48 = vpack.c.bf16 %v10769_v29, %v10761_v17  ;;  %5386 = vmatprep.mubr.bf16.mxu0 %v8126_v58  ;;  %v9260_v31 = vld [vmem:[#allocation6 + $0x4b4] ss:$8 sps:$4 sm:$0xff]  }
 0x39b   :  { %v3804_v56 = vsel %vm3740_vm11, %v8556_v7, %v3772_v32  ;;  %v10786_v3 = vsel %vm9683_vm14, %v4107_v6, %v4114_v24  ;;  %vm3741_vm13 = vcmp.gt.f32.partialorder %v8557_v34, 0.0  ;;  %v3773_v1 = vmul.f32 0.01, %v8557_v34  ;;  %v9255_v6 = vld [vmem:[#allocation6 + $0x4a0] ss:$8 sps:$4 sm:$0xff]   ;;  %v9498_v58 = vld [vmem:[#allocation3 + $0xf0] sm:$0xff] }
 0x39c   :  { %v10778_v40 = vsel %vm9683_vm14, %v11586_v21, %v10726_v52  ;;  %v3836_v14 = vadd.f32 %v9497_v18, %v3804_v56  ;;  %5387 = vmatmul.mubr.bf16.gmra.mrb[44].mxu0 %v8125_v36  ;;  %v10790_v52 = vsel %vm9693_vm15, %v4123_v55, %v4216_v44  ;;  %v4126_v20 = vshrl.u32 %v8476_v48, 16  ;;  %v4220_v56 = vld [vmem:[#allocation2 + $0xa0] sm:$0x11] }
 0x39d   :  { %v10793_v41 = vsel %vm3867_vm12, %v3835_v28, %v3899_v51  ;;  %v8558_v7 = vadd.f32 %v10664_v39, %v10487_v4  ;;  %5456 = vmatpush1.bf16.msra.mxu0 %v9252_v23  ;;  %4218 = vst [vmem:[#allocation2 + $0x90] sm:$0xff] %v10790_v52  ;;  %v3805_v22 = vsel %vm3741_vm13, %v8557_v34, %v3773_v1  ;;  %v4129_v51 = vshll.u32 %v8476_v48, 16  ;;  %v9263_v48 = vld [vmem:[#allocation6 + $0x4c4] ss:$8 sps:$4 sm:$0xff]  }
 0x39e   :  { %11587 = vst [vmem:[#allocation31_spill] sm:$0xff] %v10793_v41  ;;  %vm3868_vm1 = vcmp.gt.f32.partialorder %v3836_v14, 0.0  ;;  %v3900_v24 = vmul.f32 0.01, %v3836_v14  ;;  %v8128_v47 = vcombine.high %v10700_v61, %v10778_v40  ;;  %5457 = vmatprep.subr.bf16.mxu0 %v9257_v19  ;;  %v4128_v32 = vrot.slane %v4126_v20, 7 }
 0x39f   :  { %v3837_v36 = vadd.f32 %v9498_v58, %v3805_v22  ;;  %vm3742_vm0 = vcmp.gt.f32.partialorder %v8558_v7, 0.0  ;;  %v3774_v28 = vmul.f32 0.01, %v8558_v7  ;;  %v8127_v4 = vcombine.low %v10700_v61, %v10778_v40  ;;  %v9258_v19 = vld [vmem:[#allocation6 + $0x4b0] ss:$8 sps:$4 sm:$0xff]  }
 0x3a0   :  { %v10800_v21 = vsel %vm3868_vm1, %v3836_v14, %v3900_v24  ;;  %5396 = vmatprep.mubr.bf16.mxu0 %v8128_v47  ;;  %v4133_v39 = vrot.slane %v4128_v32, 4  ;;  %v8130_v23 = vcombine.high %v10747_v2, %v10786_v3  ;;  %v4131_v55 = vor.u32 %v4129_v51, %v4128_v32  ;;  %v9499_v24 = vld [vmem:[#allocation3 + $0xf8] sm:$0xff]  ;;  %v9261_v32 = vld [vmem:[#allocation6 + $0x4c0] ss:$8 sps:$4 sm:$0xff]  }
 0x3a1   :  { %11588 = vst [vmem:[#allocation32_spill] sm:$0xff] %v10800_v21  ;;  %v8477_v34 = vpack.c.bf16 %v10800_v21, %v10793_v41  ;;  %5458 = vmatpush1.bf16.msra.mxu0 %v9255_v6  ;;  %v3901_v44 = vmul.f32 0.01, %v3837_v36  ;;  %v3806_v18 = vsel %vm3742_vm0, %v8558_v7, %v3774_v28  ;;  %vm3869_vm2 = vcmp.gt.f32.partialorder %v3837_v36, 0.0  ;;  %v9266_v28 = vld [vmem:[#allocation6 + $0x4d4] ss:$8 sps:$4 sm:$0xff]  }
 0x3a2   :  { %5459 = vmatprep.subr.bf16.mxu0 %v9260_v31  ;;  %v4221_v14 = vsel %vm9670_vm6, %v4133_v39, %v4220_v56  ;;  %v4124_v20 = vrot.slane %v10763_v11, 4  ;;  %v3838_v22 = vadd.f32 %v9499_v24, %v3806_v18  ;;  %v4223_v51 = vld [vmem:[#allocation2 + $0xa8] sm:$0xff]  ;;  %v9264_v56 = vld [vmem:[#allocation6 + $0x4d0] ss:$8 sps:$4 sm:$0xff]   ;;  %v4264_v18 = vshll.u32 %v10543_v27, 16 }
 0x3a3   :  { %v4135_v1 = vshrl.u32 %v8477_v34, 16  ;;  %4222 = vst [vmem:[#allocation2 + $0xa0] sm:$0x11] %v4221_v14  ;;  %v4138_v6 = vshll.u32 %v8477_v34, 16  ;;  %v10815_v31 = vsel %vm3869_vm2, %v3837_v36, %v3901_v44  ;;  %v4255_v34 = vshrl.u32 %v10517_v49, 16 }
 0x3a4   :  { %5397 = vmatmul.mubr.bf16.gmra.mrb[48].mxu0 %v8127_v4  ;;  %v10813_v7 = vsel %vm9683_vm14, %v4124_v20, %v4131_v55  ;;  %11589 = vst [vmem:[#allocation33_spill] sm:$0xff] %v10815_v31  ;;  %vm3870_vm3 = vcmp.gt.f32.partialorder %v3838_v22, 0.0  ;;  %v3902_v58 = vmul.f32 0.01, %v3838_v22  ;;  %v8129_v4 = vcombine.low %v10747_v2, %v10786_v3  ;;  %v9269_v44 = vld [vmem:[#allocation6 + $0x4e4] ss:$8 sps:$4 sm:$0xff]  }
 0x3a5   :  { %v4137_v47 = vrot.slane %v4135_v1, 7  ;;  %5406 = vmatprep.mubr.bf16.mxu0 %v8130_v23  ;;  %5460 = vmatpush1.bf16.msra.mxu0 %v9258_v19  ;;  %v4258_v23 = vshll.u32 %v10517_v49, 16  ;;  %v8132_v55 = vcombine.high %v10790_v52, %v10813_v7  ;;  %v4268_v49 = vshrl.u32 %v10543_v27, 16 }
 0x3a6   :  { %5461 = vmatprep.subr.bf16.mxu0 %v9263_v48  ;;  %v10817_v39 = vsel %vm3870_vm3, %v3838_v22, %v3902_v58  ;;  %v4257_v14 = vrot.slane %v4255_v34, 4  ;;  %v9267_v22 = vld [vmem:[#allocation6 + $0x4e0] ss:$8 sps:$4 sm:$0xff]  }
 0x3a7   :  { %v4140_v11 = vor.u32 %v4138_v6, %v4137_v47  ;;  %11590 = vst [vmem:[#allocation34_spill] sm:$0xff] %v10817_v39  ;;  %v8478_v36 = vpack.c.bf16 %v10817_v39, %v10815_v31  ;;  %v4260_v1 = vrot.slane %v4258_v23, 5  ;;  %v10834_v6 = vld [vmem:[#allocation2 + $0x10] sm:$0x11]  ;;  %v4270_v58 = vrot.slane %v4268_v49, 4 }
 0x3a8   :  { %v4227_v31 = vld [vmem:[#allocation2 + $0xb8] sm:$0x11]  ;;  %v4274_v23 = vshll.u32 %v10834_v6, 16 }
 0x3a9   :  { %v10825_v19 = vsel %vm9693_vm15, %v4140_v11, %v4223_v51  ;;  %5462 = vmatpush1.bf16.msra.mxu0 %v9261_v32  ;;  %v4143_v48 = vshrl.u32 %v8478_v36, 16  ;;  %v4146_v24 = vshll.u32 %v8478_v36, 16  ;;  %v4266_v32 = vrot.slane %v4264_v18, 5 }
 0x3aa   :  { %4225 = vst [vmem:[#allocation2 + $0xa8] sm:$0xff] %v10825_v19  ;;  %5463 = vmatprep.subr.bf16.mxu0 %v9266_v28  ;;  %v9272_v28 = vld [vmem:[#allocation6 + $0x4f4] ss:$8 sps:$4 sm:$0xff]   ;;  %v4141_v11 = vrot.slane %v4137_v47, 4  ;;  %v4261_v34 = vor.u32 %v4260_v1, %v4257_v14  ;;  %v4279_v47 = vshrl.u32 %v10547_v10, 16  ;;  %v4288_v14 = vshll.u32 %v10586_v15, 16 }
 0x3ab   :  { %v4145_v20 = vrot.slane %v4143_v48, 7  ;;  %v4271_v49 = vor.u32 %v4270_v58, %v4266_v32  ;;  %v9275_v48 = vld [vmem:[#allocation6 + $0x504] ss:$8 sps:$4 sm:$0xff]   ;;  %v4292_v1 = vshrl.u32 %v10586_v15, 16 }
 0x3ac   :  { %5407 = vmatmul.mubr.bf16.gmra.mrb[52].mxu0 %v8129_v4  ;;  %v8131_v4 = vcombine.low %v10790_v52, %v10813_v7 }
 0x3ad   :  { %5416 = vmatprep.mubr.bf16.mxu0 %v8132_v55  ;;  %5464 = vmatpush1.bf16.msra.mxu0 %v9264_v56  ;;  %v4148_v51 = vor.u32 %v4146_v24, %v4145_v20  ;;  %v4150_v39 = vrot.slane %v4145_v20, 4  ;;  %v9270_v56 = vld [vmem:[#allocation6 + $0x4f0] ss:$8 sps:$4 sm:$0xff]   ;;  %v4276_v20 = vrot.slane %v4274_v23, 5  ;;  %v4281_v24 = vrot.slane %v4279_v47, 4 }
 0x3ae   :  { %5465 = vmatprep.subr.bf16.mxu0 %v9269_v44  ;;  %v4282_v44 = vshll.u32 %v10547_v10, 16  ;;  %v4272_v10 = vrot.slane %v4271_v49, 4  ;;  %v4303_v23 = vshrl.u32 %v10593_v57, 16 }
 0x3af   :  { %v10841_v36 = vsel %vm9683_vm14, %v4141_v11, %v4148_v51  ;;  %v4228_v55 = vsel %vm9670_vm6, %v4150_v39, %v4227_v31  ;;  %v4262_v31 = vrot.slane %v4261_v34, 4  ;;  %v10851_v39 = vld [vmem:[#allocation2 + $0x28] sm:$0x11]  ;;  %v4290_v11 = vrot.slane %v4288_v14, 5 }
 0x3b0   :  { %4229 = vst [vmem:[#allocation2 + $0xb8] sm:$0x11] %v4228_v55  ;;  %v8134_v18 = vcombine.high %v10825_v19, %v10841_v36  ;;  %v4294_v51 = vrot.slane %v4292_v1, 4  ;;  %v8133_v58 = vcombine.low %v10825_v19, %v10841_v36  ;;  %v4306_v55 = vshll.u32 %v10593_v57, 16  ;;  %v9321_v14 = vld [vmem:[#allocation6 + $0x300] ss:$8 sps:$4 sm:$0xff]  }
 0x3b1   :  { %5466 = vmatpush1.bf16.msra.mxu0 %v9267_v22  ;;  %v4284_v22 = vrot.slane %v4282_v44, 5  ;;  %v4267_v34 = vsel %vm9912_vm5, %v4262_v31, %v4266_v32  ;;  %v4312_v44 = vshll.u32 %v10682_v5, 16  ;;  %v10864_v1 = vld [vmem:[#allocation2 + $0x40] sm:$0x11] }
 0x3b2   :  { %5467 = vmatprep.subr.bf16.mxu0 %v9272_v28  ;;  %v4277_v28 = vsel %vm9912_vm5, %v4272_v10, %v4276_v20  ;;  %v4295_v47 = vor.u32 %v4294_v51, %v4290_v11  ;;  %v4305_v20 = vrot.slane %v4303_v23, 4  ;;  %v4308_v10 = vrot.slane %v4306_v55, 5  ;;  %v9323_v32 = vld [vmem:[#allocation6 + $0x304] ss:$8 sps:$4 sm:$0xff]  }
 0x3b3   :  { %v8136_v49 = vcombine.high %v4267_v34, %v4277_v28  ;;  %v4314_v41 = vrot.slane %v4312_v44, 5  ;;  %7146 = vmatprep.subr.bf16.mxu1 %v9323_v32  ;;  %v4322_v51 = vshll.u32 %v10864_v1, 16  ;;  %v4327_v23 = vshrl.u32 %v10645_v43, 16  ;;  %v9276_v32 = vld [vmem:[#allocation6 + $0x510] ss:$8 sps:$4 sm:$0xff]  }
 0x3b4   :  { %5417 = vmatmul.mubr.bf16.gmra.mrb[56].mxu0 %v8131_v4  ;;  %v4298_v4 = vshll.u32 %v10851_v39, 16  ;;  %v4296_v21 = vrot.slane %v4295_v47, 4  ;;  %7147 = vmatpush1.bf16.msra.mxu1 %v9321_v14  ;;  %v4309_v29 = vor.u32 %v4308_v10, %v4305_v20  ;;  %v4330_v55 = vshll.u32 %v10645_v43, 16  ;;  %v9278_v47 = vld [vmem:[#allocation6 + $0x514] ss:$8 sps:$4 sm:$0xff]  }
 0x3b5   :  { %5426 = vmatprep.mubr.bf16.mxu0 %v8134_v18  ;;  %5468 = vmatpush1.bf16.msra.mxu0 %v9270_v56  ;;  %v4285_v56 = vor.u32 %v4284_v22, %v4281_v24  ;;  %v4316_v18 = vshrl.u32 %v10682_v5, 16  ;;  %v9326_v24 = vld [vmem:[#allocation6 + $0x314] ss:$8 sps:$4 sm:$0xff]   ;;  %v9327_v20 = vld [vmem:[#allocation6 + $0x320] ss:$8 sps:$4 sm:$0xff]   ;;  %v4329_v10 = vrot.slane %v4327_v23, 4 }
 0x3b6   :  { %5550 = vmatprep.subr.bf16.mxu0 %v9275_v48  ;;  %v4300_v48 = vrot.slane %v4298_v4, 5  ;;  %v8135_v4 = vcombine.low %v4267_v34, %v4277_v28  ;;  %7148 = vmatprep.subr.bf16.mxu1 %v9326_v24  ;;  %v4324_v28 = vrot.slane %v4322_v51, 5  ;;  %v10875_v34 = vld [vmem:[#allocation2 + $0x58] sm:$0x11]  ;;  %v4310_v43 = vrot.slane %v4309_v29, 4 }
 0x3b7   :  { %v4286_v31 = vrot.slane %v4285_v56, 4  ;;  %v4318_v57 = vrot.slane %v4316_v18, 4  ;;  %v4336_v18 = vshll.u32 %v10686_v63, 16  ;;  %v4346_v51 = vshll.u32 %v10875_v34, 16  ;;  %v9284_v23 = vld [vmem:[#allocation6 + $0x534] ss:$8 sps:$4 sm:$0xff]  }
 0x3b8   :  { %v4301_v22 = vsel %vm9912_vm5, %v4296_v21, %v4300_v48  ;;  %v4340_v21 = vshrl.u32 %v10686_v63, 16  ;;  %v9329_v48 = vld [vmem:[#allocation6 + $0x324] ss:$8 sps:$4 sm:$0xff]   ;;  %v4315_v29 = vsel %vm9912_vm5, %v4310_v43, %v4314_v41  ;;  %v10886_v43 = vld [vmem:[#allocation2 + $0x70] sm:$0x11] }
 0x3b9   :  { %v4291_v56 = vsel %vm9912_vm5, %v4286_v31, %v4290_v11  ;;  %v4319_v44 = vor.u32 %v4318_v57, %v4314_v41  ;;  %v4332_v11 = vrot.slane %v4330_v55, 5  ;;  %v9332_v31 = vld [vmem:[#allocation6 + $0x334] ss:$8 sps:$4 sm:$0xff]   ;;  %v9281_v57 = vld [vmem:[#allocation6 + $0x524] ss:$8 sps:$4 sm:$0xff]   ;;  %v4338_v17 = vrot.slane %v4336_v18, 5 }
 0x3ba   :  { %v8138_v14 = vcombine.high %v4291_v56, %v4301_v22  ;;  %v4342_v46 = vrot.slane %v4340_v21, 4  ;;  %v4354_v18 = vshll.u32 %v10700_v61, 16  ;;  %v4360_v21 = vshll.u32 %v10778_v40, 16  ;;  %v9333_v41 = vld [vmem:[#allocation6 + $0x340] ss:$8 sps:$4 sm:$0xff]  }
 0x3bb   :  { %v4320_v24 = vrot.slane %v4319_v44, 4  ;;  %v4333_v55 = vor.u32 %v4332_v11, %v4329_v10 }
 0x3bc   :  { %5427 = vmatmul.mubr.bf16.gmra.mrb[60].mxu0 %v8133_v58  ;;  %v9324_v58 = vld [vmem:[#allocation6 + $0x310] ss:$8 sps:$4 sm:$0xff]   ;;  %v4343_v44 = vor.u32 %v4342_v46, %v4338_v17  ;;  %v9338_v46 = vld [vmem:[#allocation6 + $0x354] ss:$8 sps:$4 sm:$0xff]  }
 0x3bd   :  { %5469 = vmatprep.mubr.bf16.mxu0 %v8136_v49  ;;  %v9273_v49 = vld [vmem:[#allocation6 + $0x500] ss:$8 sps:$4 sm:$0xff]   ;;  %7149 = vmatpush1.bf16.msra.mxu1 %v9324_v58  ;;  %v9330_v58 = vld [vmem:[#allocation6 + $0x330] ss:$8 sps:$4 sm:$0xff]  }
 0x3be   :  { %7150 = vmatprep.subr.bf16.mxu1 %v9329_v48  ;;  %v4364_v48 = vshrl.u32 %v10778_v40, 16  ;;  %v4344_v11 = vrot.slane %v4343_v44, 4  ;;  %v4378_v44 = vshll.u32 %v10747_v2, 16 }
 0x3c1   :  { %7151 = vmatpush1.bf16.msra.mxu1 %v9327_v20  ;;  %v4334_v20 = vrot.slane %v4333_v55, 4  ;;  %v9285_v55 = vld [vmem:[#allocation6 + $0x540] ss:$8 sps:$4 sm:$0xff]  }
 0x3c2   :  { %7152 = vmatprep.subr.bf16.mxu1 %v9332_v31  ;;  %v4356_v31 = vrot.slane %v4354_v18, 5  ;;  %v9290_v18 = vld [vmem:[#allocation6 + $0x554] ss:$8 sps:$4 sm:$0xff]  }
 0x3c4   :  { %5470 = vmatmul.mubr.bf16.vlgmr.msra.gmra.mrb[32].mxu0 %v8135_v4  ;;  %v4325_v4 = vsel %vm9912_vm5, %v4320_v24, %v4324_v28  ;;  %v9335_v28 = vld [vmem:[#allocation6 + $0x344] ss:$8 sps:$4 sm:$0xff]   ;;  %v4366_v24 = vrot.slane %v4364_v48, 4 }
 0x3c5   :  { %5479 = vmatprep.mubr.bf16.mxu0 %v8138_v14  ;;  %5551 = vmatpush1.bf16.msra.mxu0 %v9273_v49  ;;  %v8137_v14 = vcombine.low %v4291_v56, %v4301_v22  ;;  %v9279_v49 = vld [vmem:[#allocation6 + $0x520] ss:$8 sps:$4 sm:$0xff]   ;;  %v9282_v22 = vld [vmem:[#allocation6 + $0x530] ss:$8 sps:$4 sm:$0xff]   ;;  %v4348_v56 = vrot.slane %v4346_v51, 5  ;;  %v4370_v51 = vshll.u32 %v10886_v43, 16 }
 0x3c6   :  { %5552 = vmatprep.subr.bf16.mxu0 %v9278_v47  ;;  %v4351_v47 = vshrl.u32 %v10700_v61, 16  ;;  %7153 = vmatpush1.bf16.msra.mxu1 %v9330_v58  ;;  %v9287_v61 = vld [vmem:[#allocation6 + $0x544] ss:$8 sps:$4 sm:$0xff]   ;;  %v9336_v58 = vld [vmem:[#allocation6 + $0x350] ss:$8 sps:$4 sm:$0xff]  }
 0x3c7   :  { %7154 = vmatprep.subr.bf16.mxu1 %v9335_v28  ;;  %v4384_v28 = vshll.u32 %v10786_v3, 16 }
 0x3c8   :  { %v4353_v10 = vrot.slane %v4351_v47, 4  ;;  %v4339_v47 = vsel %vm9912_vm5, %v4334_v20, %v4338_v17  ;;  %v9339_v17 = vld [vmem:[#allocation6 + $0x360] ss:$8 sps:$4 sm:$0xff]   ;;  %v4380_v20 = vrot.slane %v4378_v44, 5  ;;  %v4399_v44 = vshrl.u32 %v10790_v52, 16 }
 0x3c9   :  { %5553 = vmatpush1.bf16.msra.mxu0 %v9276_v32  ;;  %v8140_v32 = vcombine.high %v4315_v29, %v4325_v4 }
 0x3ca   :  { %5554 = vmatprep.subr.bf16.mxu0 %v9281_v57  ;;  %v4362_v57 = vrot.slane %v4360_v21, 5  ;;  %7155 = vmatpush1.bf16.msra.mxu1 %v9333_v41  ;;  %v4357_v21 = vor.u32 %v4356_v31, %v4353_v10  ;;  %v10897_v41 = vld [vmem:[#allocation2 + $0x88] sm:$0x11]  ;;  %v4386_v31 = vrot.slane %v4384_v28, 5 }
 0x3cb   :  { %7156 = vmatprep.subr.bf16.mxu1 %v9338_v46  ;;  %v9344_v46 = vld [vmem:[#allocation6 + $0x374] ss:$8 sps:$4 sm:$0xff]   ;;  %v9293_v10 = vld [vmem:[#allocation6 + $0x564] ss:$8 sps:$4 sm:$0xff]  }
 0x3cc   :  { %5480 = vmatmul.mubr.bf16.gmra.mrb[36].mxu0 %v8137_v14  ;;  %v4349_v14 = vsel %vm9912_vm5, %v4344_v11, %v4348_v56  ;;  %v4367_v48 = vor.u32 %v4366_v24, %v4362_v57 }
 0x3cd   :  { %5489 = vmatprep.mubr.bf16.mxu0 %v8140_v32  ;;  %5555 = vmatpush1.bf16.msra.mxu0 %v9279_v49  ;;  %v8139_v49 = vcombine.low %v4315_v29, %v4325_v4  ;;  %v4388_v32 = vshrl.u32 %v10786_v3, 16  ;;  %v8142_v56 = vcombine.high %v4339_v47, %v4349_v14  ;;  %v9288_v4 = vld [vmem:[#allocation6 + $0x550] ss:$8 sps:$4 sm:$0xff]   ;;  %v4372_v29 = vrot.slane %v4370_v51, 5 }
 0x3ce   :  { %5556 = vmatprep.subr.bf16.mxu0 %v9284_v23  ;;  %v4375_v23 = vshrl.u32 %v10747_v2, 16  ;;  %7157 = vmatpush1.bf16.msra.mxu1 %v9336_v58  ;;  %v4368_v11 = vrot.slane %v4367_v48, 4  ;;  %v4394_v51 = vshll.u32 %v10897_v41, 16  ;;  %v9342_v58 = vld [vmem:[#allocation6 + $0x370] ss:$8 sps:$4 sm:$0xff]  }
 0x3cf   :  { %v4390_v24 = vrot.slane %v4388_v32, 4  ;;  %v9296_v48 = vld [vmem:[#allocation6 + $0x574] ss:$8 sps:$4 sm:$0xff]   ;;  %v4408_v32 = vshll.u32 %v10813_v7, 16 }
 0x3d0   :  { %v4377_v2 = vrot.slane %v4375_v23, 4 }
 0x3d1   :  { %5557 = vmatpush1.bf16.msra.mxu0 %v9282_v22  ;;  %v9341_v22 = vld [vmem:[#allocation6 + $0x364] ss:$8 sps:$4 sm:$0xff]   ;;  %v4391_v28 = vor.u32 %v4390_v24, %v4386_v31 }
 0x3d2   :  { %5558 = vmatprep.subr.bf16.mxu0 %v9287_v61  ;;  %v4358_v61 = vrot.slane %v4357_v21, 4  ;;  %7158 = vmatprep.subr.bf16.mxu1 %v9341_v22  ;;  %v4381_v23 = vor.u32 %v4380_v20, %v4377_v2  ;;  %v4412_v22 = vshrl.u32 %v10813_v7, 16  ;;  %v10908_v2 = vld [vmem:[#allocation2 + $0xa0] sm:$0x11]  ;;  %v4401_v20 = vrot.slane %v4399_v44, 4 }
 0x3d3   :  { %7159 = vmatpush1.bf16.msra.mxu1 %v9339_v17  ;;  %v9345_v17 = vld [vmem:[#allocation6 + $0x380] ss:$8 sps:$4 sm:$0xff]   ;;  %v4423_v44 = vshrl.u32 %v10825_v19, 16 }
 0x3d4   :  { %5490 = vmatmul.mubr.bf16.gmra.mrb[40].mxu0 %v8139_v49  ;;  %v4373_v49 = vsel %vm9912_vm5, %v4368_v11, %v4372_v29  ;;  %7160 = vmatprep.subr.bf16.mxu1 %v9344_v46  ;;  %v4363_v21 = vsel %vm9912_vm5, %v4358_v61, %v4362_v57  ;;  %v9347_v29 = vld [vmem:[#allocation6 + $0x384] ss:$8 sps:$4 sm:$0xff]   ;;  %v4410_v61 = vrot.slane %v4408_v32, 5  ;;  %v4414_v11 = vrot.slane %v4412_v22, 4 }
 0x3d5   :  { %5499 = vmatprep.mubr.bf16.mxu0 %v8142_v56  ;;  %5559 = vmatpush1.bf16.msra.mxu0 %v9285_v55  ;;  %v8141_v55 = vcombine.low %v4339_v47, %v4349_v14  ;;  %v9291_v56 = vld [vmem:[#allocation6 + $0x560] ss:$8 sps:$4 sm:$0xff]   ;;  %v9294_v14 = vld [vmem:[#allocation6 + $0x570] ss:$8 sps:$4 sm:$0xff]   ;;  %v4396_v47 = vrot.slane %v4394_v51, 5  ;;  %v4418_v51 = vshll.u32 %v10908_v2, 16 }
 0x3d6   :  { %5560 = vmatprep.subr.bf16.mxu0 %v9290_v18  ;;  %v4402_v18 = vshll.u32 %v10790_v52, 16  ;;  %v4382_v52 = vrot.slane %v4381_v23, 4  ;;  %v9299_v46 = vld [vmem:[#allocation6 + $0x584] ss:$8 sps:$4 sm:$0xff]   ;;  %v4432_v32 = vshll.u32 %v10841_v36, 16  ;;  %v4436_v22 = vshrl.u32 %v10841_v36, 16 }
 0x3d7   :  { %7161 = vmatpush1.bf16.msra.mxu1 %v9342_v58  ;;  %v8143_v58 = vcombine.low %v4363_v21, %v4373_v49 }
 0x3d8   :  { %v4404_v57 = vrot.slane %v4402_v18, 5  ;;  %7162 = vmatprep.subr.bf16.mxu1 %v9347_v29  ;;  %v9302_v18 = vld [vmem:[#allocation6 + $0x594] ss:$8 sps:$4 sm:$0xff]  }
 0x3d9   :  { %5561 = vmatpush1.bf16.msra.mxu0 %v9288_v4  ;;  %v8144_v4 = vcombine.high %v4363_v21, %v4373_v49  ;;  %v9300_v49 = vld [vmem:[#allocation6 + $0x590] ss:$8 sps:$4 sm:$0xff]  }
 0x3da   :  { %5562 = vmatprep.subr.bf16.mxu0 %v9293_v10  ;;  %v4392_v10 = vrot.slane %v4391_v28, 4  ;;  %v4405_v23 = vor.u32 %v4404_v57, %v4401_v20  ;;  %v4426_v28 = vshll.u32 %v10825_v19, 16  ;;  %v4434_v20 = vrot.slane %v4432_v32, 5 }
 0x3db   :  { %7163 = vmatpush1.bf16.msra.mxu1 %v9345_v17  ;;  %v4438_v19 = vrot.slane %v4436_v22, 4 }
 0x3dc   :  { %5500 = vmatmul.mubr.bf16.gmra.mrb[44].mxu0 %v8141_v55  ;;  %v4397_v24 = vsel %vm9912_vm5, %v4392_v10, %v4396_v47  ;;  %v9297_v55 = vld [vmem:[#allocation6 + $0x580] ss:$8 sps:$4 sm:$0xff]   ;;  %v4406_v21 = vrot.slane %v4405_v23, 4  ;;  %v9305_v47 = vld [vmem:[#allocation6 + $0x5a4] ss:$8 sps:$4 sm:$0xff]  }
 0x3dd   :  { %5509 = vmatprep.mubr.bf16.mxu0 %v8144_v4  ;;  %5563 = vmatpush1.bf16.msra.mxu0 %v9291_v56  ;;  %v4387_v56 = vsel %vm9912_vm5, %v4382_v52, %v4386_v31  ;;  %v4420_v4 = vrot.slane %v4418_v51, 5  ;;  %v10919_v31 = vld [vmem:[#allocation2 + $0xb8] sm:$0x11]  ;;  %v4428_v52 = vrot.slane %v4426_v28, 5  ;;  %v9303_v10 = vld [vmem:[#allocation6 + $0x5a0] ss:$8 sps:$4 sm:$0xff]   ;;  %v4439_v23 = vor.u32 %v4438_v19, %v4434_v20 }
 0x3de   :  { %5564 = vmatprep.subr.bf16.mxu0 %v9296_v48  ;;  %v4415_v48 = vor.u32 %v4414_v11, %v4410_v61  ;;  %v8146_v29 = vcombine.high %v4387_v56, %v4397_v24  ;;  %v8145_v11 = vcombine.low %v4387_v56, %v4397_v24  ;;  %v4411_v51 = vsel %vm9912_vm5, %v4406_v21, %v4410_v61  ;;  %v9311_v28 = vld [vmem:[#allocation6 + $0x5c4] ss:$8 sps:$4 sm:$0xff]   ;;  %v9309_v56 = vld [vmem:[#allocation6 + $0x5c0] ss:$8 sps:$4 sm:$0xff]  }
 0x3df   :  { %v4440_v22 = vrot.slane %v4439_v23, 4  ;;  %v9318_v23 = vld [vmem:[#allocation6 + $0x5f0] ss:$8 sps:$4 sm:$0xff]  }
 0x3e0   :  { %v4416_v17 = vrot.slane %v4415_v48, 4  ;;  %v9306_v48 = vld [vmem:[#allocation6 + $0x5b0] ss:$8 sps:$4 sm:$0xff]  }
 0x3e1   :  { %5565 = vmatpush1.bf16.msra.mxu0 %v9294_v14  ;;  %v4425_v14 = vrot.slane %v4423_v44, 4 }
 0x3e2   :  { %5566 = vmatprep.subr.bf16.mxu0 %v9299_v46  ;;  %v4421_v57 = vsel %vm9912_vm5, %v4416_v17, %v4420_v4  ;;  %v4442_v46 = vshll.u32 %v10919_v31, 16  ;;  %v9314_v4 = vld [vmem:[#allocation6 + $0x5d4] ss:$8 sps:$4 sm:$0xff]   ;;  %v9312_v17 = vld [vmem:[#allocation6 + $0x5d0] ss:$8 sps:$4 sm:$0xff]  }
 0x3e3   :  { %v8148_v44 = vcombine.high %v4411_v51, %v4421_v57 }
 0x3e4   :  { %5510 = vmatmul.mubr.bf16.gmra.mrb[48].mxu0 %v8143_v58  ;;  %v9308_v58 = vld [vmem:[#allocation6 + $0x5b4] ss:$8 sps:$4 sm:$0xff]  }
 0x3e5   :  { %5519 = vmatprep.mubr.bf16.mxu0 %v8146_v29  ;;  %5567 = vmatpush1.bf16.msra.mxu0 %v9297_v55  ;;  %v4429_v55 = vor.u32 %v4428_v52, %v4425_v14  ;;  %v8147_v29 = vcombine.low %v4411_v51, %v4421_v57  ;;  %v4446_v14 = vld [vmem:[#allocation2] sm:$0xee] }
 0x3e6   :  { %5568 = vmatprep.subr.bf16.mxu0 %v9302_v18  ;;  %v4444_v18 = vrot.slane %v4442_v46, 5  ;;  %v9317_v52 = vld [vmem:[#allocation6 + $0x5e4] ss:$8 sps:$4 sm:$0xff]   ;;  %v8111_v19 = vrot.slane %v4446_v14, 9 }
 0x3e7   :  { %v4430_v32 = vrot.slane %v4429_v55, 4  ;;  %v4490_v55 = vrot.slane %v10851_v39, 5  ;;  %v4497_v39 = vrot.slane %v10864_v1, 5 }
 0x3e8   :  { %v4445_v24 = vsel %vm9912_vm5, %v4440_v22, %v4444_v18 }
 0x3e9   :  { %5569 = vmatpush1.bf16.msra.mxu0 %v9300_v49  ;;  %v4435_v61 = vsel %vm9912_vm5, %v4430_v32, %v4434_v20  ;;  %v4480_v49 = vrot.slane %v10543_v27, 5  ;;  %v9315_v20 = vld [vmem:[#allocation6 + $0x5e0] ss:$8 sps:$4 sm:$0xff]  }
 0x3ea   :  { %5570 = vmatprep.subr.bf16.mxu0 %v9305_v47  ;;  %v8150_v21 = vcombine.high %v4435_v61, %v4445_v24  ;;  %v4483_v47 = vrot.slane %v10834_v6, 5  ;;  %v4487_v6 = vrot.slane %v10586_v15, 5  ;;  %v4494_v15 = vrot.slane %v10682_v5, 5 }
 0x3eb   :  { %v4482_v46 = vrot.slane %v4480_v49, 4  ;;  %v4481_v27 = vsel %vm10002_vm9, %v8111_v19, %v4480_v49  ;;  %v4504_v5 = vrot.slane %v10875_v34, 5 }
 0x3ec   :  { %5520 = vmatmul.mubr.bf16.gmra.mrb[52].mxu0 %v8145_v11  ;;  %v9320_v11 = vld [vmem:[#allocation6 + $0x5f4] ss:$8 sps:$4 sm:$0xff]   ;;  %v4489_v18 = vrot.slane %v4487_v6, 4 }
 0x3ed   :  { %5529 = vmatprep.mubr.bf16.mxu0 %v8148_v44  ;;  %5571 = vmatpush1.bf16.msra.mxu0 %v9303_v10  ;;  %v4484_v57 = vsel %vm10002_vm9, %v4482_v46, %v4483_v47  ;;  %v8149_v10 = vcombine.low %v4435_v61, %v4445_v24  ;;  %v4448_v24 = vld [vmem:[#allocation2 + $0x30] sm:$0xee]  ;;  %v4449_v47 = vld [vmem:[#allocation2 + $0x48] sm:$0xee] }
 0x3ee   :  { %5572 = vmatprep.subr.bf16.mxu0 %v9308_v58  ;;  %v8152_v51 = vcombine.high %v4481_v27, %v4484_v57  ;;  %v4447_v58 = vld [vmem:[#allocation2 + $0x18] sm:$0xee] }
 0x3ef   :  { %v8112_v44 = vrot.slane %v4447_v58, 9  ;;  %v4515_v58 = vrot.slane %v10786_v3, 5  ;;  %v4525_v3 = vrot.slane %v10908_v2, 5 }
 0x3f1   :  { %5573 = vmatpush1.bf16.msra.mxu0 %v9306_v48  ;;  %v4491_v48 = vsel %vm10002_vm9, %v4489_v18, %v4490_v55  ;;  %v4488_v32 = vsel %vm10002_vm9, %v8112_v44, %v4487_v6 }
 0x3f2   :  { %5574 = vmatprep.subr.bf16.mxu0 %v9311_v28  ;;  %v8151_v28 = vcombine.low %v4481_v27, %v4484_v57  ;;  %v8154_v22 = vcombine.high %v4488_v32, %v4491_v48  ;;  %v4508_v57 = vrot.slane %v10778_v40, 5  ;;  %v4518_v40 = vrot.slane %v10897_v41, 5 }
 0x3f4   :  { %5530 = vmatmul.mubr.bf16.gmra.mrb[56].mxu0 %v8147_v29  ;;  %v4496_v29 = vrot.slane %v4494_v15, 4  ;;  %v4510_v34 = vrot.slane %v4508_v57, 4 }
 0x3f5   :  { %5539 = vmatprep.mubr.bf16.mxu0 %v8150_v21  ;;  %5575 = vmatpush1.bf16.msra.mxu0 %v9309_v56  ;;  %v8113_v56 = vrot.slane %v4448_v24, 9  ;;  %v4501_v21 = vrot.slane %v10686_v63, 5  ;;  %v4511_v63 = vrot.slane %v10886_v43, 5  ;;  %v4517_v43 = vrot.slane %v4515_v58, 4 }
 0x3f6   :  { %5576 = vmatprep.subr.bf16.mxu0 %v9314_v4  ;;  %v4498_v61 = vsel %vm10002_vm9, %v4496_v29, %v4497_v39  ;;  %v8153_v4 = vcombine.low %v4488_v32, %v4491_v48  ;;  %v4522_v32 = vrot.slane %v10813_v7, 5  ;;  %v4532_v7 = vrot.slane %v10919_v31, 5  ;;  %v9351_v31 = vld [vmem:[#allocation6 + $0x3a0] ss:$8 sps:$4 sm:$0xff]  }
 0x3f7   :  { %v4495_v49 = vsel %vm10002_vm9, %v8113_v56, %v4494_v15  ;;  %v4503_v1 = vrot.slane %v4501_v21, 4  ;;  %v4519_v18 = vsel %vm10002_vm9, %v4517_v43, %v4518_v40 }
 0x3f8   :  { %v8156_v14 = vcombine.high %v4495_v49, %v4498_v61  ;;  %v8155_v19 = vcombine.low %v4495_v49, %v4498_v61  ;;  %v4524_v41 = vrot.slane %v4522_v32, 4  ;;  %v4529_v61 = vrot.slane %v10841_v36, 5  ;;  %v4453_v49 = vld [vmem:[#allocation2 + $0xa8] sm:$0xee]  ;;  %v9348_v36 = vld [vmem:[#allocation6 + $0x390] ss:$8 sps:$4 sm:$0xff]  }
 0x3f9   :  { %5577 = vmatpush1.bf16.msra.mxu0 %v9312_v17  ;;  %v8114_v17 = vrot.slane %v4449_v47, 9 }
 0x3fa   :  { %5578 = vmatprep.subr.bf16.mxu0 %v9317_v52  ;;  %v4505_v52 = vsel %vm10002_vm9, %v4503_v1, %v4504_v5  ;;  %v4526_v39 = vsel %vm10002_vm9, %v4524_v41, %v4525_v3  ;;  %v4531_v2 = vrot.slane %v4529_v61, 4 }
 0x3fb   :  { %v4502_v46 = vsel %vm10002_vm9, %v8114_v17, %v4501_v21  ;;  %v8118_v21 = vrot.slane %v4453_v49, 9 }
 0x3fc   :  { %5540 = vmatmul.mubr.bf16.gmra.mrb[60].mxu0 %v8149_v10  ;;  %v4450_v10 = vld [vmem:[#allocation2 + $0x60] sm:$0xee]  ;;  %v8157_v6 = vcombine.low %v4502_v46, %v4505_v52 }
 0x3fd   :  { %5579 = vmatpush1.bf16.msra.mxu0 %v9315_v20  ;;  %5582 = vmatprep.mubr.bf16.mxu0 %v8152_v51  ;;  %v8158_v20 = vcombine.high %v4502_v46, %v4505_v52  ;;  %v8115_v27 = vrot.slane %v4450_v10, 9  ;;  %v4530_v5 = vsel %vm10002_vm9, %v8118_v21, %v4529_v61  ;;  %v9350_v52 = vld [vmem:[#allocation6 + $0x394] ss:$8 sps:$4 sm:$0xff]   ;;  %v9354_v46 = vld [vmem:[#allocation6 + $0x3b0] ss:$8 sps:$4 sm:$0xff]  }
 0x3fe   :  { %5580 = vmatprep.subr.bf16.mxu0 %v9320_v11  ;;  %v4512_v11 = vsel %vm10002_vm9, %v4510_v34, %v4511_v63  ;;  %7164 = vmatprep.subr.bf16.mxu1 %v9350_v52  ;;  %v9359_v10 = vld [vmem:[#allocation6 + $0x3c4] ss:$8 sps:$4 sm:$0xff]   ;;  %v9360_v63 = vld [vmem:[#allocation6 + $0x3d0] ss:$8 sps:$4 sm:$0xff]   ;;  %v9363_v34 = vld [vmem:[#allocation6 + $0x3e0] ss:$8 sps:$4 sm:$0xff]  }
 0x3ff   :  { %v4509_v51 = vsel %vm10002_vm9, %v8115_v27, %v4508_v57  ;;  %7165 = vmatpush1.bf16.msra.mxu1 %v9348_v36  ;;  %v9356_v57 = vld [vmem:[#allocation6 + $0x3b4] ss:$8 sps:$4 sm:$0xff]  }
 0x400   :  { %v8160_v55 = vcombine.high %v4509_v51, %v4512_v11  ;;  %v8159_v48 = vcombine.low %v4509_v51, %v4512_v11  ;;  %v9362_v27 = vld [vmem:[#allocation6 + $0x3d4] ss:$8 sps:$4 sm:$0xff]   ;;  %v9365_v11 = vld [vmem:[#allocation6 + $0x3e4] ss:$8 sps:$4 sm:$0xff]  }
 0x401   :  { %5581 = vmatpush1.bf16.msra.mxu0 %v9318_v23  ;;  %v4451_v23 = vld [vmem:[#allocation2 + $0x78] sm:$0xee] }
 0x402   :  { %v8116_v44 = vrot.slane %v4451_v23, 9  ;;  %v9368_v51 = vld [vmem:[#allocation6 + $0x3f4] ss:$8 sps:$4 sm:$0xff]  }
 0x404   :  { %5583 = vmatmul.mubr.bf16.vlgmr.msra.gmra.mrb[32].mxu0 %v8151_v28  ;;  %v4516_v28 = vsel %vm10002_vm9, %v8116_v44, %v4515_v58  ;;  %v9371_v58 = vld [vmem:[#allocation6 + $0x404] ss:$8 sps:$4 sm:$0xff]  }
 0x405   :  { %5592 = vmatprep.mubr.bf16.mxu0 %v8154_v22  ;;  %v8162_v15 = vcombine.high %v4516_v28, %v4519_v18  ;;  %v4452_v22 = vld [vmem:[#allocation2 + $0x90] sm:$0xee]  ;;  %v8161_v56 = vcombine.low %v4516_v28, %v4519_v18 }
 0x406   :  { %v8117_v24 = vrot.slane %v4452_v22, 9 }
 0x408   :  { %v4523_v29 = vsel %vm10002_vm9, %v8117_v24, %v4522_v32 }
 0x409   :  { %v8163_v47 = vcombine.low %v4523_v29, %v4526_v39 }
 0x40c   :  { %5593 = vmatmul.mubr.bf16.gmra.mrb[36].mxu0 %v8153_v4  ;;  %v8164_v4 = vcombine.high %v4523_v29, %v4526_v39 }
 0x40d   :  { %5602 = vmatprep.mubr.bf16.mxu0 %v8156_v14  ;;  %v4533_v14 = vsel %vm10002_vm9, %v4531_v2, %v4532_v7 }
 0x40e   :  { %v8166_v17 = vcombine.high %v4530_v5, %v4533_v14  ;;  %v8165_v1 = vcombine.low %v4530_v5, %v4533_v14 }
 0x414   :  { %5603 = vmatmul.mubr.bf16.gmra.mrb[40].mxu0 %v8155_v19  ;;  %v9353_v19 = vld [vmem:[#allocation6 + $0x3a4] ss:$8 sps:$4 sm:$0xff]  }
 0x415   :  { %5612 = vmatprep.mubr.bf16.mxu0 %v8158_v20  ;;  %7166 = vmatprep.subr.bf16.mxu1 %v9353_v19  ;;  %v9357_v20 = vld [vmem:[#allocation6 + $0x3c0] ss:$8 sps:$4 sm:$0xff]  }
 0x416   :  { %7167 = vmatpush1.bf16.msra.mxu1 %v9351_v31 }
 0x417   :  { %7168 = vmatprep.subr.bf16.mxu1 %v9356_v57 }
 0x41a   :  { %7169 = vmatpush1.bf16.msra.mxu1 %v9354_v46 }
 0x41b   :  { %7170 = vmatprep.subr.bf16.mxu1 %v9359_v10 }
 0x41c   :  { %5613 = vmatmul.mubr.bf16.gmra.mrb[44].mxu0 %v8157_v6  ;;  %v9366_v6 = vld [vmem:[#allocation6 + $0x3f0] ss:$8 sps:$4 sm:$0xff]  }
 0x41d   :  { %5622 = vmatprep.mubr.bf16.mxu0 %v8160_v55  ;;  %v4832_v55 = vld [vmem:[#allocation8 + $0x2] sm:$0x3] }
 0x41e   :  { %7171 = vmatpush1.bf16.msra.mxu1 %v9357_v20  ;;  %v10979_v23 = vrot.slane %v4832_v55, %v10058_v25  ;;  %v10982_v40 = vrot.slane %v4832_v55, %v10060_v30 }
 0x41f   :  { %7172 = vmatprep.subr.bf16.mxu1 %v9362_v27 }
 0x422   :  { %7173 = vmatpush1.bf16.msra.mxu1 %v9360_v63 }
 0x423   :  { %7174 = vmatprep.subr.bf16.mxu1 %v9365_v11 }
 0x424   :  { %5623 = vmatmul.mubr.bf16.gmra.mrb[48].mxu0 %v8159_v48 }
 0x425   :  { %5632 = vmatprep.mubr.bf16.mxu0 %v8162_v15 }
 0x426   :  { %7175 = vmatpush1.bf16.msra.mxu1 %v9363_v34 }
 0x427   :  { %7176 = vmatprep.subr.bf16.mxu1 %v9368_v51 }
 0x42a   :  { %7177 = vmatpush1.bf16.msra.mxu1 %v9366_v6 }
 0x42b   :  { %7259 = vmatprep.subr.bf16.mxu1 %v9371_v58  ;;  %v9500_v58 = vld [vmem:[#allocation2] sm:$0xff] }
 0x42c   :  { %5633 = vmatmul.mubr.bf16.gmra.mrb[52].mxu0 %v8161_v56 }
 0x42d   :  { %5642 = vmatprep.mubr.bf16.mxu0 %v8164_v4 }
 0x434   :  { %5643 = vmatmul.mubr.bf16.gmra.mrb[56].mxu0 %v8163_v47 }
 0x435   :  { %5652 = vmatprep.mubr.bf16.mxu0 %v8166_v17 }
 0x43c   :  { %5653 = vmatmul.mubr.bf16.gmra.mrb[60].mxu0 %v8165_v1 }
 0x4d7   :  { %v5584_v44 = vpop.f32.mrb[32].mxu0 }
 0x4d8   :  { %v8559_v43 = vadd.f32 %v5584_v44, %v10979_v23  ;;  %v5586_v18 = vpop.f32.mrb[33].mxu0 }
 0x4d9   :  { %v8560_v48 = vadd.f32 %v5586_v18, %v10982_v40  ;;  %v5588_v28 = vpop.f32.mrb[34].mxu0 }
 0x4da   :  { %vm5663_vm4 = vcmp.gt.f32.partialorder %v8559_v43, 0.0  ;;  %v5695_v32 = vmul.f32 0.01, %v8559_v43  ;;  %v8561_v15 = vadd.f32 %v5588_v28, %v10979_v23  ;;  %v5590_v22 = vpop.f32.mrb[35].mxu0 }
 0x4db   :  { %vm5664_vm7 = vcmp.gt.f32.partialorder %v8560_v48, 0.0  ;;  %v5696_v3 = vmul.f32 0.01, %v8560_v48  ;;  %v8562_v24 = vadd.f32 %v5590_v22, %v10982_v40 }
 0x4dc   :  { %v5727_v41 = vsel %vm5663_vm4, %v8559_v43, %v5695_v32  ;;  %vm5665_vm8 = vcmp.gt.f32.partialorder %v8561_v15, 0.0  ;;  %v5697_v39 = vmul.f32 0.01, %v8561_v15 }
 0x4dd   :  { %v5728_v56 = vsel %vm5664_vm7, %v8560_v48, %v5696_v3  ;;  %vm5666_vm10 = vcmp.gt.f32.partialorder %v8562_v24, 0.0  ;;  %v5698_v29 = vmul.f32 0.01, %v8562_v24  ;;  %v6002_v48 = vld [vmem:[#allocation2 + $0x10] sm:$0x11] }
 0x4de   :  { %v8479_v61 = vpack.c.bf16 %v5728_v56, %v5727_v41  ;;  %v5729_v4 = vsel %vm5665_vm8, %v8561_v15, %v5697_v39 }
 0x4df   :  { %v5730_v49 = vsel %vm5666_vm10, %v8562_v24, %v5698_v29  ;;  %v5594_v7 = vpop.f32.mrb[36].mxu0 }
 0x4e0   :  { %v5840_v21 = vshrl.u32 %v8479_v61, 16  ;;  %v8480_v2 = vpack.c.bf16 %v5730_v49, %v5729_v4  ;;  %v8563_v14 = vadd.f32 %v5594_v7, %v10979_v23  ;;  %v5596_v47 = vpop.f32.mrb[37].mxu0  ;;  %v5843_v5 = vshll.u32 %v8479_v61, 16 }
 0x4e1   :  { %v8564_v17 = vadd.f32 %v5596_v47, %v10982_v40  ;;  %v5598_v1 = vpop.f32.mrb[38].mxu0 }
 0x4e2   :  { %v5842_v36 = vrot.slane %v5840_v21, 7  ;;  %v5848_v52 = vshrl.u32 %v8480_v2, 16  ;;  %v5851_v19 = vshll.u32 %v8480_v2, 16  ;;  %vm5667_vm11 = vcmp.gt.f32.partialorder %v8563_v14, 0.0  ;;  %v5600_v31 = vpop.f32.mrb[39].mxu0 }
 0x4e3   :  { %v5699_v46 = vmul.f32 0.01, %v8563_v14  ;;  %vm5668_vm12 = vcmp.gt.f32.partialorder %v8564_v17, 0.0  ;;  %v5700_v57 = vmul.f32 0.01, %v8564_v17  ;;  %v8565_v20 = vadd.f32 %v5598_v1, %v10979_v23 }
 0x4e4   :  { %v5845_v10 = vor.u32 %v5843_v5, %v5842_v36  ;;  %v5846_v63 = vrot.slane %v5842_v36, 4  ;;  %v5850_v27 = vrot.slane %v5848_v52, 7  ;;  %v8566_v34 = vadd.f32 %v5600_v31, %v10982_v40  ;;  %v6005_v52 = vld [vmem:[#allocation2 + $0x18] sm:$0xff] }
 0x4e5   :  { %v5731_v11 = vsel %vm5667_vm11, %v8563_v14, %v5699_v46  ;;  %v5732_v6 = vsel %vm5668_vm12, %v8564_v17, %v5700_v57  ;;  %vm5669_vm13 = vcmp.gt.f32.partialorder %v8565_v20, 0.0  ;;  %v5701_v51 = vmul.f32 0.01, %v8565_v20 }
 0x4e6   :  { %v10994_v55 = vsel %vm9693_vm15, %v5845_v10, %v9500_v58  ;;  %v5853_v44 = vor.u32 %v5851_v19, %v5850_v27  ;;  %v5855_v43 = vrot.slane %v5850_v27, 4  ;;  %v8481_v18 = vpack.c.bf16 %v5732_v6, %v5731_v11  ;;  %v9369_v27 = vld [vmem:[#allocation6 + $0x400] ss:$8 sps:$4 sm:$0xff]   ;;  %v9374_v58 = vld [vmem:[#allocation6 + $0x414] ss:$8 sps:$4 sm:$0xff]  }
 0x4e7   :  { %6000 = vst [vmem:[#allocation2] sm:$0xff] %v10994_v55  ;;  %v5733_v28 = vsel %vm5669_vm13, %v8565_v20, %v5701_v51  ;;  %vm5670_vm1 = vcmp.gt.f32.partialorder %v8566_v34, 0.0  ;;  %v5702_v32 = vmul.f32 0.01, %v8566_v34  ;;  %v5604_v15 = vpop.f32.mrb[40].mxu0 }
 0x4e8   :  { %v10999_v22 = vsel %vm9683_vm14, %v5846_v63, %v5853_v44  ;;  %v6003_v3 = vsel %vm9670_vm6, %v5855_v43, %v6002_v48  ;;  %v5857_v24 = vshrl.u32 %v8481_v18, 16  ;;  %v5606_v41 = vpop.f32.mrb[41].mxu0  ;;  %v5860_v39 = vshll.u32 %v8481_v18, 16 }
 0x4e9   :  { %6001 = vst [vmem:[#allocation2 + $0x8] sm:$0xff] %v10999_v22  ;;  %6004 = vst [vmem:[#allocation2 + $0x10] sm:$0x11] %v6003_v3  ;;  %v5734_v56 = vsel %vm5670_vm1, %v8566_v34, %v5702_v32  ;;  %v8567_v29 = vadd.f32 %v5604_v15, %v10979_v23  ;;  %v8568_v61 = vadd.f32 %v5606_v41, %v10982_v40  ;;  %v5608_v4 = vpop.f32.mrb[42].mxu0  ;;  %v6009_v32 = vld [vmem:[#allocation2 + $0x28] sm:$0x11] }
 0x4ea   :  { %v5859_v49 = vrot.slane %v5857_v24, 7  ;;  %v8482_v7 = vpack.c.bf16 %v5734_v56, %v5733_v28  ;;  %v8569_v21 = vadd.f32 %v5608_v4, %v10979_v23  ;;  %v5610_v2 = vpop.f32.mrb[43].mxu0  ;;  %v8288_v14 = vcombine.high %v10994_v55, %v10999_v22 }
 0x4eb   :  { %vm5671_vm0 = vcmp.gt.f32.partialorder %v8567_v29, 0.0  ;;  %v5703_v47 = vmul.f32 0.01, %v8567_v29  ;;  %vm5672_vm2 = vcmp.gt.f32.partialorder %v8568_v61, 0.0  ;;  %v5704_v5 = vmul.f32 0.01, %v8568_v61 }
 0x4ec   :  { %v5862_v17 = vor.u32 %v5860_v39, %v5859_v49  ;;  %v5865_v1 = vshrl.u32 %v8482_v7, 16  ;;  %v5868_v36 = vshll.u32 %v8482_v7, 16  ;;  %7178 = vmatprep.mubr.bf16.mxu1 %v8288_v14  ;;  %vm5673_vm3 = vcmp.gt.f32.partialorder %v8569_v21, 0.0 }
 0x4ed   :  { %v5735_v19 = vsel %vm5671_vm0, %v8567_v29, %v5703_v47  ;;  %v5736_v31 = vsel %vm5672_vm2, %v8568_v61, %v5704_v5  ;;  %v5705_v46 = vmul.f32 0.01, %v8569_v21  ;;  %v8570_v63 = vadd.f32 %v5610_v2, %v10982_v40  ;;  %v9377_v2 = vld [vmem:[#allocation6 + $0x424] ss:$8 sps:$4 sm:$0xff]  }
 0x4ee   :  { %v11011_v57 = vsel %vm9693_vm15, %v5862_v17, %v6005_v52  ;;  %v5867_v20 = vrot.slane %v5865_v1, 7  ;;  %v8483_v10 = vpack.c.bf16 %v5736_v31, %v5735_v19  ;;  %v5863_v34 = vrot.slane %v5859_v49, 4  ;;  %v9372_v49 = vld [vmem:[#allocation6 + $0x410] ss:$8 sps:$4 sm:$0xff]  }
 0x4ef   :  { %6007 = vst [vmem:[#allocation2 + $0x18] sm:$0xff] %v11011_v57  ;;  %v5737_v11 = vsel %vm5673_vm3, %v8569_v21, %v5705_v46  ;;  %v5614_v6 = vpop.f32.mrb[44].mxu0  ;;  %v8287_v51 = vcombine.low %v10994_v55, %v10999_v22  ;;  %vm5674_vm4 = vcmp.gt.f32.partialorder %v8570_v63, 0.0  ;;  %v5706_v15 = vmul.f32 0.01, %v8570_v63  ;;  %v6012_v1 = vld [vmem:[#allocation2 + $0x30] sm:$0xff] }
 0x4f0   :  { %v5870_v44 = vor.u32 %v5868_v36, %v5867_v20  ;;  %v5872_v43 = vrot.slane %v5867_v20, 4  ;;  %v5874_v18 = vshrl.u32 %v8483_v10, 16  ;;  %v5877_v48 = vshll.u32 %v8483_v10, 16  ;;  %v5616_v28 = vpop.f32.mrb[45].mxu0 }
 0x4f1   :  { %v8571_v3 = vadd.f32 %v5614_v6, %v10979_v23  ;;  %v8572_v24 = vadd.f32 %v5616_v28, %v10982_v40  ;;  %v5618_v41 = vpop.f32.mrb[46].mxu0  ;;  %7179 = vmatmul.mubr.bf16.vlgmr.msra.gmra.mrb[32].mxu1 %v8287_v51  ;;  %v5738_v7 = vsel %vm5674_vm4, %v8570_v63, %v5706_v15  ;;  %v9375_v63 = vld [vmem:[#allocation6 + $0x420] ss:$8 sps:$4 sm:$0xff]   ;;  %v9380_v51 = vld [vmem:[#allocation6 + $0x434] ss:$8 sps:$4 sm:$0xff]  }
 0x4f2   :  { %v11021_v39 = vsel %vm9683_vm14, %v5863_v34, %v5870_v44  ;;  %v6010_v56 = vsel %vm9670_vm6, %v5872_v43, %v6009_v32  ;;  %v11025_v29 = vrot.slane %v5874_v18, 7  ;;  %v8573_v61 = vadd.f32 %v5618_v41, %v10979_v23  ;;  %v5620_v4 = vpop.f32.mrb[47].mxu0  ;;  %7260 = vmatpush1.bf16.msra.mxu1 %v9369_v27  ;;  %v6016_v28 = vld [vmem:[#allocation2 + $0x40] sm:$0x11] }
 0x4f3   :  { %6008 = vst [vmem:[#allocation2 + $0x20] sm:$0xff] %v11021_v39  ;;  %6011 = vst [vmem:[#allocation2 + $0x28] sm:$0x11] %v6010_v56  ;;  %vm5675_vm7 = vcmp.gt.f32.partialorder %v8571_v3, 0.0  ;;  %v5707_v21 = vmul.f32 0.01, %v8571_v3  ;;  %7261 = vmatprep.subr.bf16.mxu1 %v9374_v58  ;;  %v8484_v5 = vpack.c.bf16 %v5738_v7, %v5737_v11  ;;  %v8574_v19 = vadd.f32 %v5620_v4, %v10982_v40 }
 0x4f4   :  { %vm5676_vm8 = vcmp.gt.f32.partialorder %v8572_v24, 0.0  ;;  %v5879_v14 = vor.u32 %v5877_v48, %v11025_v29  ;;  %v5880_v47 = vrot.slane %v11025_v29, 4  ;;  %v5708_v17 = vmul.f32 0.01, %v8572_v24  ;;  %v9378_v56 = vld [vmem:[#allocation6 + $0x430] ss:$8 sps:$4 sm:$0xff]  }
 0x4f5   :  { %v5739_v36 = vsel %vm5675_vm7, %v8571_v3, %v5707_v21  ;;  %vm5677_vm10 = vcmp.gt.f32.partialorder %v8573_v61, 0.0  ;;  %v5709_v52 = vmul.f32 0.01, %v8573_v61  ;;  %v5882_v46 = vshrl.u32 %v8484_v5, 16  ;;  %v9383_v7 = vld [vmem:[#allocation6 + $0x444] ss:$8 sps:$4 sm:$0xff]  }
 0x4f6   :  { %v11034_v31 = vsel %vm9693_vm15, %v5879_v14, %v6012_v1  ;;  %v5885_v20 = vshll.u32 %v8484_v5, 16  ;;  %v5740_v10 = vsel %vm5676_vm8, %v8572_v24, %v5708_v17  ;;  %7262 = vmatpush1.bf16.msra.mxu1 %v9372_v49  ;;  %vm5678_vm11 = vcmp.gt.f32.partialorder %v8574_v19, 0.0 }
 0x4f7   :  { %6014 = vst [vmem:[#allocation2 + $0x30] sm:$0xff] %v11034_v31  ;;  %v8485_v27 = vpack.c.bf16 %v5740_v10, %v5739_v36  ;;  %v5741_v34 = vsel %vm5677_vm10, %v8573_v61, %v5709_v52  ;;  %v5710_v11 = vmul.f32 0.01, %v8574_v19  ;;  %v5624_v6 = vpop.f32.mrb[48].mxu0  ;;  %7263 = vmatprep.subr.bf16.mxu1 %v9377_v2  ;;  %v5884_v58 = vrot.slane %v5882_v46, 7 }
 0x4f8   :  { %v8575_v44 = vadd.f32 %v5624_v6, %v10979_v23  ;;  %v5626_v43 = vpop.f32.mrb[49].mxu0  ;;  %v8290_v18 = vcombine.high %v11011_v57, %v11021_v39  ;;  %v8289_v48 = vcombine.low %v11011_v57, %v11021_v39 }
 0x4f9   :  { %v5891_v32 = vshrl.u32 %v8485_v27, 16  ;;  %v5894_v15 = vshll.u32 %v8485_v27, 16  ;;  %v5742_v3 = vsel %vm5678_vm11, %v8574_v19, %v5710_v11  ;;  %v8576_v24 = vadd.f32 %v5626_v43, %v10982_v40  ;;  %v5628_v41 = vpop.f32.mrb[50].mxu0 }
 0x4fa   :  { %v5887_v29 = vor.u32 %v5885_v20, %v5884_v58  ;;  %v5889_v61 = vrot.slane %v5884_v58, 4  ;;  %v8486_v4 = vpack.c.bf16 %v5742_v3, %v5741_v34  ;;  %vm5679_vm12 = vcmp.gt.f32.partialorder %v8575_v44, 0.0  ;;  %v5630_v49 = vpop.f32.mrb[51].mxu0  ;;  %7188 = vmatprep.mubr.bf16.mxu1 %v8290_v18  ;;  %7264 = vmatpush1.bf16.msra.mxu1 %v9375_v63  ;;  %v6019_v20 = vld [vmem:[#allocation2 + $0x48] sm:$0xff] }
 0x4fb   :  { %v5893_v21 = vrot.slane %v5891_v32, 7  ;;  %v5711_v2 = vmul.f32 0.01, %v8575_v44  ;;  %vm5680_vm13 = vcmp.gt.f32.partialorder %v8576_v24, 0.0  ;;  %v5712_v14 = vmul.f32 0.01, %v8576_v24  ;;  %7189 = vmatmul.mubr.bf16.gmra.mrb[36].mxu1 %v8289_v48  ;;  %7265 = vmatprep.subr.bf16.mxu1 %v9380_v51 }
 0x4fc   :  { %v11045_v5 = vsel %vm9683_vm14, %v5880_v47, %v5887_v29  ;;  %v6017_v17 = vsel %vm9670_vm6, %v5889_v61, %v6016_v28  ;;  %v5899_v1 = vshrl.u32 %v8486_v4, 16  ;;  %v5902_v52 = vshll.u32 %v8486_v4, 16  ;;  %v9381_v34 = vld [vmem:[#allocation6 + $0x440] ss:$8 sps:$4 sm:$0xff]   ;;  %v6023_v48 = vld [vmem:[#allocation2 + $0x58] sm:$0x11] }
 0x4fd   :  { %6015 = vst [vmem:[#allocation2 + $0x38] sm:$0xff] %v11045_v5  ;;  %6018 = vst [vmem:[#allocation2 + $0x40] sm:$0x11] %v6017_v17  ;;  %v5896_v36 = vor.u32 %v5894_v15, %v5893_v21  ;;  %v5743_v19 = vsel %vm5679_vm12, %v8575_v44, %v5711_v2  ;;  %v5744_v46 = vsel %vm5680_vm13, %v8576_v24, %v5712_v14  ;;  %v5897_v11 = vrot.slane %v5893_v21, 4  ;;  %v9386_v44 = vld [vmem:[#allocation6 + $0x454] ss:$8 sps:$4 sm:$0xff]  }
 0x4fe   :  { %v5901_v10 = vrot.slane %v5899_v1, 7  ;;  %v8487_v63 = vpack.c.bf16 %v5744_v46, %v5743_v19  ;;  %v8577_v27 = vadd.f32 %v5628_v41, %v10979_v23  ;;  %v8578_v47 = vadd.f32 %v5630_v49, %v10982_v40  ;;  %7266 = vmatpush1.bf16.msra.mxu1 %v9378_v56  ;;  %v9384_v49 = vld [vmem:[#allocation6 + $0x450] ss:$8 sps:$4 sm:$0xff]   ;;  %v9389_v1 = vld [vmem:[#allocation6 + $0x464] ss:$8 sps:$4 sm:$0xff]  }
 0x4ff   :  { %v11055_v6 = vsel %vm9693_vm15, %v5896_v36, %v6019_v20  ;;  %v5634_v51 = vpop.f32.mrb[52].mxu0  ;;  %v8292_v58 = vcombine.high %v11034_v31, %v11045_v5  ;;  %7267 = vmatprep.subr.bf16.mxu1 %v9383_v7 }
 0x500   :  { %6021 = vst [vmem:[#allocation2 + $0x48] sm:$0xff] %v11055_v6  ;;  %v5904_v43 = vor.u32 %v5902_v52, %v5901_v10  ;;  %v5906_v18 = vrot.slane %v5901_v10, 4  ;;  %v5908_v28 = vshrl.u32 %v8487_v63, 16  ;;  %v5911_v32 = vshll.u32 %v8487_v63, 16  ;;  %v5636_v15 = vpop.f32.mrb[53].mxu0  ;;  %v6026_v52 = vld [vmem:[#allocation2 + $0x60] sm:$0xff] }
 0x501   :  { %vm5681_vm1 = vcmp.gt.f32.partialorder %v8577_v27, 0.0  ;;  %v5713_v3 = vmul.f32 0.01, %v8577_v27  ;;  %vm5682_vm0 = vcmp.gt.f32.partialorder %v8578_v47, 0.0  ;;  %v5714_v24 = vmul.f32 0.01, %v8578_v47  ;;  %7198 = vmatprep.mubr.bf16.mxu1 %v8292_v58 }
 0x502   :  { %v11062_v41 = vsel %vm9683_vm14, %v5897_v11, %v5904_v43  ;;  %v6024_v56 = vsel %vm9670_vm6, %v5906_v18, %v6023_v48  ;;  %v5910_v29 = vrot.slane %v5908_v28, 7  ;;  %v8579_v61 = vadd.f32 %v5634_v51, %v10979_v23  ;;  %v5638_v4 = vpop.f32.mrb[54].mxu0  ;;  %7268 = vmatpush1.bf16.msra.mxu1 %v9381_v34  ;;  %v9387_v34 = vld [vmem:[#allocation6 + $0x460] ss:$8 sps:$4 sm:$0xff]   ;;  %v9392_v18 = vld [vmem:[#allocation6 + $0x474] ss:$8 sps:$4 sm:$0xff]  }
 0x503   :  { %6025 = vst [vmem:[#allocation2 + $0x58] sm:$0x11] %v6024_v56  ;;  %v5745_v7 = vsel %vm5681_vm1, %v8577_v27, %v5713_v3  ;;  %v5746_v21 = vsel %vm5682_vm0, %v8578_v47, %v5714_v24  ;;  %v8580_v2 = vadd.f32 %v5636_v15, %v10982_v40  ;;  %v8581_v14 = vadd.f32 %v5638_v4, %v10979_v23  ;;  %v5640_v17 = vpop.f32.mrb[55].mxu0  ;;  %v6030_v24 = vld [vmem:[#allocation2 + $0x70] sm:$0x11] }
 0x504   :  { %7269 = vmatprep.subr.bf16.mxu1 %v9386_v44  ;;  %v5913_v36 = vor.u32 %v5911_v32, %v5910_v29  ;;  %v8488_v19 = vpack.c.bf16 %v5746_v21, %v5745_v7  ;;  %vm5683_vm2 = vcmp.gt.f32.partialorder %v8579_v61, 0.0  ;;  %v5914_v46 = vrot.slane %v5910_v29, 4 }
 0x505   :  { %v5715_v20 = vmul.f32 0.01, %v8579_v61  ;;  %vm5684_vm3 = vcmp.gt.f32.partialorder %v8580_v2, 0.0  ;;  %v5716_v10 = vmul.f32 0.01, %v8580_v2  ;;  %vm5685_vm4 = vcmp.gt.f32.partialorder %v8581_v14, 0.0 }
 0x506   :  { %v11071_v63 = vsel %vm9693_vm15, %v5913_v36, %v6026_v52  ;;  %v5916_v27 = vshrl.u32 %v8488_v19, 16  ;;  %v5717_v47 = vmul.f32 0.01, %v8581_v14  ;;  %7270 = vmatpush1.bf16.msra.mxu1 %v9384_v49  ;;  %v8582_v58 = vadd.f32 %v5640_v17, %v10982_v40 }
 0x507   :  { %6028 = vst [vmem:[#allocation2 + $0x60] sm:$0xff] %v11071_v63  ;;  %v5747_v11 = vsel %vm5683_vm2, %v8579_v61, %v5715_v20  ;;  %v5748_v51 = vsel %vm5684_vm3, %v8580_v2, %v5716_v10  ;;  %v8291_v44 = vcombine.low %v11034_v31, %v11045_v5  ;;  %v5644_v43 = vpop.f32.mrb[56].mxu0  ;;  %7271 = vmatprep.subr.bf16.mxu1 %v9389_v1  ;;  %v5919_v28 = vshll.u32 %v8488_v19, 16  ;;  %v9390_v1 = vld [vmem:[#allocation6 + $0x470] ss:$8 sps:$4 sm:$0xff]  }
 0x508   :  { %v5918_v48 = vrot.slane %v5916_v27, 7  ;;  %v8489_v32 = vpack.c.bf16 %v5748_v51, %v5747_v11  ;;  %v8583_v15 = vadd.f32 %v5644_v43, %v10979_v23  ;;  %v5646_v3 = vpop.f32.mrb[57].mxu0  ;;  %v5749_v56 = vsel %vm5685_vm4, %v8581_v14, %v5717_v47  ;;  %v9395_v19 = vld [vmem:[#allocation6 + $0x484] ss:$8 sps:$4 sm:$0xff]  }
 0x509   :  { %vm5686_vm7 = vcmp.gt.f32.partialorder %v8582_v58, 0.0  ;;  %v5718_v29 = vmul.f32 0.01, %v8582_v58  ;;  %7199 = vmatmul.mubr.bf16.gmra.mrb[40].mxu1 %v8291_v44  ;;  %v8584_v61 = vadd.f32 %v5646_v3, %v10982_v40  ;;  %v5648_v4 = vpop.f32.mrb[58].mxu0  ;;  %v6151_v12 = vshrl.u32 %v11055_v6, 16 }
 0x50a   :  { %v5921_v49 = vor.u32 %v5919_v28, %v5918_v48  ;;  %v5923_v7 = vrot.slane %v5918_v48, 4  ;;  %v5925_v21 = vshrl.u32 %v8489_v32, 16  ;;  %v5928_v2 = vshll.u32 %v8489_v32, 16  ;;  %v5650_v17 = vpop.f32.mrb[59].mxu0  ;;  %7272 = vmatpush1.bf16.msra.mxu1 %v9387_v34  ;;  %v6033_v48 = vld [vmem:[#allocation2 + $0x78] sm:$0xff] }
 0x50b   :  { %v5750_v36 = vsel %vm5686_vm7, %v8582_v58, %v5718_v29  ;;  %vm5687_vm8 = vcmp.gt.f32.partialorder %v8583_v15, 0.0  ;;  %v5719_v52 = vmul.f32 0.01, %v8583_v15  ;;  %vm5688_vm10 = vcmp.gt.f32.partialorder %v8584_v61, 0.0  ;;  %7273 = vmatprep.subr.bf16.mxu1 %v9392_v18  ;;  %v9393_v18 = vld [vmem:[#allocation6 + $0x480] ss:$8 sps:$4 sm:$0xff]  }
 0x50c   :  { %v11082_v14 = vsel %vm9683_vm14, %v5914_v46, %v5921_v49  ;;  %v6031_v20 = vsel %vm9670_vm6, %v5923_v7, %v6030_v24  ;;  %v5927_v10 = vrot.slane %v5925_v21, 7  ;;  %v8490_v27 = vpack.c.bf16 %v5750_v36, %v5749_v56 }
 0x50d   :  { %6032 = vst [vmem:[#allocation2 + $0x70] sm:$0x11] %v6031_v20  ;;  %v5751_v47 = vsel %vm5687_vm8, %v8583_v15, %v5719_v52  ;;  %v5720_v11 = vmul.f32 0.01, %v8584_v61  ;;  %v8585_v34 = vadd.f32 %v5648_v4, %v10979_v23  ;;  %v8586_v51 = vadd.f32 %v5650_v17, %v10982_v40  ;;  %v9398_v4 = vld [vmem:[#allocation6 + $0x494] ss:$8 sps:$4 sm:$0xff]  }
 0x50e   :  { %v5930_v58 = vor.u32 %v5928_v2, %v5927_v10  ;;  %v5933_v44 = vshrl.u32 %v8490_v27, 16  ;;  %v5936_v43 = vshll.u32 %v8490_v27, 16  ;;  %7274 = vmatpush1.bf16.msra.mxu1 %v9390_v1  ;;  %v5931_v49 = vrot.slane %v5927_v10, 4  ;;  %v9396_v20 = vld [vmem:[#allocation6 + $0x490] ss:$8 sps:$4 sm:$0xff]  }
 0x50f   :  { %v5752_v46 = vsel %vm5688_vm10, %v8584_v61, %v5720_v11  ;;  %vm5689_vm11 = vcmp.gt.f32.partialorder %v8585_v34, 0.0  ;;  %v5721_v28 = vmul.f32 0.01, %v8585_v34  ;;  %vm5690_vm12 = vcmp.gt.f32.partialorder %v8586_v51, 0.0  ;;  %v5654_v32 = vpop.f32.mrb[60].mxu0  ;;  %7275 = vmatprep.subr.bf16.mxu1 %v9395_v19 }
 0x510   :  { %v11091_v15 = vsel %vm9693_vm15, %v5930_v58, %v6033_v48  ;;  %v5935_v3 = vrot.slane %v5933_v44, 7  ;;  %v8491_v24 = vpack.c.bf16 %v5752_v46, %v5751_v47  ;;  %v5722_v56 = vmul.f32 0.01, %v8586_v51  ;;  %v5656_v29 = vpop.f32.mrb[61].mxu0  ;;  %v6037_v27 = vld [vmem:[#allocation2 + $0x88] sm:$0x11] }
 0x511   :  { %6035 = vst [vmem:[#allocation2 + $0x78] sm:$0xff] %v11091_v15  ;;  %v5753_v7 = vsel %vm5689_vm11, %v8585_v34, %v5721_v28  ;;  %v8294_v61 = vcombine.high %v11055_v6, %v11062_v41  ;;  %v8293_v21 = vcombine.low %v11055_v6, %v11062_v41  ;;  %v5658_v2 = vpop.f32.mrb[62].mxu0  ;;  %v8587_v47 = vadd.f32 %v5654_v32, %v10979_v23  ;;  %v9401_v58 = vld [vmem:[#allocation6 + $0x4a4] ss:$8 sps:$4 sm:$0xff]  }
 0x512   :  { %v5938_v17 = vor.u32 %v5936_v43, %v5935_v3  ;;  %v5940_v1 = vrot.slane %v5935_v3, 4  ;;  %v5942_v36 = vshrl.u32 %v8491_v24, 16  ;;  %v5945_v52 = vshll.u32 %v8491_v24, 16  ;;  %v5660_v19 = vpop.f32.mrb[63].mxu0  ;;  %7276 = vmatpush1.bf16.msra.mxu1 %v9393_v18  ;;  %v9399_v3 = vld [vmem:[#allocation6 + $0x4a0] ss:$8 sps:$4 sm:$0xff]  }
 0x513   :  { %v5754_v10 = vsel %vm5690_vm12, %v8586_v51, %v5722_v56  ;;  %7208 = vmatprep.mubr.bf16.mxu1 %v8294_v61  ;;  %v8588_v11 = vadd.f32 %v5656_v29, %v10982_v40  ;;  %v8589_v34 = vadd.f32 %v5658_v2, %v10979_v23  ;;  %7277 = vmatprep.subr.bf16.mxu1 %v9398_v4  ;;  %vm5691_vm13 = vcmp.gt.f32.partialorder %v8587_v47, 0.0  ;;  %v6040_v24 = vld [vmem:[#allocation2 + $0x90] sm:$0xff] }
 0x514   :  { %v11104_v44 = vsel %vm9683_vm14, %v5931_v49, %v5938_v17  ;;  %v6038_v43 = vsel %vm9670_vm6, %v5940_v1, %v6037_v27  ;;  %v5944_v18 = vrot.slane %v5942_v36, 7  ;;  %v8492_v48 = vpack.c.bf16 %v5754_v10, %v5753_v7  ;;  %7209 = vmatmul.mubr.bf16.gmra.mrb[44].mxu1 %v8293_v21  ;;  %v9404_v61 = vld [vmem:[#allocation6 + $0x4b4] ss:$8 sps:$4 sm:$0xff]   ;;  %v6044_v1 = vld [vmem:[#allocation2 + $0xa0] sm:$0x11] }
 0x515   :  { %6039 = vst [vmem:[#allocation2 + $0x88] sm:$0x11] %v6038_v43  ;;  %v5723_v51 = vmul.f32 0.01, %v8587_v47  ;;  %vm5692_vm1 = vcmp.gt.f32.partialorder %v8588_v11, 0.0  ;;  %vm5693_vm0 = vcmp.gt.f32.partialorder %v8589_v34, 0.0  ;;  %v8590_v2 = vadd.f32 %v5660_v19, %v10982_v40 }
 0x516   :  { %v5724_v46 = vmul.f32 0.01, %v8588_v11  ;;  %v5947_v28 = vor.u32 %v5945_v52, %v5944_v18  ;;  %v5950_v32 = vshrl.u32 %v8492_v48, 16  ;;  %v5953_v23 = vshll.u32 %v8492_v48, 16  ;;  %7278 = vmatpush1.bf16.msra.mxu1 %v9396_v20  ;;  %v9407_v19 = vld [vmem:[#allocation6 + $0x4c4] ss:$8 sps:$4 sm:$0xff]  }
 0x517   :  { %v5755_v56 = vsel %vm5691_vm13, %v8587_v47, %v5723_v51  ;;  %v5725_v49 = vmul.f32 0.01, %v8589_v34  ;;  %7279 = vmatprep.subr.bf16.mxu1 %v9401_v58  ;;  %v6079_v17 = vshrl.u32 %v10994_v55, 16  ;;  %v8296_v36 = vcombine.high %v11071_v63, %v11082_v14  ;;  %v9402_v47 = vld [vmem:[#allocation6 + $0x4b0] ss:$8 sps:$4 sm:$0xff]  }
 0x518   :  { %v5756_v29 = vsel %vm5692_vm1, %v8588_v11, %v5724_v46  ;;  %v11110_v4 = vsel %vm9693_vm15, %v5947_v28, %v6040_v24  ;;  %v5952_v7 = vrot.slane %v5950_v32, 7  ;;  %v5948_v52 = vrot.slane %v5944_v18, 4 }
 0x519   :  { %v8493_v21 = vpack.c.bf16 %v5756_v29, %v5755_v56  ;;  %6042 = vst [vmem:[#allocation2 + $0x90] sm:$0xff] %v11110_v4  ;;  %v5757_v11 = vsel %vm5693_vm0, %v8589_v34, %v5725_v49  ;;  %vm5694_vm2 = vcmp.gt.f32.partialorder %v8590_v2, 0.0  ;;  %v5726_v58 = vmul.f32 0.01, %v8590_v2  ;;  %7218 = vmatprep.mubr.bf16.mxu1 %v8296_v36  ;;  %v9405_v56 = vld [vmem:[#allocation6 + $0x4c0] ss:$8 sps:$4 sm:$0xff]  }
 0x51a   :  { %v5955_v20 = vor.u32 %v5953_v23, %v5952_v7  ;;  %v5957_v27 = vrot.slane %v5952_v7, 4  ;;  %7280 = vmatpush1.bf16.msra.mxu1 %v9399_v3  ;;  %v8295_v40 = vcombine.low %v11071_v63, %v11082_v14  ;;  %v6082_v46 = vshll.u32 %v10994_v55, 16  ;;  %v6047_v49 = vld [vmem:[#allocation2 + $0xa8] sm:$0xff]  ;;  %v9410_v7 = vld [vmem:[#allocation6 + $0x4d4] ss:$8 sps:$4 sm:$0xff]  }
 0x51b   :  { %v5959_v10 = vshrl.u32 %v8493_v21, 16  ;;  %7281 = vmatprep.subr.bf16.mxu1 %v9404_v61  ;;  %v5962_v51 = vshll.u32 %v8493_v21, 16  ;;  %v5758_v34 = vsel %vm5694_vm2, %v8590_v2, %v5726_v58  ;;  %v8298_v28 = vcombine.high %v11091_v15, %v11104_v44  ;;  %v9413_v58 = vld [vmem:[#allocation6 + $0x4e4] ss:$8 sps:$4 sm:$0xff]  }
 0x51c   :  { %v11122_v43 = vsel %vm9683_vm14, %v5948_v52, %v5955_v20  ;;  %v6045_v18 = vsel %vm9670_vm6, %v5957_v27, %v6044_v1  ;;  %7219 = vmatmul.mubr.bf16.gmra.mrb[48].mxu1 %v8295_v40  ;;  %v8297_v32 = vcombine.low %v11091_v15, %v11104_v44  ;;  %v6103_v23 = vshrl.u32 %v11011_v57, 16 }
 0x51d   :  { %v5961_v48 = vrot.slane %v5959_v10, 7  ;;  %6046 = vst [vmem:[#allocation2 + $0xa0] sm:$0x11] %v6045_v18  ;;  %v8494_v24 = vpack.c.bf16 %v5758_v34, %v5757_v11  ;;  %v6106_v29 = vshll.u32 %v11011_v57, 16  ;;  %7228 = vmatprep.mubr.bf16.mxu1 %v8298_v28  ;;  %v8300_v55 = vcombine.high %v11110_v4, %v11122_v43  ;;  %v9408_v57 = vld [vmem:[#allocation6 + $0x4d0] ss:$8 sps:$4 sm:$0xff]  }
 0x51e   :  { %7282 = vmatpush1.bf16.msra.mxu1 %v9402_v47  ;;  %v8299_v61 = vcombine.low %v11110_v4, %v11122_v43  ;;  %v6088_v1 = vshll.u32 %v10999_v22, 16  ;;  %v6081_v36 = vrot.slane %v6079_v17, 4  ;;  %v6084_v52 = vrot.slane %v6082_v46, 5  ;;  %v11145_v11 = vld [vmem:[#allocation2 + $0x10] sm:$0x11] }
 0x51f   :  { %v5964_v3 = vor.u32 %v5962_v51, %v5961_v48  ;;  %7283 = vmatprep.subr.bf16.mxu1 %v9407_v19  ;;  %v5967_v2 = vshrl.u32 %v8494_v24, 16  ;;  %v6092_v20 = vshrl.u32 %v10999_v22, 16  ;;  %v6127_v27 = vshrl.u32 %v11034_v31, 16  ;;  %v11148_v28 = vld [vmem:[#allocation2 + $0x28] sm:$0x11] }
 0x520   :  { %v5970_v47 = vshll.u32 %v8494_v24, 16  ;;  %v6105_v38 = vrot.slane %v6103_v23, 4  ;;  %v6090_v40 = vrot.slane %v6088_v1, 5  ;;  %v6108_v18 = vrot.slane %v6106_v29, 5  ;;  %v6051_v24 = vld [vmem:[#allocation2 + $0xb8] sm:$0x11] }
 0x521   :  { %v11139_v21 = vsel %vm9693_vm15, %v5964_v3, %v6047_v49  ;;  %v5969_v10 = vrot.slane %v5967_v2, 7  ;;  %v6094_v19 = vrot.slane %v6092_v20, 4  ;;  %v6112_v51 = vshll.u32 %v11021_v39, 16 }
 0x522   :  { %6049 = vst [vmem:[#allocation2 + $0xa8] sm:$0xff] %v11139_v21  ;;  %7284 = vmatpush1.bf16.msra.mxu1 %v9405_v56  ;;  %v5965_v34 = vrot.slane %v5961_v48, 4  ;;  %v6116_v22 = vshrl.u32 %v11021_v39, 16  ;;  %v6130_v3 = vshll.u32 %v11034_v31, 16  ;;  %v6085_v56 = vor.u32 %v6084_v52, %v6081_v36 }
 0x523   :  { %7285 = vmatprep.subr.bf16.mxu1 %v9410_v7  ;;  %v5972_v17 = vor.u32 %v5970_v47, %v5969_v10  ;;  %v5974_v46 = vrot.slane %v5969_v10, 4  ;;  %v6098_v23 = vshll.u32 %v11145_v11, 16  ;;  %v6114_v49 = vrot.slane %v6112_v51, 5  ;;  %v9411_v7 = vld [vmem:[#allocation6 + $0x4e0] ss:$8 sps:$4 sm:$0xff]  }
 0x524   :  { %7229 = vmatmul.mubr.bf16.gmra.mrb[52].mxu1 %v8297_v32  ;;  %v6109_v2 = vor.u32 %v6108_v18, %v6105_v38  ;;  %v6118_v39 = vrot.slane %v6116_v22, 4  ;;  %v6095_v1 = vor.u32 %v6094_v19, %v6090_v40  ;;  %v6122_v36 = vshll.u32 %v11148_v28, 16  ;;  %v9414_v18 = vld [vmem:[#allocation6 + $0x4f0] ss:$8 sps:$4 sm:$0xff]  }
 0x525   :  { %v11155_v29 = vsel %vm9683_vm14, %v5965_v34, %v5972_v17  ;;  %v6052_v48 = vsel %vm9670_vm6, %v5974_v46, %v6051_v24  ;;  %7238 = vmatprep.mubr.bf16.mxu1 %v8300_v55  ;;  %v6154_v55 = vshll.u32 %v11055_v6, 16  ;;  %v6100_v52 = vrot.slane %v6098_v23, 5  ;;  %v9419_v6 = vld [vmem:[#allocation6 + $0x504] ss:$8 sps:$4 sm:$0xff]  }
 0x526   :  { %7286 = vmatpush1.bf16.msra.mxu1 %v9408_v57  ;;  %6053 = vst [vmem:[#allocation2 + $0xb8] sm:$0x11] %v6052_v48  ;;  %v8302_v31 = vcombine.high %v11139_v21, %v11155_v29  ;;  %v8301_v32 = vcombine.low %v11139_v21, %v11155_v29  ;;  %v6175_v57 = vshrl.u32 %v11071_v63, 16  ;;  %v6119_v20 = vor.u32 %v6118_v39, %v6114_v49  ;;  %v11175_v23 = vld [vmem:[#allocation2 + $0x40] sm:$0x11] }
 0x527   :  { %7287 = vmatprep.subr.bf16.mxu1 %v9413_v58  ;;  %v6129_v10 = vrot.slane %v6127_v27, 4  ;;  %v6132_v47 = vrot.slane %v6130_v3, 5  ;;  %v6086_v38 = vrot.slane %v6085_v56, 4  ;;  %v6110_v51 = vrot.slane %v6109_v2, 4  ;;  %v11195_v39 = vld [vmem:[#allocation2 + $0x70] sm:$0x11] }
 0x528   :  { %v6136_v58 = vshll.u32 %v11045_v5, 16  ;;  %v6140_v19 = vshrl.u32 %v11045_v5, 16  ;;  %v6178_v34 = vshll.u32 %v11071_v63, 16  ;;  %v6199_v17 = vshrl.u32 %v11091_v15, 16 }
 0x529   :  { %v6096_v46 = vrot.slane %v6095_v1, 4  ;;  %v6124_v22 = vrot.slane %v6122_v36, 5  ;;  %v6202_v24 = vshll.u32 %v11091_v15, 16  ;;  %v6223_v27 = vshrl.u32 %v11110_v4, 16 }
 0x52a   :  { %7288 = vmatpush1.bf16.msra.mxu1 %v9411_v7  ;;  %v6226_v3 = vshll.u32 %v11110_v4, 16  ;;  %v6120_v48 = vrot.slane %v6119_v20, 4  ;;  %v6133_v15 = vor.u32 %v6132_v47, %v6129_v10  ;;  %v11187_v7 = vsel %vm9912_vm5, %v6086_v38, %v6090_v40 }
 0x52b   :  { %7289 = vmatprep.subr.bf16.mxu1 %v9416_v33  ;;  %v11183_v63 = vsel %vm9912_vm5, %v6096_v46, %v6100_v52  ;;  %v11191_v2 = vsel %vm9912_vm5, %v6110_v51, %v6114_v49  ;;  %v11193_v4 = vrot.slane %v6136_v58, 5  ;;  %v6177_v33 = vrot.slane %v6175_v57, 4 }
 0x52c   :  { %7239 = vmatmul.mubr.bf16.gmra.mrb[56].mxu1 %v8299_v61  ;;  %v6142_v61 = vrot.slane %v6140_v19, 4  ;;  %v11199_v1 = vsel %vm9912_vm5, %v6120_v48, %v6124_v22  ;;  %v6180_v40 = vrot.slane %v6178_v34, 5  ;;  %v8303_v36 = vcombine.low %v11187_v7, %v11183_v63  ;;  %v11219_v34 = vld [vmem:[#allocation2 + $0x88] sm:$0x11] }
 0x52d   :  { %7248 = vmatprep.mubr.bf16.mxu1 %v8302_v31  ;;  %v6146_v31 = vshll.u32 %v11175_v23, 16  ;;  %v8304_v49 = vcombine.high %v11187_v7, %v11183_v63  ;;  %v6184_v52 = vshll.u32 %v11082_v14, 16  ;;  %v6188_v20 = vshrl.u32 %v11082_v14, 16 }
 0x52e   :  { %7290 = vmatpush1.bf16.msra.mxu1 %v9414_v18  ;;  %v11208_v10 = vrot.slane %v6133_v15, 4  ;;  %v11210_v47 = vrot.slane %v6151_v12, 4  ;;  %v6181_v38 = vor.u32 %v6180_v40, %v6177_v33  ;;  %v6194_v18 = vshll.u32 %v11195_v39, 16 }
 0x52f   :  { %7372 = vmatprep.subr.bf16.mxu1 %v9419_v6  ;;  %v8306_v57 = vcombine.high %v11191_v2, %v11199_v1  ;;  %v6143_v51 = vor.u32 %v6142_v61, %v11193_v4  ;;  %v11216_v58 = vrot.slane %v6154_v55, 5  ;;  %v6160_v19 = vshll.u32 %v11062_v41, 16 }
 0x530   :  { %v11221_v46 = vrot.slane %v6146_v31, 5  ;;  %v6182_v6 = vrot.slane %v6181_v38, 4  ;;  %v6186_v22 = vrot.slane %v6184_v52, 5  ;;  %v6190_v12 = vrot.slane %v6188_v20, 4  ;;  %v11235_v52 = vld [vmem:[#allocation2 + $0xa0] sm:$0x11] }
 0x531   :  { %v6196_v63 = vrot.slane %v6194_v18, 5  ;;  %v6201_v48 = vrot.slane %v6199_v17, 4  ;;  %v6204_v15 = vrot.slane %v6202_v24, 5  ;;  %v6208_v7 = vshll.u32 %v11104_v44, 16 }
 0x532   :  { %v11229_v55 = vsel %vm9912_vm5, %v6182_v6, %v6186_v22  ;;  %v6191_v61 = vor.u32 %v6190_v12, %v6186_v22  ;;  %v6212_v31 = vshrl.u32 %v11104_v44, 16  ;;  %v6218_v33 = vshll.u32 %v11219_v34, 16 }
 0x533   :  { %v11233_v40 = vrot.slane %v6160_v19, 5  ;;  %v6205_v17 = vor.u32 %v6204_v15, %v6201_v48  ;;  %v6210_v24 = vrot.slane %v6208_v7, 5  ;;  %v6225_v20 = vrot.slane %v6223_v27, 4  ;;  %v9417_v27 = vld [vmem:[#allocation6 + $0x500] ss:$8 sps:$4 sm:$0xff]  }
 0x534   :  { %7249 = vmatmul.mubr.bf16.gmra.mrb[60].mxu1 %v8301_v32  ;;  %v6144_v38 = vrot.slane %v6143_v51, 4  ;;  %v6164_v32 = vshrl.u32 %v11062_v41, 16  ;;  %v6192_v18 = vrot.slane %v6191_v61, 4  ;;  %v6214_v5 = vrot.slane %v6212_v31, 4  ;;  %v11253_v31 = vld [vmem:[#allocation2 + $0xb8] sm:$0x11] }
 0x535   :  { %7291 = vmatprep.mubr.bf16.mxu1 %v8304_v49  ;;  %v6206_v6 = vrot.slane %v6205_v17, 4  ;;  %v6220_v56 = vrot.slane %v6218_v33, 5  ;;  %v6228_v22 = vrot.slane %v6226_v3, 5  ;;  %v6232_v12 = vshll.u32 %v11122_v43, 16 }
 0x536   :  { %v11241_v49 = vsel %vm9912_vm5, %v6192_v18, %v6196_v63  ;;  %v6215_v19 = vor.u32 %v6214_v5, %v6210_v24  ;;  %v6236_v48 = vshrl.u32 %v11122_v43, 16  ;;  %v6242_v15 = vshll.u32 %v11235_v52, 16  ;;  %v9422_v63 = vld [vmem:[#allocation6 + $0x514] ss:$8 sps:$4 sm:$0xff]  }
 0x537   :  { %v11251_v3 = vsel %vm9912_vm5, %v6206_v6, %v6210_v24  ;;  %v6229_v61 = vor.u32 %v6228_v22, %v6225_v20  ;;  %v6234_v33 = vrot.slane %v6232_v12, 5  ;;  %v11591_v8 = vshrl.u32 %v11139_v21, 16  ;;  %v11260_v24 = vld [vmem:[#allocation2 + $0x58] sm:$0x11] }
 0x538   :  { %v6216_v5 = vrot.slane %v6215_v19, 4  ;;  %v6238_v17 = vrot.slane %v6236_v48, 4  ;;  %v6244_v18 = vrot.slane %v6242_v15, 5  ;;  %v11592_v51 = vshll.u32 %v11139_v21, 16  ;;  %v9425_v48 = vld [vmem:[#allocation6 + $0x524] ss:$8 sps:$4 sm:$0xff]  }
 0x539   :  { %v6230_v9 = vrot.slane %v6229_v61, 4  ;;  %v6249_v16 = vrot.slane %v11591_v8, 4  ;;  %v6256_v7 = vshll.u32 %v11155_v29, 16  ;;  %v6260_v22 = vshrl.u32 %v11155_v29, 16  ;;  %v9420_v8 = vld [vmem:[#allocation6 + $0x510] ss:$8 sps:$4 sm:$0xff]  }
 0x53a   :  { %v6252_v54 = vrot.slane %v11592_v51, 5  ;;  %v11264_v20 = vsel %vm9912_vm5, %v6216_v5, %v6220_v56  ;;  %v6239_v6 = vor.u32 %v6238_v17, %v6234_v33  ;;  %v6266_v12 = vshll.u32 %v11253_v31, 16 }
 0x53b   :  { %v8314_v21 = vcombine.high %v11251_v3, %v11264_v20  ;;  %v11274_v19 = vsel %vm9912_vm5, %v6230_v9, %v6234_v33  ;;  %v6258_v56 = vrot.slane %v6256_v7, 5  ;;  %v6166_v15 = vrot.slane %v6164_v32, 4  ;;  %v9423_v7 = vld [vmem:[#allocation6 + $0x520] ss:$8 sps:$4 sm:$0xff]  }
 0x53c   :  { %7292 = vmatmul.mubr.bf16.vlgmr.msra.gmra.mrb[32].mxu1 %v8303_v36  ;;  %v6240_v51 = vrot.slane %v6239_v6, 4  ;;  %v6253_v61 = vor.u32 %v6252_v54, %v6249_v16  ;;  %v6262_v5 = vrot.slane %v6260_v22, 4  ;;  %v6268_v33 = vrot.slane %v6266_v12, 5  ;;  %v9426_v22 = vld [vmem:[#allocation6 + $0x530] ss:$8 sps:$4 sm:$0xff]  }
 0x53d   :  { %7301 = vmatprep.mubr.bf16.mxu1 %v8306_v57  ;;  %7373 = vmatpush1.bf16.msra.mxu1 %v9417_v27  ;;  %v6149_v57 = vsel %vm9912_vm5, %v6144_v38, %v11221_v46  ;;  %v6170_v27 = vshll.u32 %v11260_v24, 16  ;;  %v8305_v32 = vcombine.low %v11191_v2, %v11199_v1  ;;  %v6139_v54 = vsel %vm9912_vm5, %v11208_v10, %v11193_v4  ;;  %v9428_v38 = vld [vmem:[#allocation6 + $0x534] ss:$8 sps:$4 sm:$0xff]   ;;  %v6274_v12 = vld [vmem:[#allocation2 + $0x60] sm:$0xee] }
 0x53e   :  { %7374 = vmatprep.subr.bf16.mxu1 %v9422_v63  ;;  %v11282_v17 = vsel %vm9912_vm5, %v6240_v51, %v6244_v18  ;;  %v6254_v36 = vrot.slane %v6253_v61, 4  ;;  %v6263_v9 = vor.u32 %v6262_v5, %v6258_v56  ;;  %v6157_v63 = vor.u32 %v11216_v58, %v11210_v47 }
 0x53f   :  { %v8316_v16 = vcombine.high %v11274_v19, %v11282_v17  ;;  %v8315_v46 = vcombine.low %v11274_v19, %v11282_v17  ;;  %v6167_v18 = vor.u32 %v6166_v15, %v11233_v40  ;;  %v8308_v6 = vcombine.high %v6139_v54, %v6149_v57  ;;  %v6276_v15 = vld [vmem:[#allocation2 + $0x90] sm:$0xee]  ;;  %v9502_v17 = vld [vmem:[#allocation2 + $0x20] sm:$0xff] }
 0x540   :  { %v11299_v2 = vsel %vm9912_vm5, %v6254_v36, %v6258_v56  ;;  %v6264_v1 = vrot.slane %v6263_v9, 4  ;;  %v6172_v4 = vrot.slane %v6170_v27, 5  ;;  %v6158_v36 = vrot.slane %v6157_v63, 4  ;;  %v9434_v63 = vld [vmem:[#allocation6 + $0x554] ss:$8 sps:$4 sm:$0xff]  }
 0x541   :  { %7375 = vmatpush1.bf16.msra.mxu1 %v9420_v8  ;;  %v9431_v8 = vld [vmem:[#allocation6 + $0x544] ss:$8 sps:$4 sm:$0xff]   ;;  %v6168_v56 = vrot.slane %v6167_v18, 4  ;;  %v8283_v61 = vrot.slane %v6274_v12, 9  ;;  %v6332_v5 = vrot.slane %v11082_v14, 5  ;;  %v6335_v27 = vrot.slane %v11195_v39, 5 }
 0x542   :  { %7376 = vmatprep.subr.bf16.mxu1 %v9425_v48  ;;  %v11303_v10 = vsel %vm9912_vm5, %v6264_v1, %v6268_v33  ;;  %v6275_v48 = vld [vmem:[#allocation2 + $0x78] sm:$0xee]  ;;  %v8307_v9 = vcombine.low %v6139_v54, %v6149_v57  ;;  %v9429_v33 = vld [vmem:[#allocation6 + $0x540] ss:$8 sps:$4 sm:$0xff]   ;;  %v6342_v1 = vrot.slane %v11219_v34, 5  ;;  %v6346_v39 = vrot.slane %v11122_v43, 5 }
 0x543   :  { %v8318_v47 = vcombine.high %v11299_v2, %v11303_v10  ;;  %v8317_v58 = vcombine.low %v11299_v2, %v11303_v10  ;;  %v6173_v51 = vsel %vm9912_vm5, %v6168_v56, %v6172_v4  ;;  %v6334_v18 = vrot.slane %v6332_v5, 4  ;;  %v9432_v54 = vld [vmem:[#allocation6 + $0x550] ss:$8 sps:$4 sm:$0xff]  }
 0x544   :  { %7302 = vmatmul.mubr.bf16.gmra.mrb[36].mxu1 %v8305_v32  ;;  %v8284_v32 = vrot.slane %v6275_v48, 9  ;;  %v11321_v57 = vsel %vm10002_vm9, %v8283_v61, %v6332_v5  ;;  %v6349_v34 = vrot.slane %v11235_v52, 5  ;;  %v6353_v5 = vrot.slane %v11155_v29, 5  ;;  %v6272_v10 = vld [vmem:[#allocation2 + $0x30] sm:$0xee] }
 0x545   :  { %7311 = vmatprep.mubr.bf16.mxu1 %v8308_v6  ;;  %7377 = vmatpush1.bf16.msra.mxu1 %v9423_v7  ;;  %v6339_v7 = vrot.slane %v11104_v44, 5  ;;  %v8285_v6 = vrot.slane %v6276_v15, 9  ;;  %v11325_v44 = vsel %vm10002_vm9, %v6334_v18, %v6335_v27  ;;  %v6356_v27 = vrot.slane %v11253_v31, 5  ;;  %v9440_v18 = vld [vmem:[#allocation6 + $0x574] ss:$8 sps:$4 sm:$0xff]  }
 0x546   :  { %7378 = vmatprep.subr.bf16.mxu1 %v9428_v38  ;;  %v6163_v38 = vsel %vm9912_vm5, %v6158_v36, %v11233_v40  ;;  %v6277_v40 = vld [vmem:[#allocation2 + $0xa8] sm:$0xee]  ;;  %v8328_v43 = vcombine.high %v11321_v57, %v11325_v44 }
 0x547   :  { %v8310_v4 = vcombine.high %v6163_v38, %v6173_v51  ;;  %v6341_v14 = vrot.slane %v6339_v7, 4  ;;  %v11329_v42 = vsel %vm10002_vm9, %v8284_v32, %v6339_v7  ;;  %v9437_v36 = vld [vmem:[#allocation6 + $0x564] ss:$8 sps:$4 sm:$0xff]   ;;  %v11346_v48 = vsel %vm10002_vm9, %v8285_v6, %v6346_v39  ;;  %v9435_v32 = vld [vmem:[#allocation6 + $0x560] ss:$8 sps:$4 sm:$0xff]  }
 0x548   :  { %v8286_v61 = vrot.slane %v6277_v40, 9  ;;  %v6355_v7 = vrot.slane %v6353_v5, 4  ;;  %v9444_v40 = vld [vmem:[#allocation6 + $0x590] ss:$8 sps:$4 sm:$0xff]  }
 0x549   :  { %7379 = vmatpush1.bf16.msra.mxu1 %v9426_v22  ;;  %v8327_v22 = vcombine.low %v11321_v57, %v11325_v44  ;;  %v11338_v12 = vsel %vm10002_vm9, %v6341_v14, %v6342_v1  ;;  %v9441_v14 = vld [vmem:[#allocation6 + $0x580] ss:$8 sps:$4 sm:$0xff]  }
 0x54a   :  { %7380 = vmatprep.subr.bf16.mxu1 %v9431_v8  ;;  %v6348_v8 = vrot.slane %v6346_v39, 4  ;;  %v8330_v52 = vcombine.high %v11329_v42, %v11338_v12  ;;  %v8329_v56 = vcombine.low %v11329_v42, %v11338_v12  ;;  %v11360_v1 = vsel %vm10002_vm9, %v8286_v61, %v6353_v5  ;;  %v9446_v39 = vld [vmem:[#allocation6 + $0x594] ss:$8 sps:$4 sm:$0xff]  }
 0x54b   :  { %v11364_v29 = vsel %vm10002_vm9, %v6355_v7, %v6356_v27  ;;  %v11595_v61 = vcombine.low %v11251_v3, %v11264_v20  ;;  %v9458_v5 = vld [vmem:[#allocation6 + $0x5d4] ss:$8 sps:$4 sm:$0xff]   ;;  %v9501_v27 = vld [vmem:[#allocation2 + $0x8] sm:$0xff]  ;;  %v6270_v7 = vld [vmem:[#allocation2] sm:$0xee]  ;;  %v6307_v3 = vrot.slane %v11145_v11, 5 }
 0x54c   :  { %7312 = vmatmul.mubr.bf16.gmra.mrb[40].mxu1 %v8307_v9  ;;  %v11350_v15 = vsel %vm10002_vm9, %v6348_v8, %v6349_v34  ;;  %v8334_v31 = vcombine.high %v11360_v1, %v11364_v29  ;;  %v8333_v6 = vcombine.low %v11360_v1, %v11364_v29  ;;  %v11594_v34 = vcombine.low %v11229_v55, %v11241_v49  ;;  %v9447_v8 = vld [vmem:[#allocation6 + $0x5a0] ss:$8 sps:$4 sm:$0xff]   ;;  %v9456_v20 = vld [vmem:[#allocation6 + $0x5d0] ss:$8 sps:$4 sm:$0xff]   ;;  %v9464_v11 = vld [vmem:[#allocation6 + $0x5f4] ss:$8 sps:$4 sm:$0xff]  }
 0x54d   :  { %7321 = vmatprep.mubr.bf16.mxu1 %v8310_v4  ;;  %7381 = vmatpush1.bf16.msra.mxu1 %v9429_v33  ;;  %v8332_v9 = vcombine.high %v11346_v48, %v11350_v15  ;;  %v8331_v33 = vcombine.low %v11346_v48, %v11350_v15  ;;  %v9443_v4 = vld [vmem:[#allocation6 + $0x584] ss:$8 sps:$4 sm:$0xff]  }
 0x54e   :  { %7382 = vmatprep.subr.bf16.mxu1 %v9434_v63  ;;  %v8309_v63 = vcombine.low %v6163_v38, %v6173_v51  ;;  %v11593_v51 = vcombine.high %v11229_v55, %v11241_v49  ;;  %v9438_v38 = vld [vmem:[#allocation6 + $0x570] ss:$8 sps:$4 sm:$0xff]   ;;  %v9455_v49 = vld [vmem:[#allocation6 + $0x5c4] ss:$8 sps:$4 sm:$0xff]  }
 0x54f   :  { %v9450_v55 = vld [vmem:[#allocation6 + $0x5b0] ss:$8 sps:$4 sm:$0xff]  }
 0x551   :  { %7383 = vmatpush1.bf16.msra.mxu1 %v9432_v54  ;;  %v9449_v54 = vld [vmem:[#allocation6 + $0x5a4] ss:$8 sps:$4 sm:$0xff]  }
 0x552   :  { %7384 = vmatprep.subr.bf16.mxu1 %v9437_v36  ;;  %v9452_v36 = vld [vmem:[#allocation6 + $0x5b4] ss:$8 sps:$4 sm:$0xff]  }
 0x554   :  { %7322 = vmatmul.mubr.bf16.gmra.mrb[44].mxu1 %v8309_v63  ;;  %v8279_v63 = vrot.slane %v6270_v7, 9 }
 0x555   :  { %7331 = vmatprep.mubr.bf16.mxu1 %v11593_v51  ;;  %7385 = vmatpush1.bf16.msra.mxu1 %v9435_v32  ;;  %v6304_v32 = vrot.slane %v9501_v27, 5 }
 0x556   :  { %7386 = vmatprep.subr.bf16.mxu1 %v9440_v18 }
 0x557   :  { %v6306_v18 = vrot.slane %v6304_v32, 4  ;;  %v6305_v19 = vsel %vm10002_vm9, %v8279_v63, %v6304_v32  ;;  %v6325_v32 = vrot.slane %v11062_v41, 5  ;;  %v11440_v41 = vrot.slane %v6654_v37, %v10058_v25 }
 0x559   :  { %7387 = vmatpush1.bf16.msra.mxu1 %v9438_v38  ;;  %v6308_v51 = vsel %vm10002_vm9, %v6306_v18, %v6307_v3  ;;  %v9459_v38 = vld [vmem:[#allocation6 + $0x5e0] ss:$8 sps:$4 sm:$0xff]  }
 0x55a   :  { %7388 = vmatprep.subr.bf16.mxu1 %v9443_v4  ;;  %v8320_v4 = vcombine.high %v6305_v19, %v6308_v51  ;;  %v6273_v3 = vld [vmem:[#allocation2 + $0x48] sm:$0xee] }
 0x55c   :  { %7332 = vmatmul.mubr.bf16.gmra.mrb[48].mxu1 %v11594_v34 }
 0x55d   :  { %7341 = vmatprep.mubr.bf16.mxu1 %v8314_v21  ;;  %7389 = vmatpush1.bf16.msra.mxu1 %v9441_v14  ;;  %v9453_v21 = vld [vmem:[#allocation6 + $0x5c0] ss:$8 sps:$4 sm:$0xff]   ;;  %v6314_v14 = vrot.slane %v11148_v28, 5  ;;  %v6321_v28 = vrot.slane %v11175_v23, 5  ;;  %v6327_v23 = vrot.slane %v6325_v32, 4 }
 0x55e   :  { %7390 = vmatprep.subr.bf16.mxu1 %v9446_v39  ;;  %v9462_v39 = vld [vmem:[#allocation6 + $0x5f0] ss:$8 sps:$4 sm:$0xff]  }
 0x561   :  { %7391 = vmatpush1.bf16.msra.mxu1 %v9444_v40 }
 0x562   :  { %7392 = vmatprep.subr.bf16.mxu1 %v9449_v54 }
 0x564   :  { %7342 = vmatmul.mubr.bf16.gmra.mrb[52].mxu1 %v11595_v61  ;;  %v9503_v61 = vld [vmem:[#allocation2 + $0x38] sm:$0xff] }
 0x565   :  { %7351 = vmatprep.mubr.bf16.mxu1 %v8316_v16  ;;  %7393 = vmatpush1.bf16.msra.mxu1 %v9447_v8  ;;  %v9461_v16 = vld [vmem:[#allocation6 + $0x5e4] ss:$8 sps:$4 sm:$0xff]   ;;  %v8319_v8 = vcombine.low %v6305_v19, %v6308_v51 }
 0x566   :  { %7394 = vmatprep.subr.bf16.mxu1 %v9452_v36 }
 0x569   :  { %7395 = vmatpush1.bf16.msra.mxu1 %v9450_v55  ;;  %v6318_v55 = vrot.slane %v9503_v61, 5 }
 0x56a   :  { %7396 = vmatprep.subr.bf16.mxu1 %v9455_v49 }
 0x56b   :  { %v6320_v49 = vrot.slane %v6318_v55, 4 }
 0x56c   :  { %7352 = vmatmul.mubr.bf16.gmra.mrb[56].mxu1 %v8315_v46  ;;  %v6311_v46 = vrot.slane %v9502_v17, 5 }
 0x56d   :  { %7361 = vmatprep.mubr.bf16.mxu1 %v8318_v47  ;;  %7397 = vmatpush1.bf16.msra.mxu1 %v9453_v21  ;;  %v6271_v47 = vld [vmem:[#allocation2 + $0x18] sm:$0xee]  ;;  %v6322_v21 = vsel %vm10002_vm9, %v6320_v49, %v6321_v28 }
 0x56e   :  { %7398 = vmatprep.subr.bf16.mxu1 %v9458_v5  ;;  %v8280_v34 = vrot.slane %v6271_v47, 9  ;;  %v6313_v40 = vrot.slane %v6311_v46, 4 }
 0x570   :  { %v6315_v54 = vsel %vm10002_vm9, %v6313_v40, %v6314_v14  ;;  %v6312_v36 = vsel %vm10002_vm9, %v8280_v34, %v6311_v46 }
 0x571   :  { %7399 = vmatpush1.bf16.msra.mxu1 %v9456_v20  ;;  %v8322_v2 = vcombine.high %v6312_v36, %v6315_v54  ;;  %v8321_v5 = vcombine.low %v6312_v36, %v6315_v54  ;;  %v6328_v20 = vrot.slane %v11260_v24, 5  ;;  %v11443_v24 = vrot.slane %v6654_v37, %v10060_v30 }
 0x572   :  { %7400 = vmatprep.subr.bf16.mxu1 %v9461_v16  ;;  %v8282_v16 = vrot.slane %v6273_v3, 9 }
 0x573   :  { %v6329_v63 = vsel %vm10002_vm9, %v6327_v23, %v6328_v20 }
 0x574   :  { %7362 = vmatmul.mubr.bf16.gmra.mrb[60].mxu1 %v8317_v58  ;;  %v8281_v58 = vrot.slane %v6272_v10, 9  ;;  %v6326_v51 = vsel %vm10002_vm9, %v8282_v16, %v6325_v32 }
 0x575   :  { %7401 = vmatpush1.bf16.msra.mxu1 %v9459_v38  ;;  %7404 = vmatprep.mubr.bf16.mxu1 %v8320_v4  ;;  %v8326_v38 = vcombine.high %v6326_v51, %v6329_v63  ;;  %v8325_v19 = vcombine.low %v6326_v51, %v6329_v63 }
 0x576   :  { %7402 = vmatprep.subr.bf16.mxu1 %v9464_v11  ;;  %v6319_v27 = vsel %vm10002_vm9, %v8281_v58, %v6318_v55 }
 0x577   :  { %v8324_v7 = vcombine.high %v6319_v27, %v6322_v21  ;;  %v8323_v18 = vcombine.low %v6319_v27, %v6322_v21 }
 0x579   :  { %7403 = vmatpush1.bf16.msra.mxu1 %v9462_v39 }
 0x57c   :  { %7405 = vmatmul.mubr.bf16.vlgmr.msra.gmra.mrb[32].mxu1 %v8319_v8 }
 0x57d   :  { %7414 = vmatprep.mubr.bf16.mxu1 %v8322_v2 }
 0x584   :  { %7415 = vmatmul.mubr.bf16.gmra.mrb[36].mxu1 %v8321_v5 }
 0x585   :  { %7424 = vmatprep.mubr.bf16.mxu1 %v8324_v7 }
 0x58c   :  { %7425 = vmatmul.mubr.bf16.gmra.mrb[40].mxu1 %v8323_v18 }
 0x58d   :  { %7434 = vmatprep.mubr.bf16.mxu1 %v8326_v38 }
 0x594   :  { %7435 = vmatmul.mubr.bf16.gmra.mrb[44].mxu1 %v8325_v19 }
 0x595   :  { %7444 = vmatprep.mubr.bf16.mxu1 %v8328_v43 }
 0x59c   :  { %7445 = vmatmul.mubr.bf16.gmra.mrb[48].mxu1 %v8327_v22 }
 0x59d   :  { %7454 = vmatprep.mubr.bf16.mxu1 %v8330_v52 }
 0x5a4   :  { %7455 = vmatmul.mubr.bf16.gmra.mrb[52].mxu1 %v8329_v56 }
 0x5a5   :  { %7464 = vmatprep.mubr.bf16.mxu1 %v8332_v9 }
 0x5ac   :  { %7465 = vmatmul.mubr.bf16.gmra.mrb[56].mxu1 %v8331_v33 }
 0x5ad   :  { %7474 = vmatprep.mubr.bf16.mxu1 %v8334_v31 }
 0x5b4   :  { %7475 = vmatmul.mubr.bf16.gmra.mrb[60].mxu1 %v8333_v6 }
 0x64f   :  { %v7406_v57 = vpop.f32.mrb[32].mxu1 }
 0x650   :  { %v8591_v44 = vadd.f32 %v7406_v57, %v11440_v41  ;;  %v7408_v42 = vpop.f32.mrb[33].mxu1 }
 0x651   :  { %v8592_v43 = vadd.f32 %v7408_v42, %v11443_v24  ;;  %v7410_v22 = vpop.f32.mrb[34].mxu1 }
 0x652   :  { %vm7485_vm6 = vcmp.gt.f32.partialorder %v8591_v44, 0.0  ;;  %v7517_v12 = vmul.f32 0.01, %v8591_v44  ;;  %v8593_v52 = vadd.f32 %v7410_v22, %v11440_v41  ;;  %v7412_v56 = vpop.f32.mrb[35].mxu1 }
 0x653   :  { %vm7486_vm14 = vcmp.gt.f32.partialorder %v8592_v43, 0.0  ;;  %v7518_v48 = vmul.f32 0.01, %v8592_v43  ;;  %v8594_v25 = vadd.f32 %v7412_v56, %v11443_v24 }
 0x654   :  { %v7549_v15 = vsel %vm7485_vm6, %v8591_v44, %v7517_v12  ;;  %vm7487_vm15 = vcmp.gt.f32.partialorder %v8593_v52, 0.0  ;;  %v7519_v30 = vmul.f32 0.01, %v8593_v52 }
 0x655   :  { %v7581_v9 = vadd.f32 %v7549_v15, %v10494_v53  ;;  %v7550_v33 = vsel %vm7486_vm14, %v8592_v43, %v7518_v48  ;;  %vm7488_vm5 = vcmp.gt.f32.partialorder %v8594_v25, 0.0  ;;  %v7520_v1 = vmul.f32 0.01, %v8594_v25 }
 0x656   :  { %v7582_v29 = vadd.f32 %v7550_v33, %v10497_v45  ;;  %v7551_v31 = vsel %vm7487_vm15, %v8593_v52, %v7519_v30 }
 0x657   :  { %vm7613_vm9 = vcmp.gt.f32.partialorder %v7581_v9, 0.0  ;;  %v7645_v6 = vmul.f32 0.01, %v7581_v9  ;;  %v7583_v11 = vadd.f32 %v7551_v31, %v10501_v26  ;;  %v7552_v17 = vsel %vm7488_vm5, %v8594_v25, %v7520_v1  ;;  %v7416_v46 = vpop.f32.mrb[36].mxu1 }
 0x658   :  { %vm7614_vm3 = vcmp.gt.f32.partialorder %v7582_v29, 0.0  ;;  %v7646_v4 = vmul.f32 0.01, %v7582_v29  ;;  %v7584_v47 = vadd.f32 %v7552_v17, %v10503_v59  ;;  %v8595_v14 = vadd.f32 %v7416_v46, %v11440_v41  ;;  %v7418_v39 = vpop.f32.mrb[37].mxu1 }
 0x659   :  { %v7677_v53 = vsel %vm7613_vm9, %v7581_v9, %v7645_v6  ;;  %vm7615_vm4 = vcmp.gt.f32.partialorder %v7583_v11, 0.0  ;;  %v7647_v34 = vmul.f32 0.01, %v7583_v11  ;;  %v8596_v40 = vadd.f32 %v7418_v39, %v11443_v24  ;;  %v7420_v45 = vpop.f32.mrb[38].mxu1 }
 0x65a   :  { %7709 = vst [vmem:[#allocation9] sm:$0xff] %v7677_v53  ;;  %v7678_v54 = vsel %vm7614_vm3, %v7582_v29, %v7646_v4  ;;  %vm7616_vm7 = vcmp.gt.f32.partialorder %v7584_v47, 0.0  ;;  %v7648_v8 = vmul.f32 0.01, %v7584_v47  ;;  %vm7489_vm8 = vcmp.gt.f32.partialorder %v8595_v14, 0.0  ;;  %v7422_v26 = vpop.f32.mrb[39].mxu1 }
 0x65b   :  { %7710 = vst [vmem:[#allocation9 + $0x8] sm:$0xff] %v7678_v54  ;;  %v7679_v36 = vsel %vm7615_vm4, %v7583_v11, %v7647_v34  ;;  %v7521_v61 = vmul.f32 0.01, %v8595_v14  ;;  %vm7490_vm10 = vcmp.gt.f32.partialorder %v8596_v40, 0.0  ;;  %v7522_v59 = vmul.f32 0.01, %v8596_v40 }
 0x65c   :  { %7711 = vst [vmem:[#allocation9 + $0x10] sm:$0xff] %v7679_v36  ;;  %v7680_v55 = vsel %vm7616_vm7, %v7584_v47, %v7648_v8  ;;  %v8597_v2 = vadd.f32 %v7420_v45, %v11440_v41  ;;  %v8598_v10 = vadd.f32 %v7422_v26, %v11443_v24  ;;  %v11596_v29 = vld [vmem:[#allocation13_spill] sm:$0xff]  ;;  %v11597_v53 = vld [vmem:[#allocation14_spill] sm:$0xff] }
 0x65d   :  { %7712 = vst [vmem:[#allocation9 + $0x18] sm:$0xff] %v7680_v55  ;;  %v7553_v28 = vsel %vm7489_vm8, %v8595_v14, %v7521_v61  ;;  %v7554_v58 = vsel %vm7490_vm10, %v8596_v40, %v7522_v59  ;;  %v11598_v59 = vld [vmem:[#allocation15_spill] sm:$0xff] }
 0x65e   :  { %v7585_v49 = vadd.f32 %v7553_v28, %v10512_v60  ;;  %v7586_v21 = vadd.f32 %v7554_v58, %v10522_v0  ;;  %vm7491_vm11 = vcmp.gt.f32.partialorder %v8597_v2, 0.0  ;;  %v7523_v5 = vmul.f32 0.01, %v8597_v2 }
 0x65f   :  { %vm7492_vm12 = vcmp.gt.f32.partialorder %v8598_v10, 0.0  ;;  %v7524_v27 = vmul.f32 0.01, %v8598_v10  ;;  %v7426_v32 = vpop.f32.mrb[40].mxu1 }
 0x660   :  { %vm7617_vm13 = vcmp.gt.f32.partialorder %v7585_v49, 0.0  ;;  %v7649_v7 = vmul.f32 0.01, %v7585_v49  ;;  %vm7618_vm1 = vcmp.gt.f32.partialorder %v7586_v21, 0.0  ;;  %v7650_v3 = vmul.f32 0.01, %v7586_v21 }
 0x661   :  { %v7555_v20 = vsel %vm7491_vm11, %v8597_v2, %v7523_v5  ;;  %v7556_v16 = vsel %vm7492_vm12, %v8598_v10, %v7524_v27  ;;  %v8599_v23 = vadd.f32 %v7426_v32, %v11440_v41  ;;  %v7428_v63 = vpop.f32.mrb[41].mxu1 }
 0x662   :  { %v7681_v18 = vsel %vm7617_vm13, %v7585_v49, %v7649_v7  ;;  %v7682_v51 = vsel %vm7618_vm1, %v7586_v21, %v7650_v3  ;;  %v7587_v60 = vadd.f32 %v7555_v20, %v10529_v13  ;;  %v7588_v0 = vadd.f32 %v7556_v16, %v10535_v62  ;;  %v7430_v38 = vpop.f32.mrb[42].mxu1  ;;  %v11599_v49 = vld [vmem:[#allocation16_spill] sm:$0xff] }
 0x663   :  { %7713 = vst [vmem:[#allocation9 + $0x20] sm:$0xff] %v7681_v18  ;;  %7714 = vst [vmem:[#allocation9 + $0x28] sm:$0xff] %v7682_v51  ;;  %vm7493_vm0 = vcmp.gt.f32.partialorder %v8599_v23, 0.0  ;;  %v7525_v19 = vmul.f32 0.01, %v8599_v23  ;;  %v8600_v37 = vadd.f32 %v7428_v63, %v11443_v24  ;;  %v8601_v57 = vadd.f32 %v7430_v38, %v11440_v41  ;;  %v7432_v44 = vpop.f32.mrb[43].mxu1 }
 0x664   :  { %vm7619_vm2 = vcmp.gt.f32.partialorder %v7587_v60, 0.0  ;;  %v7651_v42 = vmul.f32 0.01, %v7587_v60  ;;  %vm7620_vm6 = vcmp.gt.f32.partialorder %v7588_v0, 0.0  ;;  %v7652_v43 = vmul.f32 0.01, %v7588_v0 }
 0x665   :  { %v7557_v22 = vsel %vm7493_vm0, %v8599_v23, %v7525_v19  ;;  %vm7494_vm14 = vcmp.gt.f32.partialorder %v8600_v37, 0.0  ;;  %v7526_v12 = vmul.f32 0.01, %v8600_v37  ;;  %vm7495_vm15 = vcmp.gt.f32.partialorder %v8601_v57, 0.0  ;;  %v11600_v23 = vld [vmem:[#allocation17_spill] sm:$0xff] }
 0x666   :  { %v7683_v13 = vsel %vm7619_vm2, %v7587_v60, %v7651_v42  ;;  %v7684_v62 = vsel %vm7620_vm6, %v7588_v0, %v7652_v43  ;;  %v7589_v52 = vadd.f32 %v7557_v22, %v10549_v50  ;;  %v7527_v56 = vmul.f32 0.01, %v8601_v57  ;;  %v11601_v0 = vld [vmem:[#allocation18_spill] sm:$0xff] }
 0x667   :  { %7715 = vst [vmem:[#allocation9 + $0x30] sm:$0xff] %v7683_v13  ;;  %7716 = vst [vmem:[#allocation9 + $0x38] sm:$0xff] %v7684_v62  ;;  %v7558_v48 = vsel %vm7494_vm14, %v8600_v37, %v7526_v12  ;;  %v8602_v25 = vadd.f32 %v7432_v44, %v11443_v24  ;;  %v7436_v15 = vpop.f32.mrb[44].mxu1  ;;  %v11602_v13 = vld [vmem:[#allocation19_spill] sm:$0xff] }
 0x668   :  { %vm7621_vm5 = vcmp.gt.f32.partialorder %v7589_v52, 0.0  ;;  %v7653_v30 = vmul.f32 0.01, %v7589_v52  ;;  %v7590_v9 = vadd.f32 %v7558_v48, %v10554_v35  ;;  %v7559_v33 = vsel %vm7495_vm15, %v8601_v57, %v7527_v56  ;;  %v7438_v1 = vpop.f32.mrb[45].mxu1 }
 0x669   :  { %v7591_v31 = vadd.f32 %v7559_v33, %v11596_v29  ;;  %vm7496_vm9 = vcmp.gt.f32.partialorder %v8602_v25, 0.0  ;;  %v7528_v6 = vmul.f32 0.01, %v8602_v25  ;;  %v8603_v11 = vadd.f32 %v7436_v15, %v11440_v41  ;;  %v7440_v50 = vpop.f32.mrb[46].mxu1  ;;  %v11603_v29 = vld [vmem:[#allocation20_spill] sm:$0xff] }
 0x66a   :  { %v7685_v17 = vsel %vm7621_vm5, %v7589_v52, %v7653_v30  ;;  %vm7622_vm3 = vcmp.gt.f32.partialorder %v7590_v9, 0.0  ;;  %v7654_v46 = vmul.f32 0.01, %v7590_v9  ;;  %v8604_v4 = vadd.f32 %v7438_v1, %v11443_v24  ;;  %v7442_v47 = vpop.f32.mrb[47].mxu1 }
 0x66b   :  { %7717 = vst [vmem:[#allocation9 + $0x40] sm:$0xff] %v7685_v17  ;;  %vm7623_vm4 = vcmp.gt.f32.partialorder %v7591_v31, 0.0  ;;  %v7655_v14 = vmul.f32 0.01, %v7591_v31  ;;  %v7560_v39 = vsel %vm7496_vm9, %v8602_v25, %v7528_v6  ;;  %vm7497_vm7 = vcmp.gt.f32.partialorder %v8603_v11, 0.0 }
 0x66c   :  { %v7686_v35 = vsel %vm7622_vm3, %v7590_v9, %v7654_v46  ;;  %v7592_v34 = vadd.f32 %v7560_v39, %v11597_v53  ;;  %v7529_v40 = vmul.f32 0.01, %v8603_v11  ;;  %vm7498_vm8 = vcmp.gt.f32.partialorder %v8604_v4, 0.0  ;;  %v11604_v46 = vld [vmem:[#allocation21_spill] sm:$0xff] }
 0x66d   :  { %7718 = vst [vmem:[#allocation9 + $0x48] sm:$0xff] %v7686_v35  ;;  %v7687_v45 = vsel %vm7623_vm4, %v7591_v31, %v7655_v14  ;;  %v7530_v54 = vmul.f32 0.01, %v8604_v4  ;;  %v8605_v8 = vadd.f32 %v7440_v50, %v11440_v41  ;;  %v8606_v26 = vadd.f32 %v7442_v47, %v11443_v24 }
 0x66e   :  { %7719 = vst [vmem:[#allocation9 + $0x50] sm:$0xff] %v7687_v45  ;;  %vm7624_vm10 = vcmp.gt.f32.partialorder %v7592_v34, 0.0  ;;  %v7656_v36 = vmul.f32 0.01, %v7592_v34  ;;  %v7561_v61 = vsel %vm7497_vm7, %v8603_v11, %v7529_v40  ;;  %v11605_v40 = vld [vmem:[#allocation22_spill] sm:$0xff] }
 0x66f   :  { %v7593_v55 = vadd.f32 %v7561_v61, %v11598_v59  ;;  %v7562_v2 = vsel %vm7498_vm8, %v8604_v4, %v7530_v54  ;;  %vm7499_vm11 = vcmp.gt.f32.partialorder %v8605_v8, 0.0  ;;  %v7531_v10 = vmul.f32 0.01, %v8605_v8  ;;  %v7446_v28 = vpop.f32.mrb[48].mxu1 }
 0x670   :  { %v7688_v58 = vsel %vm7624_vm10, %v7592_v34, %v7656_v36  ;;  %v7594_v21 = vadd.f32 %v7562_v2, %v11599_v49  ;;  %vm7500_vm12 = vcmp.gt.f32.partialorder %v8606_v26, 0.0  ;;  %v7532_v5 = vmul.f32 0.01, %v8606_v26  ;;  %v7448_v27 = vpop.f32.mrb[49].mxu1 }
 0x671   :  { %7720 = vst [vmem:[#allocation9 + $0x58] sm:$0xff] %v7688_v58  ;;  %vm7625_vm13 = vcmp.gt.f32.partialorder %v7593_v55, 0.0  ;;  %v7657_v32 = vmul.f32 0.01, %v7593_v55  ;;  %v7563_v7 = vsel %vm7499_vm11, %v8605_v8, %v7531_v10  ;;  %v8607_v3 = vadd.f32 %v7446_v28, %v11440_v41  ;;  %v7450_v20 = vpop.f32.mrb[50].mxu1 }
 0x672   :  { %vm7626_vm1 = vcmp.gt.f32.partialorder %v7594_v21, 0.0  ;;  %v7658_v16 = vmul.f32 0.01, %v7594_v21  ;;  %v7595_v63 = vadd.f32 %v7563_v7, %v11600_v23  ;;  %v7564_v18 = vsel %vm7500_vm12, %v8606_v26, %v7532_v5  ;;  %v7452_v51 = vpop.f32.mrb[51].mxu1  ;;  %v11606_v26 = vld [vmem:[#allocation23_spill] sm:$0xff]  ;;  %v11607_v5 = vld [vmem:[#allocation24_spill] sm:$0xff] }
 0x673   :  { %v7689_v60 = vsel %vm7625_vm13, %v7593_v55, %v7657_v32  ;;  %v7596_v38 = vadd.f32 %v7564_v18, %v11601_v0  ;;  %vm7501_vm0 = vcmp.gt.f32.partialorder %v8607_v3, 0.0  ;;  %v7533_v19 = vmul.f32 0.01, %v8607_v3  ;;  %v11608_v0 = vld [vmem:[#allocation25_spill] sm:$0xff] }
 0x674   :  { %7721 = vst [vmem:[#allocation9 + $0x60] sm:$0xff] %v7689_v60  ;;  %v7690_v37 = vsel %vm7626_vm1, %v7594_v21, %v7658_v16  ;;  %vm7627_vm2 = vcmp.gt.f32.partialorder %v7595_v63, 0.0  ;;  %v7659_v57 = vmul.f32 0.01, %v7595_v63  ;;  %v8608_v44 = vadd.f32 %v7448_v27, %v11443_v24 }
 0x675   :  { %7722 = vst [vmem:[#allocation9 + $0x68] sm:$0xff] %v7690_v37  ;;  %vm7628_vm6 = vcmp.gt.f32.partialorder %v7596_v38, 0.0  ;;  %v7660_v42 = vmul.f32 0.01, %v7596_v38  ;;  %v7565_v43 = vsel %vm7501_vm0, %v8607_v3, %v7533_v19  ;;  %v8609_v22 = vadd.f32 %v7450_v20, %v11440_v41 }
 0x676   :  { %v7691_v12 = vsel %vm7627_vm2, %v7595_v63, %v7659_v57  ;;  %v7597_v62 = vadd.f32 %v7565_v43, %v11602_v13  ;;  %vm7502_vm14 = vcmp.gt.f32.partialorder %v8608_v44, 0.0  ;;  %v7534_v52 = vmul.f32 0.01, %v8608_v44 }
 0x677   :  { %7723 = vst [vmem:[#allocation9 + $0x70] sm:$0xff] %v7691_v12  ;;  %v7692_v56 = vsel %vm7628_vm6, %v7596_v38, %v7660_v42  ;;  %vm7503_vm15 = vcmp.gt.f32.partialorder %v8609_v22, 0.0  ;;  %v7535_v48 = vmul.f32 0.01, %v8609_v22  ;;  %v8610_v25 = vadd.f32 %v7452_v51, %v11443_v24  ;;  %v7456_v15 = vpop.f32.mrb[52].mxu1 }
 0x678   :  { %7724 = vst [vmem:[#allocation9 + $0x78] sm:$0xff] %v7692_v56  ;;  %vm7629_vm5 = vcmp.gt.f32.partialorder %v7597_v62, 0.0  ;;  %v7661_v30 = vmul.f32 0.01, %v7597_v62  ;;  %v7566_v9 = vsel %vm7502_vm14, %v8608_v44, %v7534_v52  ;;  %v8611_v33 = vadd.f32 %v7456_v15, %v11440_v41  ;;  %v7458_v1 = vpop.f32.mrb[53].mxu1  ;;  %v11609_v44 = vld [vmem:[#allocation26_spill] sm:$0xff] }
 0x679   :  { %v7598_v31 = vadd.f32 %v7566_v9, %v11603_v29  ;;  %v7567_v6 = vsel %vm7503_vm15, %v8609_v22, %v7535_v48  ;;  %vm7504_vm9 = vcmp.gt.f32.partialorder %v8610_v25, 0.0  ;;  %v7536_v11 = vmul.f32 0.01, %v8610_v25  ;;  %v7460_v50 = vpop.f32.mrb[54].mxu1  ;;  %v11610_v52 = vld [vmem:[#allocation27_spill] sm:$0xff]  ;;  %v11611_v15 = vld [vmem:[#allocation28_spill] sm:$0xff] }
 0x67a   :  { %v7693_v17 = vsel %vm7629_vm5, %v7597_v62, %v7661_v30  ;;  %v7599_v4 = vadd.f32 %v7567_v6, %v11604_v46  ;;  %vm7505_vm3 = vcmp.gt.f32.partialorder %v8611_v33, 0.0  ;;  %v7537_v47 = vmul.f32 0.01, %v8611_v33  ;;  %v7462_v14 = vpop.f32.mrb[55].mxu1 }
 0x67b   :  { %7725 = vst [vmem:[#allocation9 + $0x80] sm:$0xff] %v7693_v17  ;;  %vm7630_vm4 = vcmp.gt.f32.partialorder %v7598_v31, 0.0  ;;  %v7662_v39 = vmul.f32 0.01, %v7598_v31  ;;  %v7568_v35 = vsel %vm7504_vm9, %v8610_v25, %v7536_v11  ;;  %v8612_v53 = vadd.f32 %v7458_v1, %v11443_v24 }
 0x67c   :  { %vm7631_vm7 = vcmp.gt.f32.partialorder %v7599_v4, 0.0  ;;  %v7663_v34 = vmul.f32 0.01, %v7599_v4  ;;  %v7600_v45 = vadd.f32 %v7568_v35, %v11605_v40  ;;  %v7569_v54 = vsel %vm7505_vm3, %v8611_v33, %v7537_v47  ;;  %v11612_v47 = vld [vmem:[#allocation29_spill] sm:$0xff] }
 0x67d   :  { %v7694_v8 = vsel %vm7630_vm4, %v7598_v31, %v7662_v39  ;;  %v7601_v36 = vadd.f32 %v7569_v54, %v11606_v26  ;;  %vm7506_vm8 = vcmp.gt.f32.partialorder %v8612_v53, 0.0  ;;  %v7538_v61 = vmul.f32 0.01, %v8612_v53  ;;  %v11613_v26 = vld [vmem:[#allocation30_spill] sm:$0xff] }
 0x67e   :  { %7726 = vst [vmem:[#allocation9 + $0x88] sm:$0xff] %v7694_v8  ;;  %v7695_v59 = vsel %vm7631_vm7, %v7599_v4, %v7663_v34  ;;  %vm7632_vm10 = vcmp.gt.f32.partialorder %v7600_v45, 0.0  ;;  %v7664_v55 = vmul.f32 0.01, %v7600_v45  ;;  %v8613_v2 = vadd.f32 %v7460_v50, %v11440_v41 }
 0x67f   :  { %7727 = vst [vmem:[#allocation9 + $0x90] sm:$0xff] %v7695_v59  ;;  %vm7633_vm11 = vcmp.gt.f32.partialorder %v7601_v36, 0.0  ;;  %v7665_v10 = vmul.f32 0.01, %v7601_v36  ;;  %v7570_v28 = vsel %vm7506_vm8, %v8612_v53, %v7538_v61  ;;  %v8614_v58 = vadd.f32 %v7462_v14, %v11443_v24  ;;  %v7466_v49 = vpop.f32.mrb[56].mxu1 }
 0x680   :  { %v7696_v21 = vsel %vm7632_vm10, %v7600_v45, %v7664_v55  ;;  %v7602_v27 = vadd.f32 %v7570_v28, %v11607_v5  ;;  %vm7507_vm12 = vcmp.gt.f32.partialorder %v8613_v2, 0.0  ;;  %v7539_v32 = vmul.f32 0.01, %v8613_v2  ;;  %v7468_v7 = vpop.f32.mrb[57].mxu1 }
 0x681   :  { %7728 = vst [vmem:[#allocation9 + $0x98] sm:$0xff] %v7696_v21  ;;  %v7697_v3 = vsel %vm7633_vm11, %v7601_v36, %v7665_v10  ;;  %vm7508_vm13 = vcmp.gt.f32.partialorder %v8614_v58, 0.0  ;;  %v7540_v20 = vmul.f32 0.01, %v8614_v58  ;;  %v8615_v16 = vadd.f32 %v7466_v49, %v11440_v41  ;;  %v7470_v23 = vpop.f32.mrb[58].mxu1 }
 0x682   :  { %7729 = vst [vmem:[#allocation9 + $0xa0] sm:$0xff] %v7697_v3  ;;  %vm7634_vm1 = vcmp.gt.f32.partialorder %v7602_v27, 0.0  ;;  %v7666_v63 = vmul.f32 0.01, %v7602_v27  ;;  %v7571_v18 = vsel %vm7507_vm12, %v8613_v2, %v7539_v32  ;;  %v8616_v51 = vadd.f32 %v7468_v7, %v11443_v24  ;;  %v7472_v60 = vpop.f32.mrb[59].mxu1  ;;  %v11614_v2 = vld [vmem:[#allocation31_spill] sm:$0xff] }
 0x683   :  { %v7603_v38 = vadd.f32 %v7571_v18, %v11608_v0  ;;  %v7572_v19 = vsel %vm7508_vm13, %v8614_v58, %v7540_v20  ;;  %vm7509_vm0 = vcmp.gt.f32.partialorder %v8615_v16, 0.0  ;;  %v7541_v37 = vmul.f32 0.01, %v8615_v16  ;;  %v11616_v3 = vld [vmem:[#allocation33_spill] sm:$0xff] }
 0x684   :  { %v7698_v57 = vsel %vm7634_vm1, %v7602_v27, %v7666_v63  ;;  %v7604_v42 = vadd.f32 %v7572_v19, %v11609_v44  ;;  %vm7510_vm2 = vcmp.gt.f32.partialorder %v8616_v51, 0.0  ;;  %v7542_v43 = vmul.f32 0.01, %v8616_v51  ;;  %v11615_v27 = vld [vmem:[#allocation32_spill] sm:$0xff] }
 0x685   :  { %7730 = vst [vmem:[#allocation9 + $0xa8] sm:$0xff] %v7698_v57  ;;  %vm7635_vm6 = vcmp.gt.f32.partialorder %v7603_v38, 0.0  ;;  %v7667_v22 = vmul.f32 0.01, %v7603_v38  ;;  %v7573_v12 = vsel %vm7509_vm0, %v8615_v16, %v7541_v37  ;;  %v8617_v13 = vadd.f32 %v7470_v23, %v11440_v41 }
 0x686   :  { %vm7636_vm14 = vcmp.gt.f32.partialorder %v7604_v42, 0.0  ;;  %v7668_v62 = vmul.f32 0.01, %v7604_v42  ;;  %v7605_v56 = vadd.f32 %v7573_v12, %v11610_v52  ;;  %v7574_v48 = vsel %vm7510_vm2, %v8616_v51, %v7542_v43 }
 0x687   :  { %v7699_v25 = vsel %vm7635_vm6, %v7603_v38, %v7667_v22  ;;  %v7606_v30 = vadd.f32 %v7574_v48, %v11611_v15  ;;  %vm7511_vm15 = vcmp.gt.f32.partialorder %v8617_v13, 0.0  ;;  %v7543_v9 = vmul.f32 0.01, %v8617_v13  ;;  %v7476_v33 = vpop.f32.mrb[60].mxu1 }
 0x688   :  { %7731 = vst [vmem:[#allocation9 + $0xb0] sm:$0xff] %v7699_v25  ;;  %v7700_v1 = vsel %vm7636_vm14, %v7604_v42, %v7668_v62  ;;  %vm7637_vm5 = vcmp.gt.f32.partialorder %v7605_v56, 0.0  ;;  %v7669_v29 = vmul.f32 0.01, %v7605_v56  ;;  %v8618_v31 = vadd.f32 %v7472_v60, %v11443_v24  ;;  %v7478_v6 = vpop.f32.mrb[61].mxu1 }
 0x689   :  { %7732 = vst [vmem:[#allocation9 + $0xb8] sm:$0xff] %v7700_v1  ;;  %vm7638_vm9 = vcmp.gt.f32.partialorder %v7606_v30, 0.0  ;;  %v7670_v11 = vmul.f32 0.01, %v7606_v30  ;;  %v7575_v50 = vsel %vm7511_vm15, %v8617_v13, %v7543_v9  ;;  %v8619_v17 = vadd.f32 %v7476_v33, %v11440_v41  ;;  %v7480_v46 = vpop.f32.mrb[62].mxu1 }
 0x68a   :  { %v7701_v4 = vsel %vm7637_vm5, %v7605_v56, %v7669_v29  ;;  %v7607_v14 = vadd.f32 %v7575_v50, %v11612_v47  ;;  %vm7512_vm3 = vcmp.gt.f32.partialorder %v8618_v31, 0.0  ;;  %v7544_v39 = vmul.f32 0.01, %v8618_v31  ;;  %v7482_v35 = vpop.f32.mrb[63].mxu1 }
 0x68b   :  { %7733 = vst [vmem:[#allocation9 + $0xc0] sm:$0xff] %v7701_v4  ;;  %v7702_v53 = vsel %vm7638_vm9, %v7606_v30, %v7670_v11  ;;  %vm7513_vm4 = vcmp.gt.f32.partialorder %v8619_v17, 0.0  ;;  %v7545_v34 = vmul.f32 0.01, %v8619_v17  ;;  %v8620_v40 = vadd.f32 %v7478_v6, %v11443_v24 }
 0x68c   :  { %7734 = vst [vmem:[#allocation9 + $0xc8] sm:$0xff] %v7702_v53  ;;  %vm7639_vm7 = vcmp.gt.f32.partialorder %v7607_v14, 0.0  ;;  %v7671_v45 = vmul.f32 0.01, %v7607_v14  ;;  %v7576_v54 = vsel %vm7512_vm3, %v8618_v31, %v7544_v39  ;;  %v8621_v8 = vadd.f32 %v7480_v46, %v11440_v41 }
 0x68d   :  { %v7608_v36 = vadd.f32 %v7576_v54, %v11613_v26  ;;  %v7577_v61 = vsel %vm7513_vm4, %v8619_v17, %v7545_v34  ;;  %vm7514_vm8 = vcmp.gt.f32.partialorder %v8620_v40, 0.0  ;;  %v7546_v59 = vmul.f32 0.01, %v8620_v40 }
 0x68e   :  { %v7703_v55 = vsel %vm7639_vm7, %v7607_v14, %v7671_v45  ;;  %v7609_v10 = vadd.f32 %v7577_v61, %v11614_v2  ;;  %vm7515_vm10 = vcmp.gt.f32.partialorder %v8621_v8, 0.0  ;;  %v7547_v28 = vmul.f32 0.01, %v8621_v8 }
 0x68f   :  { %7735 = vst [vmem:[#allocation9 + $0xd0] sm:$0xff] %v7703_v55  ;;  %vm7640_vm11 = vcmp.gt.f32.partialorder %v7608_v36, 0.0  ;;  %v7672_v58 = vmul.f32 0.01, %v7608_v36  ;;  %v7578_v49 = vsel %vm7514_vm8, %v8620_v40, %v7546_v59  ;;  %v8622_v21 = vadd.f32 %v7482_v35, %v11443_v24  ;;  %v11617_v24 = vld [vmem:[#allocation34_spill] sm:$0xff] }
 0x690   :  { %vm7641_vm12 = vcmp.gt.f32.partialorder %v7609_v10, 0.0  ;;  %v7673_v5 = vmul.f32 0.01, %v7609_v10  ;;  %v7610_v41 = vadd.f32 %v7578_v49, %v11615_v27  ;;  %v7579_v32 = vsel %vm7515_vm10, %v8621_v8, %v7547_v28 }
 0x691   :  { %v7704_v7 = vsel %vm7640_vm11, %v7608_v36, %v7672_v58  ;;  %v7611_v20 = vadd.f32 %v7579_v32, %v11616_v3  ;;  %vm7516_vm13 = vcmp.gt.f32.partialorder %v8622_v21, 0.0  ;;  %v7548_v16 = vmul.f32 0.01, %v8622_v21 }
 0x692   :  { %7736 = vst [vmem:[#allocation9 + $0xd8] sm:$0xff] %v7704_v7  ;;  %v7705_v23 = vsel %vm7641_vm12, %v7609_v10, %v7673_v5  ;;  %vm7642_vm1 = vcmp.gt.f32.partialorder %v7610_v41, 0.0  ;;  %v7674_v63 = vmul.f32 0.01, %v7610_v41 }
 0x693   :  { %7737 = vst [vmem:[#allocation9 + $0xe0] sm:$0xff] %v7705_v23  ;;  %vm7643_vm0 = vcmp.gt.f32.partialorder %v7611_v20, 0.0  ;;  %v7675_v18 = vmul.f32 0.01, %v7611_v20  ;;  %v7580_v51 = vsel %vm7516_vm13, %v8622_v21, %v7548_v16 }
 0x694   :  { %v7706_v60 = vsel %vm7642_vm1, %v7610_v41, %v7674_v63  ;;  %v7612_v0 = vadd.f32 %v7580_v51, %v11617_v24 }
 0x695   :  { %7738 = vst [vmem:[#allocation9 + $0xe8] sm:$0xff] %v7706_v60  ;;  %v7707_v38 = vsel %vm7643_vm0, %v7611_v20, %v7675_v18 }
 0x696   :  { %7739 = vst [vmem:[#allocation9 + $0xf0] sm:$0xff] %v7707_v38  ;;  %vm7644_vm2 = vcmp.gt.f32.partialorder %v7612_v0, 0.0  ;;  %v7676_v19 = vmul.f32 0.01, %v7612_v0 }
 0x698   :  { %v7708_v37 = vsel %vm7644_vm2, %v7612_v0, %v7676_v19 }
 0x699   :  { %7740 = vst [vmem:[#allocation9 + $0xf8] sm:$0xff] %v7708_v37 }
 0x69a   :  { %9581 = shalt.err (!%p9578_p0)
}
 0x69b   :  { %s9582_s29 = scalar_lea.hbm %s11527_s3, 4096 }
 0x69c   :  { %p9583_p1 = scmp.ne.s32.totalorder %s11527_s3, %s9582_s29  ;;  %p9586_p2 = scmp.lt.u32.totalorder %s9582_s29, %s11527_s3 }
 0x69e   :  { %p9588_p3 = pnand %p9586_p2, %p9583_p1 }
 0x6a0   :  { %9591 = shalt.err (!%p9588_p3)
}
 0x6a1   :  { %7752 = dma.vmem_to_hbm [thread:$0]  %s7747_s25, 4096, %s11527_s3, [#allocation5], %s9602_s1, %s9602_s1, %s9603_s9  }
 0x6a2   :  { %9596 = dma.done.wait [#allocation5], 4096  }
 0x6a3   :  { %9597 = vsyncadd [#allocation5], 4294963200 }
 0x6a4   :  { %7756 = vsyncpa [#allocation4], 1 }
 0x6a5   :  { %7757 = vsyncpa [#allocation7], 1 }
 0x6a6   :  { %7758 = vsyncpa [#allocation5], 1 }

</bundles_post_ra>
